<compile_context>
chip_gen: v7x
topology: tpu7x:2x2x1
jax: 0.10.0
libtpu: 0.0.40
codegen_flags: <defaults>
</compile_context>

<pallas_src>
import jax
import jax.numpy as jnp
from jax.experimental import pallas as pl
from jax.experimental.pallas import tpu as pltpu

DIM = 8                 # adapter bottleneck dim (module default)
HID = 768               # hidden size hard-coded in the module
GRID = 14               # 14x14 patch grid hard-coded in the module
NTOK = 1 + GRID * GRID  # 197 tokens (cls + patches)
K = 7                   # depthwise conv kernel size
PAD = 3                 # conv padding
LANES = 256             # padded token axis inside the kernel (>= NTOK + 45)
CTR = PAD * K + PAD     # center tap index (ki=3, kj=3) -> 24


def _erf(x):
    # Abramowitz & Stegun 7.1.26 rational approximation (|err| < 1.5e-7), so the
    # exact (erf-based) GELU of F.gelu lowers with plain VPU/EUP ops.
    a1, a2, a3, a4, a5 = 0.254829592, -0.284496736, 1.421413741, -1.453152027, 1.061405429
    p = 0.3275911
    sgn = jnp.where(x < 0.0, -1.0, 1.0)
    ax = jnp.abs(x)
    t = 1.0 / (1.0 + p * ax)
    poly = ((((a5 * t + a4) * t + a3) * t + a2) * t + a1) * t
    return sgn * (1.0 - poly * jnp.exp(-ax * ax))


def _gelu_exact(x):
    return 0.5 * x * (1.0 + _erf(x * 0.7071067811865476))


def lka_vit_kernel(x_ref, wd_ref, bd_ref, wc_ref, bc_ref, wu_ref, bu_ref,
                   cm_ref, o_ref, buf_ref):
    f32 = jnp.float32

    # 1) adapter_down, produced directly in the transposed (dim, tokens) layout:
    #    xt[d, t] = sum_c Wd[d, c] * x[t, c] + bd[d].  x is cast to f32 at the
    #    DMA boundary; all accumulation is f32.
    x32 = x_ref[0].astype(f32)                               # (197, 768)
    xt = jax.lax.dot_general(
        wd_ref[...], x32, (((1,), (1,)), ((), ())),
        preferred_element_type=f32) + bd_ref[...]            # (dim, 197)

    # Widen to a 256-lane buffer: token t at lane t, lanes 197..255 zero.  Only
    # the pad lanes are re-zeroed (one masked store); doing it every step keeps
    # the per-core scratch safe under megacore grid sharding.
    buf_ref[:, NTOK:] = jnp.zeros((DIM, LANES - NTOK), f32)
    buf_ref[:, 0:NTOK] = xt
    src = buf_ref[...]                                       # (dim, 256)

    wc = wc_ref[...]                                         # (dim, 49)

    # 2) depthwise 7x7 conv (stride 1, pad 3, groups=dim) on the 14x14 patch
    #    grid.  Tap (di, dj) is a constant flat shift s = di*14 + dj along the
    #    token lane axis, realized with pltpu.roll; the per-dj column mask
    #    (hoisted out of the di loop) removes horizontal wrap-around, the cls
    #    lane and the pad lanes.  Accumulation stays in registers (2 vregs).
    acc = jnp.zeros(src.shape, f32)
    for dj in range(-PAD, PAD + 1):
        xm = src * cm_ref[dj + PAD:dj + PAD + 1, :]          # (dim, 256)
        for di in range(-PAD, PAD + 1):
            s = di * GRID + dj                               # flat token shift
            k = (di + PAD) * K + (dj + PAD)                  # 7x7 tap index
            w = wc[:, k:k + 1]                               # (dim, 1) per-channel weight
            # shifted[l] = xm[(l + s) % 256]  (jnp.roll semantics)
            shifted = xm if s == 0 else pltpu.roll(xm, (-s) % LANES, axis=1)
            acc = acc + w * shifted
    acc = acc + bc_ref[...]                                  # conv bias

    # cls token: conv of a 1x1 zero-padded image -> only the center tap.
    cls_val = bc_ref[...] + wc[:, CTR:CTR + 1] * xt[:, 0:1]  # (dim, 1)
    lane = jax.lax.broadcasted_iota(jnp.int32, acc.shape, 1)
    acc = jnp.where(lane == 0, cls_val, acc)

    # 3) exact (erf-based) GELU, matching F.gelu's default.
    # TODO(synk): nn.Dropout(0.1) is identity at inference; training-mode RNG
    # masking is not implemented here.
    h_t = _gelu_exact(acc)                                   # (dim, 256)

    # 4) fused "transpose back + adapter_up": contract the dim axis of both
    #    operands in one MXU pass -> token-major (256, 768); rows 197..255 are
    #    garbage and are never stored.  Single lane-dense output store.
    out256 = jax.lax.dot_general(
        h_t, wu_ref[...], (((0,), (0,)), ((), ())),
        preferred_element_type=f32)                          # (256, 768)
    out = out256[0:NTOK, :] + bu_ref[...]                    # (197, 768)
    o_ref[0] = out.astype(o_ref.dtype)


def lka_vit_forward(x, params):
    B, N, C = x.shape
    assert N == NTOK and C == HID, "module hard-codes 197 tokens x 768 hidden"
    wd, bd, wc, bc, wu, bu, colmask = (
        params[k] for k in ("wd", "bd", "wc", "bc", "wu", "bu", "colmask"))
    dim = wd.shape[0]

    itemsize = jnp.dtype(x.dtype).itemsize
    weight_bytes = sum(int(p.size) * 4 for p in (wd, bd, wc, bc, wu, bu, colmask))
    cost = pl.CostEstimate(
        flops=int(B * (2 * NTOK * HID * dim          # adapter_down
                       + 2 * NTOK * dim * K * K      # depthwise 7x7 conv
                       + 2 * NTOK * dim * HID)),     # adapter_up
        transcendentals=int(B * dim * LANES),        # exp inside the erf approx
        bytes_accessed=int(2 * B * N * C * itemsize + weight_bytes))

    return pl.pallas_call(
        lka_vit_kernel,
        out_shape=jax.ShapeDtypeStruct((B, N, C), x.dtype),
        grid_spec=pltpu.PrefetchScalarGridSpec(
            num_scalar_prefetch=0,
            grid=(B,),
            in_specs=[
                pl.BlockSpec((1, N, C), lambda b: (b, 0, 0)),        # x (caller dtype)
                pl.BlockSpec((dim, C), lambda b: (0, 0)),            # adapter_down.weight
                pl.BlockSpec((dim, 1), lambda b: (0, 0)),            # adapter_down.bias
                pl.BlockSpec((dim, K * K), lambda b: (0, 0)),        # depthwise conv weight
                pl.BlockSpec((dim, 1), lambda b: (0, 0)),            # conv bias
                pl.BlockSpec((dim, C), lambda b: (0, 0)),            # adapter_up.weight (transposed)
                pl.BlockSpec((1, C), lambda b: (0, 0)),              # adapter_up.bias
                pl.BlockSpec((K, LANES), lambda b: (0, 0)),          # per-dj column masks
            ],
            out_specs=pl.BlockSpec((1, N, C), lambda b: (b, 0, 0)),
            scratch_shapes=[pltpu.VMEM((dim, LANES), jnp.float32)],
        ),
        compiler_params=pltpu.CompilerParams(dimension_semantics=("parallel",)),
        cost_estimate=cost,
    )(x, wd, bd, wc, bc, wu, bu, colmask)


def init_params(key):
    ks = jax.random.split(key, 6)
    # PyTorch parameter shapes and the layout used here:
    #   adapter_down.weight (dim, 768)     -> wd (dim, 768)   (used as-is)
    #   adapter_down.bias   (dim,)         -> bd (dim, 1)
    #   adapter_conv.weight (dim, 1, 7, 7) -> wc (dim, 49), column = ki*7 + kj
    #   adapter_conv.bias   (dim,)         -> bc (dim, 1)
    #   adapter_up.weight   (768, dim)     -> wu (dim, 768)   (stored transposed)
    #   adapter_up.bias     (768,)         -> bu (1, 768)
    wd = jax.random.normal(ks[0], (DIM, HID), jnp.float32) * 0.02
    bd = jax.random.normal(ks[1], (DIM, 1), jnp.float32) * 0.02
    conv_w = jax.random.normal(ks[2], (DIM, 1, K, K), jnp.float32) * 0.05
    wc = conv_w.reshape(DIM, K * K)
    bc = jax.random.normal(ks[3], (DIM, 1), jnp.float32) * 0.02
    wu = jax.random.normal(ks[4], (DIM, HID), jnp.float32) * 0.02
    bu = jax.random.normal(ks[5], (1, HID), jnp.float32) * 0.02

    # colmask[dj+3, lane] = 1 where `lane` holds a patch token whose column can
    # legally feed a tap with horizontal offset dj (0 <= col - dj < 14).  It is
    # 0 on the cls lane (0) and on the pad lanes (197..255).
    lane = jnp.arange(LANES)
    is_patch = (lane >= 1) & (lane <= GRID * GRID)
    col = (lane - 1) % GRID
    dj = jnp.arange(-PAD, PAD + 1)
    ok = ((col[None, :] - dj[:, None]) >= 0) & ((col[None, :] - dj[:, None]) <= GRID - 1)
    colmask = (is_patch[None, :] & ok).astype(jnp.float32)            # (7, 256)

    return dict(wd=wd, bd=bd, wc=wc, bc=bc, wu=wu, bu=bu, colmask=colmask)


if __name__ == "__main__":
    key = jax.random.PRNGKey(0)
    pkey, xkey = jax.random.split(key)
    params = init_params(pkey)
    B = 2
    # bf16 I/O (the kernel is HBM-bound); internal math stays f32.
    x = jax.random.normal(xkey, (B, NTOK, HID), jnp.float32).astype(jnp.bfloat16)
    y = lka_vit_forward(x, params)
    y = jax.block_until_ready(y)
    assert y.shape == (B, NTOK, HID) and y.dtype == jnp.bfloat16
    print("KERNEL_OK")
</pallas_src>

<mosaic_0001>
module attributes {stable_mosaic.version = 11 : i64} {
  func.func @lka_vit_kernel(%arg0: i32, %arg1: memref<1x197x768xbf16, #tpu.memory_space<vmem>>, %arg2: memref<8x768xf32, #tpu.memory_space<vmem>>, %arg3: memref<8x1xf32, #tpu.memory_space<vmem>>, %arg4: memref<8x49xf32, #tpu.memory_space<vmem>>, %arg5: memref<8x1xf32, #tpu.memory_space<vmem>>, %arg6: memref<8x768xf32, #tpu.memory_space<vmem>>, %arg7: memref<1x768xf32, #tpu.memory_space<vmem>>, %arg8: memref<7x256xf32, #tpu.memory_space<vmem>>, %arg9: memref<1x197x768xbf16, #tpu.memory_space<vmem>>, %arg10: memref<8x256xf32, #tpu.memory_space<vmem>>) attributes {dimension_semantics = [#tpu.dimension_semantics<parallel>], iteration_bounds = array<i64: 2>, scalar_prefetch = 0 : i64, scratch_operands = 1 : i64, tpu.core_type = #tpu.core_type<tc>, window_params = [{transform_indices = @transform_0, window_bounds = array<i64: 1, 197, 768>}, {pipeline_mode = #tpu.pipeline_mode<synchronous>, transform_indices = @transform_1, window_bounds = array<i64: 8, 768>}, {pipeline_mode = #tpu.pipeline_mode<synchronous>, transform_indices = @transform_2, window_bounds = array<i64: 8, 1>}, {pipeline_mode = #tpu.pipeline_mode<synchronous>, transform_indices = @transform_3, window_bounds = array<i64: 8, 49>}, {pipeline_mode = #tpu.pipeline_mode<synchronous>, transform_indices = @transform_4, window_bounds = array<i64: 8, 1>}, {pipeline_mode = #tpu.pipeline_mode<synchronous>, transform_indices = @transform_5, window_bounds = array<i64: 8, 768>}, {pipeline_mode = #tpu.pipeline_mode<synchronous>, transform_indices = @transform_6, window_bounds = array<i64: 1, 768>}, {pipeline_mode = #tpu.pipeline_mode<synchronous>, transform_indices = @transform_7, window_bounds = array<i64: 7, 256>}, {transform_indices = @transform_8, window_bounds = array<i64: 1, 197, 768>}]} {
    %c0 = arith.constant 0 : index
    %c0_0 = arith.constant 0 : index
    %c0_1 = arith.constant 0 : index
    %0 = vector.load %arg1[%c0, %c0_0, %c0_1] : memref<1x197x768xbf16, #tpu.memory_space<vmem>>, vector<1x197x768xbf16>
    %1 = vector.shape_cast %0 : vector<1x197x768xbf16> to vector<197x768xbf16>
    %2 = arith.extf %1 : vector<197x768xbf16> to vector<197x768xf32>
    %c0_2 = arith.constant 0 : index
    %c0_3 = arith.constant 0 : index
    %3 = vector.load %arg2[%c0_2, %c0_3] : memref<8x768xf32, #tpu.memory_space<vmem>>, vector<8x768xf32>
    %cst = arith.constant dense<0.000000e+00> : vector<8x197xf32>
    %4 = tpu.matmul %3, %2, %cst {dimension_numbers = #tpu.dot_dimension_numbers<[1], [1], [0], [0], [0, 0, 1, 0], [], []>} : vector<8x768xf32>, vector<197x768xf32>, vector<8x197xf32> -> vector<8x197xf32>
    %c0_4 = arith.constant 0 : index
    %c0_5 = arith.constant 0 : index
    %5 = vector.load %arg3[%c0_4, %c0_5] : memref<8x1xf32, #tpu.memory_space<vmem>>, vector<8x1xf32>
    %6 = vector.broadcast %5 : vector<8x1xf32> to vector<8x197xf32>
    %7 = arith.addf %4, %6 : vector<8x197xf32>
    %cst_6 = arith.constant 0.000000e+00 : f32
    %8 = vector.broadcast %cst_6 : f32 to vector<8x59xf32>
    %c0_7 = arith.constant 0 : index
    %c197 = arith.constant 197 : index
    %9 = vector.load %arg10[%c0_7, %c197] : memref<8x256xf32, #tpu.memory_space<vmem>>, vector<8x59xf32>
    tpu.vector_store %arg10[%c0_7, %c197], %8 {strides = array<i32>} : memref<8x256xf32, #tpu.memory_space<vmem>>, vector<8x59xf32>,
    %c0_8 = arith.constant 0 : index
    %c0_9 = arith.constant 0 : index
    %10 = vector.load %arg10[%c0_8, %c0_9] : memref<8x256xf32, #tpu.memory_space<vmem>>, vector<8x197xf32>
    tpu.vector_store %arg10[%c0_8, %c0_9], %7 {strides = array<i32>} : memref<8x256xf32, #tpu.memory_space<vmem>>, vector<8x197xf32>,
    %c0_10 = arith.constant 0 : index
    %c0_11 = arith.constant 0 : index
    %11 = vector.load %arg10[%c0_10, %c0_11] : memref<8x256xf32, #tpu.memory_space<vmem>>, vector<8x256xf32>
    %c0_12 = arith.constant 0 : index
    %c0_13 = arith.constant 0 : index
    %12 = vector.load %arg4[%c0_12, %c0_13] : memref<8x49xf32, #tpu.memory_space<vmem>>, vector<8x49xf32>
    %cst_14 = arith.constant 0.000000e+00 : f32
    %13 = vector.broadcast %cst_14 : f32 to vector<8x256xf32>
    %c0_15 = arith.constant 0 : index
    %c0_16 = arith.constant 0 : index
    %14 = vector.load %arg8[%c0_15, %c0_16] : memref<7x256xf32, #tpu.memory_space<vmem>>, vector<1x256xf32>
    %15 = vector.broadcast %14 : vector<1x256xf32> to vector<8x256xf32>
    %16 = arith.mulf %11, %15 : vector<8x256xf32>
    %17 = vector.extract_strided_slice %12 {offsets = [0, 0], sizes = [8, 1], strides = [1, 1]} : vector<8x49xf32> to vector<8x1xf32>
    %c45_i32 = arith.constant 45 : i32
    %18 = tpu.dynamic_rotate %16 by %c45_i32 dim 1 : vector<8x256xf32>, i32 -> vector<8x256xf32>
    %19 = vector.broadcast %17 : vector<8x1xf32> to vector<8x256xf32>
    %20 = arith.mulf %19, %18 : vector<8x256xf32>
    %21 = arith.addf %13, %20 : vector<8x256xf32>
    %22 = vector.extract_strided_slice %12 {offsets = [0, 7], sizes = [8, 1], strides = [1, 1]} : vector<8x49xf32> to vector<8x1xf32>
    %c31_i32 = arith.constant 31 : i32
    %23 = tpu.dynamic_rotate %16 by %c31_i32 dim 1 : vector<8x256xf32>, i32 -> vector<8x256xf32>
    %24 = vector.broadcast %22 : vector<8x1xf32> to vector<8x256xf32>
    %25 = arith.mulf %24, %23 : vector<8x256xf32>
    %26 = arith.addf %21, %25 : vector<8x256xf32>
    %27 = vector.extract_strided_slice %12 {offsets = [0, 14], sizes = [8, 1], strides = [1, 1]} : vector<8x49xf32> to vector<8x1xf32>
    %c17_i32 = arith.constant 17 : i32
    %28 = tpu.dynamic_rotate %16 by %c17_i32 dim 1 : vector<8x256xf32>, i32 -> vector<8x256xf32>
    %29 = vector.broadcast %27 : vector<8x1xf32> to vector<8x256xf32>
    %30 = arith.mulf %29, %28 : vector<8x256xf32>
    %31 = arith.addf %26, %30 : vector<8x256xf32>
    %32 = vector.extract_strided_slice %12 {offsets = [0, 21], sizes = [8, 1], strides = [1, 1]} : vector<8x49xf32> to vector<8x1xf32>
    %c3_i32 = arith.constant 3 : i32
    %33 = tpu.dynamic_rotate %16 by %c3_i32 dim 1 : vector<8x256xf32>, i32 -> vector<8x256xf32>
    %34 = vector.broadcast %32 : vector<8x1xf32> to vector<8x256xf32>
    %35 = arith.mulf %34, %33 : vector<8x256xf32>
    %36 = arith.addf %31, %35 : vector<8x256xf32>
    %37 = vector.extract_strided_slice %12 {offsets = [0, 28], sizes = [8, 1], strides = [1, 1]} : vector<8x49xf32> to vector<8x1xf32>
    %c245_i32 = arith.constant 245 : i32
    %38 = tpu.dynamic_rotate %16 by %c245_i32 dim 1 : vector<8x256xf32>, i32 -> vector<8x256xf32>
    %39 = vector.broadcast %37 : vector<8x1xf32> to vector<8x256xf32>
    %40 = arith.mulf %39, %38 : vector<8x256xf32>
    %41 = arith.addf %36, %40 : vector<8x256xf32>
    %42 = vector.extract_strided_slice %12 {offsets = [0, 35], sizes = [8, 1], strides = [1, 1]} : vector<8x49xf32> to vector<8x1xf32>
    %c231_i32 = arith.constant 231 : i32
    %43 = tpu.dynamic_rotate %16 by %c231_i32 dim 1 : vector<8x256xf32>, i32 -> vector<8x256xf32>
    %44 = vector.broadcast %42 : vector<8x1xf32> to vector<8x256xf32>
    %45 = arith.mulf %44, %43 : vector<8x256xf32>
    %46 = arith.addf %41, %45 : vector<8x256xf32>
    %47 = vector.extract_strided_slice %12 {offsets = [0, 42], sizes = [8, 1], strides = [1, 1]} : vector<8x49xf32> to vector<8x1xf32>
    %c217_i32 = arith.constant 217 : i32
    %48 = tpu.dynamic_rotate %16 by %c217_i32 dim 1 : vector<8x256xf32>, i32 -> vector<8x256xf32>
    %49 = vector.broadcast %47 : vector<8x1xf32> to vector<8x256xf32>
    %50 = arith.mulf %49, %48 : vector<8x256xf32>
    %51 = arith.addf %46, %50 : vector<8x256xf32>
    %c1 = arith.constant 1 : index
    %c0_17 = arith.constant 0 : index
    %52 = vector.load %arg8[%c1, %c0_17] : memref<7x256xf32, #tpu.memory_space<vmem>>, vector<1x256xf32>
    %53 = vector.broadcast %52 : vector<1x256xf32> to vector<8x256xf32>
    %54 = arith.mulf %11, %53 : vector<8x256xf32>
    %55 = vector.extract_strided_slice %12 {offsets = [0, 1], sizes = [8, 1], strides = [1, 1]} : vector<8x49xf32> to vector<8x1xf32>
    %c44_i32 = arith.constant 44 : i32
    %56 = tpu.dynamic_rotate %54 by %c44_i32 dim 1 : vector<8x256xf32>, i32 -> vector<8x256xf32>
    %57 = vector.broadcast %55 : vector<8x1xf32> to vector<8x256xf32>
    %58 = arith.mulf %57, %56 : vector<8x256xf32>
    %59 = arith.addf %51, %58 : vector<8x256xf32>
    %60 = vector.extract_strided_slice %12 {offsets = [0, 8], sizes = [8, 1], strides = [1, 1]} : vector<8x49xf32> to vector<8x1xf32>
    %c30_i32 = arith.constant 30 : i32
    %61 = tpu.dynamic_rotate %54 by %c30_i32 dim 1 : vector<8x256xf32>, i32 -> vector<8x256xf32>
    %62 = vector.broadcast %60 : vector<8x1xf32> to vector<8x256xf32>
    %63 = arith.mulf %62, %61 : vector<8x256xf32>
    %64 = arith.addf %59, %63 : vector<8x256xf32>
    %65 = vector.extract_strided_slice %12 {offsets = [0, 15], sizes = [8, 1], strides = [1, 1]} : vector<8x49xf32> to vector<8x1xf32>
    %c16_i32 = arith.constant 16 : i32
    %66 = tpu.dynamic_rotate %54 by %c16_i32 dim 1 : vector<8x256xf32>, i32 -> vector<8x256xf32>
    %67 = vector.broadcast %65 : vector<8x1xf32> to vector<8x256xf32>
    %68 = arith.mulf %67, %66 : vector<8x256xf32>
    %69 = arith.addf %64, %68 : vector<8x256xf32>
    %70 = vector.extract_strided_slice %12 {offsets = [0, 22], sizes = [8, 1], strides = [1, 1]} : vector<8x49xf32> to vector<8x1xf32>
    %c2_i32 = arith.constant 2 : i32
    %71 = tpu.dynamic_rotate %54 by %c2_i32 dim 1 : vector<8x256xf32>, i32 -> vector<8x256xf32>
    %72 = vector.broadcast %70 : vector<8x1xf32> to vector<8x256xf32>
    %73 = arith.mulf %72, %71 : vector<8x256xf32>
    %74 = arith.addf %69, %73 : vector<8x256xf32>
    %75 = vector.extract_strided_slice %12 {offsets = [0, 29], sizes = [8, 1], strides = [1, 1]} : vector<8x49xf32> to vector<8x1xf32>
    %c244_i32 = arith.constant 244 : i32
    %76 = tpu.dynamic_rotate %54 by %c244_i32 dim 1 : vector<8x256xf32>, i32 -> vector<8x256xf32>
    %77 = vector.broadcast %75 : vector<8x1xf32> to vector<8x256xf32>
    %78 = arith.mulf %77, %76 : vector<8x256xf32>
    %79 = arith.addf %74, %78 : vector<8x256xf32>
    %80 = vector.extract_strided_slice %12 {offsets = [0, 36], sizes = [8, 1], strides = [1, 1]} : vector<8x49xf32> to vector<8x1xf32>
    %c230_i32 = arith.constant 230 : i32
    %81 = tpu.dynamic_rotate %54 by %c230_i32 dim 1 : vector<8x256xf32>, i32 -> vector<8x256xf32>
    %82 = vector.broadcast %80 : vector<8x1xf32> to vector<8x256xf32>
    %83 = arith.mulf %82, %81 : vector<8x256xf32>
    %84 = arith.addf %79, %83 : vector<8x256xf32>
    %85 = vector.extract_strided_slice %12 {offsets = [0, 43], sizes = [8, 1], strides = [1, 1]} : vector<8x49xf32> to vector<8x1xf32>
    %c216_i32 = arith.constant 216 : i32
    %86 = tpu.dynamic_rotate %54 by %c216_i32 dim 1 : vector<8x256xf32>, i32 -> vector<8x256xf32>
    %87 = vector.broadcast %85 : vector<8x1xf32> to vector<8x256xf32>
    %88 = arith.mulf %87, %86 : vector<8x256xf32>
    %89 = arith.addf %84, %88 : vector<8x256xf32>
    %c2 = arith.constant 2 : index
    %c0_18 = arith.constant 0 : index
    %90 = vector.load %arg8[%c2, %c0_18] : memref<7x256xf32, #tpu.memory_space<vmem>>, vector<1x256xf32>
    %91 = vector.broadcast %90 : vector<1x256xf32> to vector<8x256xf32>
    %92 = arith.mulf %11, %91 : vector<8x256xf32>
    %93 = vector.extract_strided_slice %12 {offsets = [0, 2], sizes = [8, 1], strides = [1, 1]} : vector<8x49xf32> to vector<8x1xf32>
    %c43_i32 = arith.constant 43 : i32
    %94 = tpu.dynamic_rotate %92 by %c43_i32 dim 1 : vector<8x256xf32>, i32 -> vector<8x256xf32>
    %95 = vector.broadcast %93 : vector<8x1xf32> to vector<8x256xf32>
    %96 = arith.mulf %95, %94 : vector<8x256xf32>
    %97 = arith.addf %89, %96 : vector<8x256xf32>
    %98 = vector.extract_strided_slice %12 {offsets = [0, 9], sizes = [8, 1], strides = [1, 1]} : vector<8x49xf32> to vector<8x1xf32>
    %c29_i32 = arith.constant 29 : i32
    %99 = tpu.dynamic_rotate %92 by %c29_i32 dim 1 : vector<8x256xf32>, i32 -> vector<8x256xf32>
    %100 = vector.broadcast %98 : vector<8x1xf32> to vector<8x256xf32>
    %101 = arith.mulf %100, %99 : vector<8x256xf32>
    %102 = arith.addf %97, %101 : vector<8x256xf32>
    %103 = vector.extract_strided_slice %12 {offsets = [0, 16], sizes = [8, 1], strides = [1, 1]} : vector<8x49xf32> to vector<8x1xf32>
    %c15_i32 = arith.constant 15 : i32
    %104 = tpu.dynamic_rotate %92 by %c15_i32 dim 1 : vector<8x256xf32>, i32 -> vector<8x256xf32>
    %105 = vector.broadcast %103 : vector<8x1xf32> to vector<8x256xf32>
    %106 = arith.mulf %105, %104 : vector<8x256xf32>
    %107 = arith.addf %102, %106 : vector<8x256xf32>
    %108 = vector.extract_strided_slice %12 {offsets = [0, 23], sizes = [8, 1], strides = [1, 1]} : vector<8x49xf32> to vector<8x1xf32>
    %c1_i32 = arith.constant 1 : i32
    %109 = tpu.dynamic_rotate %92 by %c1_i32 dim 1 : vector<8x256xf32>, i32 -> vector<8x256xf32>
    %110 = vector.broadcast %108 : vector<8x1xf32> to vector<8x256xf32>
    %111 = arith.mulf %110, %109 : vector<8x256xf32>
    %112 = arith.addf %107, %111 : vector<8x256xf32>
    %113 = vector.extract_strided_slice %12 {offsets = [0, 30], sizes = [8, 1], strides = [1, 1]} : vector<8x49xf32> to vector<8x1xf32>
    %c243_i32 = arith.constant 243 : i32
    %114 = tpu.dynamic_rotate %92 by %c243_i32 dim 1 : vector<8x256xf32>, i32 -> vector<8x256xf32>
    %115 = vector.broadcast %113 : vector<8x1xf32> to vector<8x256xf32>
    %116 = arith.mulf %115, %114 : vector<8x256xf32>
    %117 = arith.addf %112, %116 : vector<8x256xf32>
    %118 = vector.extract_strided_slice %12 {offsets = [0, 37], sizes = [8, 1], strides = [1, 1]} : vector<8x49xf32> to vector<8x1xf32>
    %c229_i32 = arith.constant 229 : i32
    %119 = tpu.dynamic_rotate %92 by %c229_i32 dim 1 : vector<8x256xf32>, i32 -> vector<8x256xf32>
    %120 = vector.broadcast %118 : vector<8x1xf32> to vector<8x256xf32>
    %121 = arith.mulf %120, %119 : vector<8x256xf32>
    %122 = arith.addf %117, %121 : vector<8x256xf32>
    %123 = vector.extract_strided_slice %12 {offsets = [0, 44], sizes = [8, 1], strides = [1, 1]} : vector<8x49xf32> to vector<8x1xf32>
    %c215_i32 = arith.constant 215 : i32
    %124 = tpu.dynamic_rotate %92 by %c215_i32 dim 1 : vector<8x256xf32>, i32 -> vector<8x256xf32>
    %125 = vector.broadcast %123 : vector<8x1xf32> to vector<8x256xf32>
    %126 = arith.mulf %125, %124 : vector<8x256xf32>
    %127 = arith.addf %122, %126 : vector<8x256xf32>
    %c3 = arith.constant 3 : index
    %c0_19 = arith.constant 0 : index
    %128 = vector.load %arg8[%c3, %c0_19] : memref<7x256xf32, #tpu.memory_space<vmem>>, vector<1x256xf32>
    %129 = vector.broadcast %128 : vector<1x256xf32> to vector<8x256xf32>
    %130 = arith.mulf %11, %129 : vector<8x256xf32>
    %131 = vector.extract_strided_slice %12 {offsets = [0, 3], sizes = [8, 1], strides = [1, 1]} : vector<8x49xf32> to vector<8x1xf32>
    %c42_i32 = arith.constant 42 : i32
    %132 = tpu.dynamic_rotate %130 by %c42_i32 dim 1 : vector<8x256xf32>, i32 -> vector<8x256xf32>
    %133 = vector.broadcast %131 : vector<8x1xf32> to vector<8x256xf32>
    %134 = arith.mulf %133, %132 : vector<8x256xf32>
    %135 = arith.addf %127, %134 : vector<8x256xf32>
    %136 = vector.extract_strided_slice %12 {offsets = [0, 10], sizes = [8, 1], strides = [1, 1]} : vector<8x49xf32> to vector<8x1xf32>
    %c28_i32 = arith.constant 28 : i32
    %137 = tpu.dynamic_rotate %130 by %c28_i32 dim 1 : vector<8x256xf32>, i32 -> vector<8x256xf32>
    %138 = vector.broadcast %136 : vector<8x1xf32> to vector<8x256xf32>
    %139 = arith.mulf %138, %137 : vector<8x256xf32>
    %140 = arith.addf %135, %139 : vector<8x256xf32>
    %141 = vector.extract_strided_slice %12 {offsets = [0, 17], sizes = [8, 1], strides = [1, 1]} : vector<8x49xf32> to vector<8x1xf32>
    %c14_i32 = arith.constant 14 : i32
    %142 = tpu.dynamic_rotate %130 by %c14_i32 dim 1 : vector<8x256xf32>, i32 -> vector<8x256xf32>
    %143 = vector.broadcast %141 : vector<8x1xf32> to vector<8x256xf32>
    %144 = arith.mulf %143, %142 : vector<8x256xf32>
    %145 = arith.addf %140, %144 : vector<8x256xf32>
    %146 = vector.extract_strided_slice %12 {offsets = [0, 24], sizes = [8, 1], strides = [1, 1]} : vector<8x49xf32> to vector<8x1xf32>
    %147 = vector.broadcast %146 : vector<8x1xf32> to vector<8x256xf32>
    %148 = arith.mulf %147, %130 : vector<8x256xf32>
    %149 = arith.addf %145, %148 : vector<8x256xf32>
    %150 = vector.extract_strided_slice %12 {offsets = [0, 31], sizes = [8, 1], strides = [1, 1]} : vector<8x49xf32> to vector<8x1xf32>
    %c242_i32 = arith.constant 242 : i32
    %151 = tpu.dynamic_rotate %130 by %c242_i32 dim 1 : vector<8x256xf32>, i32 -> vector<8x256xf32>
    %152 = vector.broadcast %150 : vector<8x1xf32> to vector<8x256xf32>
    %153 = arith.mulf %152, %151 : vector<8x256xf32>
    %154 = arith.addf %149, %153 : vector<8x256xf32>
    %155 = vector.extract_strided_slice %12 {offsets = [0, 38], sizes = [8, 1], strides = [1, 1]} : vector<8x49xf32> to vector<8x1xf32>
    %c228_i32 = arith.constant 228 : i32
    %156 = tpu.dynamic_rotate %130 by %c228_i32 dim 1 : vector<8x256xf32>, i32 -> vector<8x256xf32>
    %157 = vector.broadcast %155 : vector<8x1xf32> to vector<8x256xf32>
    %158 = arith.mulf %157, %156 : vector<8x256xf32>
    %159 = arith.addf %154, %158 : vector<8x256xf32>
    %160 = vector.extract_strided_slice %12 {offsets = [0, 45], sizes = [8, 1], strides = [1, 1]} : vector<8x49xf32> to vector<8x1xf32>
    %c214_i32 = arith.constant 214 : i32
    %161 = tpu.dynamic_rotate %130 by %c214_i32 dim 1 : vector<8x256xf32>, i32 -> vector<8x256xf32>
    %162 = vector.broadcast %160 : vector<8x1xf32> to vector<8x256xf32>
    %163 = arith.mulf %162, %161 : vector<8x256xf32>
    %164 = arith.addf %159, %163 : vector<8x256xf32>
    %c4 = arith.constant 4 : index
    %c0_20 = arith.constant 0 : index
    %165 = vector.load %arg8[%c4, %c0_20] : memref<7x256xf32, #tpu.memory_space<vmem>>, vector<1x256xf32>
    %166 = vector.broadcast %165 : vector<1x256xf32> to vector<8x256xf32>
    %167 = arith.mulf %11, %166 : vector<8x256xf32>
    %168 = vector.extract_strided_slice %12 {offsets = [0, 4], sizes = [8, 1], strides = [1, 1]} : vector<8x49xf32> to vector<8x1xf32>
    %c41_i32 = arith.constant 41 : i32
    %169 = tpu.dynamic_rotate %167 by %c41_i32 dim 1 : vector<8x256xf32>, i32 -> vector<8x256xf32>
    %170 = vector.broadcast %168 : vector<8x1xf32> to vector<8x256xf32>
    %171 = arith.mulf %170, %169 : vector<8x256xf32>
    %172 = arith.addf %164, %171 : vector<8x256xf32>
    %173 = vector.extract_strided_slice %12 {offsets = [0, 11], sizes = [8, 1], strides = [1, 1]} : vector<8x49xf32> to vector<8x1xf32>
    %c27_i32 = arith.constant 27 : i32
    %174 = tpu.dynamic_rotate %167 by %c27_i32 dim 1 : vector<8x256xf32>, i32 -> vector<8x256xf32>
    %175 = vector.broadcast %173 : vector<8x1xf32> to vector<8x256xf32>
    %176 = arith.mulf %175, %174 : vector<8x256xf32>
    %177 = arith.addf %172, %176 : vector<8x256xf32>
    %178 = vector.extract_strided_slice %12 {offsets = [0, 18], sizes = [8, 1], strides = [1, 1]} : vector<8x49xf32> to vector<8x1xf32>
    %c13_i32 = arith.constant 13 : i32
    %179 = tpu.dynamic_rotate %167 by %c13_i32 dim 1 : vector<8x256xf32>, i32 -> vector<8x256xf32>
    %180 = vector.broadcast %178 : vector<8x1xf32> to vector<8x256xf32>
    %181 = arith.mulf %180, %179 : vector<8x256xf32>
    %182 = arith.addf %177, %181 : vector<8x256xf32>
    %183 = vector.extract_strided_slice %12 {offsets = [0, 25], sizes = [8, 1], strides = [1, 1]} : vector<8x49xf32> to vector<8x1xf32>
    %c255_i32 = arith.constant 255 : i32
    %184 = tpu.dynamic_rotate %167 by %c255_i32 dim 1 : vector<8x256xf32>, i32 -> vector<8x256xf32>
    %185 = vector.broadcast %183 : vector<8x1xf32> to vector<8x256xf32>
    %186 = arith.mulf %185, %184 : vector<8x256xf32>
    %187 = arith.addf %182, %186 : vector<8x256xf32>
    %188 = vector.extract_strided_slice %12 {offsets = [0, 32], sizes = [8, 1], strides = [1, 1]} : vector<8x49xf32> to vector<8x1xf32>
    %c241_i32 = arith.constant 241 : i32
    %189 = tpu.dynamic_rotate %167 by %c241_i32 dim 1 : vector<8x256xf32>, i32 -> vector<8x256xf32>
    %190 = vector.broadcast %188 : vector<8x1xf32> to vector<8x256xf32>
    %191 = arith.mulf %190, %189 : vector<8x256xf32>
    %192 = arith.addf %187, %191 : vector<8x256xf32>
    %193 = vector.extract_strided_slice %12 {offsets = [0, 39], sizes = [8, 1], strides = [1, 1]} : vector<8x49xf32> to vector<8x1xf32>
    %c227_i32 = arith.constant 227 : i32
    %194 = tpu.dynamic_rotate %167 by %c227_i32 dim 1 : vector<8x256xf32>, i32 -> vector<8x256xf32>
    %195 = vector.broadcast %193 : vector<8x1xf32> to vector<8x256xf32>
    %196 = arith.mulf %195, %194 : vector<8x256xf32>
    %197 = arith.addf %192, %196 : vector<8x256xf32>
    %198 = vector.extract_strided_slice %12 {offsets = [0, 46], sizes = [8, 1], strides = [1, 1]} : vector<8x49xf32> to vector<8x1xf32>
    %c213_i32 = arith.constant 213 : i32
    %199 = tpu.dynamic_rotate %167 by %c213_i32 dim 1 : vector<8x256xf32>, i32 -> vector<8x256xf32>
    %200 = vector.broadcast %198 : vector<8x1xf32> to vector<8x256xf32>
    %201 = arith.mulf %200, %199 : vector<8x256xf32>
    %202 = arith.addf %197, %201 : vector<8x256xf32>
    %c5 = arith.constant 5 : index
    %c0_21 = arith.constant 0 : index
    %203 = vector.load %arg8[%c5, %c0_21] : memref<7x256xf32, #tpu.memory_space<vmem>>, vector<1x256xf32>
    %204 = vector.broadcast %203 : vector<1x256xf32> to vector<8x256xf32>
    %205 = arith.mulf %11, %204 : vector<8x256xf32>
    %206 = vector.extract_strided_slice %12 {offsets = [0, 5], sizes = [8, 1], strides = [1, 1]} : vector<8x49xf32> to vector<8x1xf32>
    %c40_i32 = arith.constant 40 : i32
    %207 = tpu.dynamic_rotate %205 by %c40_i32 dim 1 : vector<8x256xf32>, i32 -> vector<8x256xf32>
    %208 = vector.broadcast %206 : vector<8x1xf32> to vector<8x256xf32>
    %209 = arith.mulf %208, %207 : vector<8x256xf32>
    %210 = arith.addf %202, %209 : vector<8x256xf32>
    %211 = vector.extract_strided_slice %12 {offsets = [0, 12], sizes = [8, 1], strides = [1, 1]} : vector<8x49xf32> to vector<8x1xf32>
    %c26_i32 = arith.constant 26 : i32
    %212 = tpu.dynamic_rotate %205 by %c26_i32 dim 1 : vector<8x256xf32>, i32 -> vector<8x256xf32>
    %213 = vector.broadcast %211 : vector<8x1xf32> to vector<8x256xf32>
    %214 = arith.mulf %213, %212 : vector<8x256xf32>
    %215 = arith.addf %210, %214 : vector<8x256xf32>
    %216 = vector.extract_strided_slice %12 {offsets = [0, 19], sizes = [8, 1], strides = [1, 1]} : vector<8x49xf32> to vector<8x1xf32>
    %c12_i32 = arith.constant 12 : i32
    %217 = tpu.dynamic_rotate %205 by %c12_i32 dim 1 : vector<8x256xf32>, i32 -> vector<8x256xf32>
    %218 = vector.broadcast %216 : vector<8x1xf32> to vector<8x256xf32>
    %219 = arith.mulf %218, %217 : vector<8x256xf32>
    %220 = arith.addf %215, %219 : vector<8x256xf32>
    %221 = vector.extract_strided_slice %12 {offsets = [0, 26], sizes = [8, 1], strides = [1, 1]} : vector<8x49xf32> to vector<8x1xf32>
    %c254_i32 = arith.constant 254 : i32
    %222 = tpu.dynamic_rotate %205 by %c254_i32 dim 1 : vector<8x256xf32>, i32 -> vector<8x256xf32>
    %223 = vector.broadcast %221 : vector<8x1xf32> to vector<8x256xf32>
    %224 = arith.mulf %223, %222 : vector<8x256xf32>
    %225 = arith.addf %220, %224 : vector<8x256xf32>
    %226 = vector.extract_strided_slice %12 {offsets = [0, 33], sizes = [8, 1], strides = [1, 1]} : vector<8x49xf32> to vector<8x1xf32>
    %c240_i32 = arith.constant 240 : i32
    %227 = tpu.dynamic_rotate %205 by %c240_i32 dim 1 : vector<8x256xf32>, i32 -> vector<8x256xf32>
    %228 = vector.broadcast %226 : vector<8x1xf32> to vector<8x256xf32>
    %229 = arith.mulf %228, %227 : vector<8x256xf32>
    %230 = arith.addf %225, %229 : vector<8x256xf32>
    %231 = vector.extract_strided_slice %12 {offsets = [0, 40], sizes = [8, 1], strides = [1, 1]} : vector<8x49xf32> to vector<8x1xf32>
    %c226_i32 = arith.constant 226 : i32
    %232 = tpu.dynamic_rotate %205 by %c226_i32 dim 1 : vector<8x256xf32>, i32 -> vector<8x256xf32>
    %233 = vector.broadcast %231 : vector<8x1xf32> to vector<8x256xf32>
    %234 = arith.mulf %233, %232 : vector<8x256xf32>
    %235 = arith.addf %230, %234 : vector<8x256xf32>
    %236 = vector.extract_strided_slice %12 {offsets = [0, 47], sizes = [8, 1], strides = [1, 1]} : vector<8x49xf32> to vector<8x1xf32>
    %c212_i32 = arith.constant 212 : i32
    %237 = tpu.dynamic_rotate %205 by %c212_i32 dim 1 : vector<8x256xf32>, i32 -> vector<8x256xf32>
    %238 = vector.broadcast %236 : vector<8x1xf32> to vector<8x256xf32>
    %239 = arith.mulf %238, %237 : vector<8x256xf32>
    %240 = arith.addf %235, %239 : vector<8x256xf32>
    %c6 = arith.constant 6 : index
    %c0_22 = arith.constant 0 : index
    %241 = vector.load %arg8[%c6, %c0_22] : memref<7x256xf32, #tpu.memory_space<vmem>>, vector<1x256xf32>
    %242 = vector.broadcast %241 : vector<1x256xf32> to vector<8x256xf32>
    %243 = arith.mulf %11, %242 : vector<8x256xf32>
    %244 = vector.extract_strided_slice %12 {offsets = [0, 6], sizes = [8, 1], strides = [1, 1]} : vector<8x49xf32> to vector<8x1xf32>
    %c39_i32 = arith.constant 39 : i32
    %245 = tpu.dynamic_rotate %243 by %c39_i32 dim 1 : vector<8x256xf32>, i32 -> vector<8x256xf32>
    %246 = vector.broadcast %244 : vector<8x1xf32> to vector<8x256xf32>
    %247 = arith.mulf %246, %245 : vector<8x256xf32>
    %248 = arith.addf %240, %247 : vector<8x256xf32>
    %249 = vector.extract_strided_slice %12 {offsets = [0, 13], sizes = [8, 1], strides = [1, 1]} : vector<8x49xf32> to vector<8x1xf32>
    %c25_i32 = arith.constant 25 : i32
    %250 = tpu.dynamic_rotate %243 by %c25_i32 dim 1 : vector<8x256xf32>, i32 -> vector<8x256xf32>
    %251 = vector.broadcast %249 : vector<8x1xf32> to vector<8x256xf32>
    %252 = arith.mulf %251, %250 : vector<8x256xf32>
    %253 = arith.addf %248, %252 : vector<8x256xf32>
    %254 = vector.extract_strided_slice %12 {offsets = [0, 20], sizes = [8, 1], strides = [1, 1]} : vector<8x49xf32> to vector<8x1xf32>
    %c11_i32 = arith.constant 11 : i32
    %255 = tpu.dynamic_rotate %243 by %c11_i32 dim 1 : vector<8x256xf32>, i32 -> vector<8x256xf32>
    %256 = vector.broadcast %254 : vector<8x1xf32> to vector<8x256xf32>
    %257 = arith.mulf %256, %255 : vector<8x256xf32>
    %258 = arith.addf %253, %257 : vector<8x256xf32>
    %259 = vector.extract_strided_slice %12 {offsets = [0, 27], sizes = [8, 1], strides = [1, 1]} : vector<8x49xf32> to vector<8x1xf32>
    %c253_i32 = arith.constant 253 : i32
    %260 = tpu.dynamic_rotate %243 by %c253_i32 dim 1 : vector<8x256xf32>, i32 -> vector<8x256xf32>
    %261 = vector.broadcast %259 : vector<8x1xf32> to vector<8x256xf32>
    %262 = arith.mulf %261, %260 : vector<8x256xf32>
    %263 = arith.addf %258, %262 : vector<8x256xf32>
    %264 = vector.extract_strided_slice %12 {offsets = [0, 34], sizes = [8, 1], strides = [1, 1]} : vector<8x49xf32> to vector<8x1xf32>
    %c239_i32 = arith.constant 239 : i32
    %265 = tpu.dynamic_rotate %243 by %c239_i32 dim 1 : vector<8x256xf32>, i32 -> vector<8x256xf32>
    %266 = vector.broadcast %264 : vector<8x1xf32> to vector<8x256xf32>
    %267 = arith.mulf %266, %265 : vector<8x256xf32>
    %268 = arith.addf %263, %267 : vector<8x256xf32>
    %269 = vector.extract_strided_slice %12 {offsets = [0, 41], sizes = [8, 1], strides = [1, 1]} : vector<8x49xf32> to vector<8x1xf32>
    %c225_i32 = arith.constant 225 : i32
    %270 = tpu.dynamic_rotate %243 by %c225_i32 dim 1 : vector<8x256xf32>, i32 -> vector<8x256xf32>
    %271 = vector.broadcast %269 : vector<8x1xf32> to vector<8x256xf32>
    %272 = arith.mulf %271, %270 : vector<8x256xf32>
    %273 = arith.addf %268, %272 : vector<8x256xf32>
    %274 = vector.extract_strided_slice %12 {offsets = [0, 48], sizes = [8, 1], strides = [1, 1]} : vector<8x49xf32> to vector<8x1xf32>
    %c211_i32 = arith.constant 211 : i32
    %275 = tpu.dynamic_rotate %243 by %c211_i32 dim 1 : vector<8x256xf32>, i32 -> vector<8x256xf32>
    %276 = vector.broadcast %274 : vector<8x1xf32> to vector<8x256xf32>
    %277 = arith.mulf %276, %275 : vector<8x256xf32>
    %278 = arith.addf %273, %277 : vector<8x256xf32>
    %c0_23 = arith.constant 0 : index
    %c0_24 = arith.constant 0 : index
    %279 = vector.load %arg5[%c0_23, %c0_24] : memref<8x1xf32, #tpu.memory_space<vmem>>, vector<8x1xf32>
    %280 = vector.broadcast %279 : vector<8x1xf32> to vector<8x256xf32>
    %281 = arith.addf %278, %280 : vector<8x256xf32>
    %c0_25 = arith.constant 0 : index
    %c0_26 = arith.constant 0 : index
    %282 = vector.load %arg5[%c0_25, %c0_26] : memref<8x1xf32, #tpu.memory_space<vmem>>, vector<8x1xf32>
    %283 = vector.extract_strided_slice %12 {offsets = [0, 24], sizes = [8, 1], strides = [1, 1]} : vector<8x49xf32> to vector<8x1xf32>
    %284 = vector.extract_strided_slice %7 {offsets = [0, 0], sizes = [8, 1], strides = [1, 1]} : vector<8x197xf32> to vector<8x1xf32>
    %285 = arith.mulf %283, %284 : vector<8x1xf32>
    %286 = arith.addf %282, %285 : vector<8x1xf32>
    %287 = tpu.iota {dimensions = array<i32: 1>} : vector<8x256xi32>
    %c0_i32 = arith.constant 0 : i32
    %288 = vector.broadcast %c0_i32 : i32 to vector<8x256xi32>
    %289 = arith.cmpi eq, %287, %288 : vector<8x256xi32>
    %290 = vector.shape_cast %286 : vector<8x1xf32> to vector<8x1xf32>
    %291 = vector.broadcast %290 : vector<8x1xf32> to vector<8x256xf32>
    %292 = arith.select %289, %291, %281 : vector<8x256xi1>, vector<8x256xf32>
    %cst_27 = arith.constant 5.000000e-01 : f32
    %293 = vector.broadcast %cst_27 : f32 to vector<8x256xf32>
    %294 = arith.mulf %293, %292 : vector<8x256xf32>
    %cst_28 = arith.constant 0.707106769 : f32
    %295 = vector.broadcast %cst_28 : f32 to vector<8x256xf32>
    %296 = arith.mulf %292, %295 : vector<8x256xf32>
    %cst_29 = arith.constant 0.000000e+00 : f32
    %297 = vector.broadcast %cst_29 : f32 to vector<8x256xf32>
    %298 = arith.cmpf olt, %296, %297 : vector<8x256xf32>
    %cst_30 = arith.constant -1.000000e+00 : f32
    %cst_31 = arith.constant 1.000000e+00 : f32
    %299 = vector.broadcast %cst_30 : f32 to vector<8x256xf32>
    %300 = vector.broadcast %cst_31 : f32 to vector<8x256xf32>
    %301 = arith.select %298, %299, %300 : vector<8x256xi1>, vector<8x256xf32>
    %302 = math.absf %296 : vector<8x256xf32>
    %cst_32 = arith.constant 0.327591091 : f32
    %303 = vector.broadcast %cst_32 : f32 to vector<8x256xf32>
    %304 = arith.mulf %303, %302 : vector<8x256xf32>
    %cst_33 = arith.constant 1.000000e+00 : f32
    %305 = vector.broadcast %cst_33 : f32 to vector<8x256xf32>
    %306 = arith.addf %305, %304 : vector<8x256xf32>
    %cst_34 = arith.constant 1.000000e+00 : f32
    %307 = vector.broadcast %cst_34 : f32 to vector<8x256xf32>
    %308 = arith.divf %307, %306 : vector<8x256xf32>
    %cst_35 = arith.constant 1.06140542 : f32
    %309 = vector.broadcast %cst_35 : f32 to vector<8x256xf32>
    %310 = arith.mulf %309, %308 : vector<8x256xf32>
    %cst_36 = arith.constant -1.45315206 : f32
    %311 = vector.broadcast %cst_36 : f32 to vector<8x256xf32>
    %312 = arith.addf %310, %311 : vector<8x256xf32>
    %313 = arith.mulf %312, %308 : vector<8x256xf32>
    %cst_37 = arith.constant 1.42141378 : f32
    %314 = vector.broadcast %cst_37 : f32 to vector<8x256xf32>
    %315 = arith.addf %313, %314 : vector<8x256xf32>
    %316 = arith.mulf %315, %308 : vector<8x256xf32>
    %cst_38 = arith.constant -0.284496725 : f32
    %317 = vector.broadcast %cst_38 : f32 to vector<8x256xf32>
    %318 = arith.addf %316, %317 : vector<8x256xf32>
    %319 = arith.mulf %318, %308 : vector<8x256xf32>
    %cst_39 = arith.constant 0.254829586 : f32
    %320 = vector.broadcast %cst_39 : f32 to vector<8x256xf32>
    %321 = arith.addf %319, %320 : vector<8x256xf32>
    %322 = arith.mulf %321, %308 : vector<8x256xf32>
    %cst_40 = arith.constant 0.000000e+00 : f32
    %323 = vector.broadcast %cst_40 : f32 to vector<8x256xf32>
    %324 = arith.subf %323, %302 : vector<8x256xf32>
    %325 = arith.mulf %324, %302 : vector<8x256xf32>
    %326 = math.exp %325 : vector<8x256xf32>
    %327 = arith.mulf %322, %326 : vector<8x256xf32>
    %cst_41 = arith.constant 1.000000e+00 : f32
    %328 = vector.broadcast %cst_41 : f32 to vector<8x256xf32>
    %329 = arith.subf %328, %327 : vector<8x256xf32>
    %330 = arith.mulf %301, %329 : vector<8x256xf32>
    %cst_42 = arith.constant 1.000000e+00 : f32
    %331 = vector.broadcast %cst_42 : f32 to vector<8x256xf32>
    %332 = arith.addf %331, %330 : vector<8x256xf32>
    %333 = arith.mulf %294, %332 : vector<8x256xf32>
    %c0_43 = arith.constant 0 : index
    %c0_44 = arith.constant 0 : index
    %334 = vector.load %arg6[%c0_43, %c0_44] : memref<8x768xf32, #tpu.memory_space<vmem>>, vector<8x768xf32>
    %cst_45 = arith.constant dense<0.000000e+00> : vector<256x768xf32>
    %335 = tpu.matmul %333, %334, %cst_45 {dimension_numbers = #tpu.dot_dimension_numbers<[0], [0], [1], [1], [0, 1, 1, 1], [], []>} : vector<8x256xf32>, vector<8x768xf32>, vector<256x768xf32> -> vector<256x768xf32>
    %336 = vector.extract_strided_slice %335 {offsets = [0, 0], sizes = [197, 768], strides = [1, 1]} : vector<256x768xf32> to vector<197x768xf32>
    %c0_46 = arith.constant 0 : index
    %c0_47 = arith.constant 0 : index
    %337 = vector.load %arg7[%c0_46, %c0_47] : memref<1x768xf32, #tpu.memory_space<vmem>>, vector<1x768xf32>
    %338 = vector.broadcast %337 : vector<1x768xf32> to vector<197x768xf32>
    %339 = arith.addf %336, %338 : vector<197x768xf32>
    %340 = arith.truncf %339 : vector<197x768xf32> to vector<197x768xbf16>
    %c0_48 = arith.constant 0 : index
    %c0_49 = arith.constant 0 : index
    %c0_50 = arith.constant 0 : index
    %341 = vector.load %arg9[%c0_48, %c0_49, %c0_50] : memref<1x197x768xbf16, #tpu.memory_space<vmem>>, vector<1x197x768xbf16>
    %342 = vector.shape_cast %341 : vector<1x197x768xbf16> to vector<197x768xbf16>
    %343 = vector.shape_cast %340 : vector<197x768xbf16> to vector<1x197x768xbf16>
    tpu.vector_store %arg9[%c0_48, %c0_49, %c0_50], %343 {strides = array<i32>} : memref<1x197x768xbf16, #tpu.memory_space<vmem>>, vector<1x197x768xbf16>,
    return
  }
  func.func @transform_0(%arg0: i32) -> (i32, i32, i32) {
    %c0_i32 = arith.constant 0 : i32
    %c0_i32_0 = arith.constant 0 : i32
    %c0_i32_1 = arith.constant 0 : i32
    return %arg0, %c0_i32, %c0_i32_0 : i32, i32, i32
  }
  func.func @transform_1(%arg0: i32) -> (i32, i32) {
    %c0_i32 = arith.constant 0 : i32
    %c0_i32_0 = arith.constant 0 : i32
    %c0_i32_1 = arith.constant 0 : i32
    return %c0_i32, %c0_i32_0 : i32, i32
  }
  func.func @transform_2(%arg0: i32) -> (i32, i32) {
    %c0_i32 = arith.constant 0 : i32
    %c0_i32_0 = arith.constant 0 : i32
    %c0_i32_1 = arith.constant 0 : i32
    return %c0_i32, %c0_i32_0 : i32, i32
  }
  func.func @transform_3(%arg0: i32) -> (i32, i32) {
    %c0_i32 = arith.constant 0 : i32
    %c0_i32_0 = arith.constant 0 : i32
    %c0_i32_1 = arith.constant 0 : i32
    return %c0_i32, %c0_i32_0 : i32, i32
  }
  func.func @transform_4(%arg0: i32) -> (i32, i32) {
    %c0_i32 = arith.constant 0 : i32
    %c0_i32_0 = arith.constant 0 : i32
    %c0_i32_1 = arith.constant 0 : i32
    return %c0_i32, %c0_i32_0 : i32, i32
  }
  func.func @transform_5(%arg0: i32) -> (i32, i32) {
    %c0_i32 = arith.constant 0 : i32
    %c0_i32_0 = arith.constant 0 : i32
    %c0_i32_1 = arith.constant 0 : i32
    return %c0_i32, %c0_i32_0 : i32, i32
  }
  func.func @transform_6(%arg0: i32) -> (i32, i32) {
    %c0_i32 = arith.constant 0 : i32
    %c0_i32_0 = arith.constant 0 : i32
    %c0_i32_1 = arith.constant 0 : i32
    return %c0_i32, %c0_i32_0 : i32, i32
  }
  func.func @transform_7(%arg0: i32) -> (i32, i32) {
    %c0_i32 = arith.constant 0 : i32
    %c0_i32_0 = arith.constant 0 : i32
    %c0_i32_1 = arith.constant 0 : i32
    return %c0_i32, %c0_i32_0 : i32, i32
  }
  func.func @transform_8(%arg0: i32) -> (i32, i32, i32) {
    %c0_i32 = arith.constant 0 : i32
    %c0_i32_0 = arith.constant 0 : i32
    %c0_i32_1 = arith.constant 0 : i32
    return %arg0, %c0_i32, %c0_i32_0 : i32, i32, i32
  }
}

</mosaic_0001>

<bundles_post_ra>
// kernel: tpu_custom_call.1
= control target key start
LH: loop header
LB: loop body
LE: loop exit
PB: predicated region body
PF: predicated region fallthrough
CT: control target
= control target key end

     0   :  { %s4275_s27 = smov 0   ;;  %s5815_s0 = inlined_call_operand.vmem [shape: bf16[2,197,768], index: 0, kind: input, shape index: {}]   ;;  %s5816_s1 = inlined_call_operand.vmem [shape: f32[8,768], index: 1, kind: input, shape index: {}]   ;;  %s5817_s2 = inlined_call_operand.vmem [shape: f32[8,1], index: 2, kind: input, shape index: {}]   ;;  %s5818_s3 = inlined_call_operand.vmem [shape: f32[8,49], index: 3, kind: input, shape index: {}]   ;;  %s5819_s4 = inlined_call_operand.vmem [shape: f32[8,1], index: 4, kind: input, shape index: {}]   ;;  %s5820_s5 = inlined_call_operand.vmem [shape: f32[8,768], index: 5, kind: input, shape index: {}]   ;;  %s5821_s6 = inlined_call_operand.vmem [shape: f32[1,768], index: 6, kind: input, shape index: {}]   ;;  %s5822_s7 = inlined_call_operand.vmem [shape: f32[7,256], index: 7, kind: input, shape index: {}]   ;;  %s5823_s8 = inlined_call_operand.vmem [shape: bf16[2,197,768], index: 8, kind: output, shape index: {}]  }
   0x1 LB: > { %s3358_s28 = sadd.s32 4294967295, %s4127_s27   ;;  %p3362_p0 = scmp.ge.s32.totalorder %s4127_s27, 1  ;;  %s4127_s27 = sphi %s4275_s27, %s18_s27  }
   0x2   : > { %p262_p1 = scmp.lt.s32.totalorder %s4127_s27, 3 }
   0x4   : > { %p263_p2 = pnand %p3362_p0, %p262_p1 }
   0x6   : > { %266 = sbr.rel (%p263_p2) target bundleno = 1843 (0x733), region = 52 }
   0xd   : > { %p296_p3 = scmp.lt.s32.totalorder %s3358_s28, 1  ;;  %v532_v0 = vld [vmem:[%s5816_s1 + $0x8] sm:$0xff]  ;;  %v531_v30 = vld [vmem:[%s5816_s1] sm:$0xff]  ;;  %v534_v32 = vld [vmem:[%s5816_s1 + $0x18] sm:$0xff]  ;;  %v4129_v47 = vmov 0   ;;  %v4130_v51 = vmov 14  }
   0xe   : > { %607 = vmatprep.mubr.f32.mxu0 %v532_v0  ;;  %3953 = vset.pattern.permute.xlu0 %v4129_v47  ;;  %v537_v48 = vld [vmem:[%s5817_s2] sm:$0xff]  ;;  %v4131_v54 = vmov 35   ;;  %v4132_v56 = vmov 42   ;;  %v4133_v59 = vmov 1   ;;  %v4134_v61 = vmov 8   ;;  %s4171_s15 = smov 45  }
   0xf   : > { %s5998_s28 = smov (!%p296_p3, %s3358_s28), 1  ;;  %3954 = vset.pattern.permute.xlu1 %v4129_v47  ;;  %540 = vperm.xlu0 %3953, %v537_v48   ;;  %v4354_v52 = vld [vmem:[%s5818_s3] sm:$0xff]  ;;  %v4135_v0 = vmov 15   ;;  %v4158_v48 = vmov 11   ;;  %vm756_vm0 = vcmask 1048104   ;;  %vm759_vm1 = vcmask 564224  }
  0x10   : > { %s5824_s9 = smul.u32 600, %s5998_s28  ;;  %789 = vperm.xlu1 %3954, %v4354_v52   ;;  %s4172_s18 = smov 17  }
  0x11   : > { %s4173_s25 = smov 31   ;;  %s5826_s26 = smov 87  }
  0x12   : > { %s4294_s12 = scalar_lea.vmem %s5815_s0, %s5824_s9  ;;  %s4175_s29 = smov 3  }
  0x13   : > { %v4004_v1 = vld [vmem:[%s4294_s12 + $0x4] ss:$24 sps:$4 sm:$0xff]   ;;  %v4006_v2 = vld [vmem:[%s4294_s12] ss:$24 sps:$4 sm:$0xff]   ;;  %v4007_v3 = vld [vmem:[%s4294_s12 + $0x34] ss:$24 sps:$4 sm:$0xff]   ;;  %3956 = vset.pattern.permute.xlu0 %v4130_v51 }
  0x14   : > { %3620 = vmatprep.subr.bf16.mxu0 %v4004_v1  ;;  %v4009_v4 = vld [vmem:[%s4294_s12 + $0x30] ss:$24 sps:$4 sm:$0xff]   ;;  %v4010_v5 = vld [vmem:[%s4294_s12 + $0x64] ss:$24 sps:$4 sm:$0xff]   ;;  %v4012_v6 = vld [vmem:[%s4294_s12 + $0x60] ss:$24 sps:$4 sm:$0xff]   ;;  %819 = vperm.xlu0 %3956, %v4354_v52  }
  0x15   : > { %3622 = vmatpush1.bf16.xpose.msra.mxu0 %v4006_v2  ;;  %v4013_v7 = vld [vmem:[%s4294_s12 + $0x94] ss:$24 sps:$4 sm:$0xff]   ;;  %v4015_v8 = vld [vmem:[%s4294_s12 + $0x90] ss:$24 sps:$4 sm:$0xff]   ;;  %v4016_v9 = vld [vmem:[%s4294_s12 + $0xc4] ss:$24 sps:$4 sm:$0xff]  }
  0x16   : > { %3624 = vmatprep.subr.bf16.mxu0 %v4007_v3  ;;  %v4018_v10 = vld [vmem:[%s4294_s12 + $0xc0] ss:$24 sps:$4 sm:$0xff]   ;;  %v4019_v11 = vld [vmem:[%s4294_s12 + $0xf4] ss:$24 sps:$4 sm:$0xff]   ;;  %v4021_v12 = vld [vmem:[%s4294_s12 + $0xf0] ss:$24 sps:$4 sm:$0xff]  }
  0x17   : > { %v4022_v13 = vld [vmem:[%s4294_s12 + $0x124] ss:$24 sps:$4 sm:$0xff]   ;;  %v4024_v14 = vld [vmem:[%s4294_s12 + $0x120] ss:$24 sps:$4 sm:$0xff]   ;;  %v4025_v15 = vld [vmem:[%s4294_s12 + $0x154] ss:$24 sps:$4 sm:$0xff]  }
  0x18   : > { %v4027_v16 = vld [vmem:[%s4294_s12 + $0x150] ss:$24 sps:$4 sm:$0xff]   ;;  %v4028_v17 = vld [vmem:[%s4294_s12 + $0x184] ss:$24 sps:$4 sm:$0xff]   ;;  %v4030_v18 = vld [vmem:[%s4294_s12 + $0x180] ss:$24 sps:$4 sm:$0xff]   ;;  %3959 = vset.pattern.permute.xlu0 %v4131_v54 }
  0x19   : > { %v4031_v19 = vld [vmem:[%s4294_s12 + $0x1b4] ss:$24 sps:$4 sm:$0xff]   ;;  %v4033_v20 = vld [vmem:[%s4294_s12 + $0x1b0] ss:$24 sps:$4 sm:$0xff]   ;;  %v4034_v21 = vld [vmem:[%s4294_s12 + $0x1e4] ss:$24 sps:$4 sm:$0xff]   ;;  %864 = vperm.xlu0 %3959, %v4354_v52  }
  0x1a   : > { %v4036_v22 = vld [vmem:[%s4294_s12 + $0x1e0] ss:$24 sps:$4 sm:$0xff]   ;;  %v4037_v23 = vld [vmem:[%s4294_s12 + $0x214] ss:$24 sps:$4 sm:$0xff]   ;;  %v4039_v25 = vld [vmem:[%s4294_s12 + $0x210] ss:$24 sps:$4 sm:$0xff]  }
  0x1b   : > { %v378_v24 = vld [vmem:[%s4294_s12 + $0x240] sm:$0x77]  ;;  %v4043_v31 = vld [vmem:[%s4294_s12 + $0x3c] ss:$24 sps:$4 sm:$0xff]   ;;  %v4045_v33 = vld [vmem:[%s4294_s12 + $0x38] ss:$24 sps:$4 sm:$0xff]  }
  0x1c   : > { %v526_v26 = vunpack.c.h.bf16 %v378_v24  ;;  %v525_v27 = vunpack.c.l.bf16 %v378_v24  ;;  %v4040_v28 = vld [vmem:[%s4294_s12 + $0xc] ss:$24 sps:$4 sm:$0xff]   ;;  %v4042_v29 = vld [vmem:[%s4294_s12 + $0x8] ss:$24 sps:$4 sm:$0xff]   ;;  %v4049_v36 = vld [vmem:[%s4294_s12 + $0x9c] ss:$24 sps:$4 sm:$0xff]  }
  0x1d   : > { %3626 = vmatpush1.bf16.xpose.msra.mxu0 %v4009_v4  ;;  %v4046_v34 = vld [vmem:[%s4294_s12 + $0x6c] ss:$24 sps:$4 sm:$0xff]   ;;  %v4048_v35 = vld [vmem:[%s4294_s12 + $0x68] ss:$24 sps:$4 sm:$0xff]   ;;  %v4051_v37 = vld [vmem:[%s4294_s12 + $0x98] ss:$24 sps:$4 sm:$0xff]   ;;  %3960 = vset.pattern.permute.xlu0 %v4132_v56 }
  0x1e   : > { %3628 = vmatprep.subr.bf16.mxu0 %v4010_v5  ;;  %v4052_v38 = vld [vmem:[%s4294_s12 + $0xcc] ss:$24 sps:$4 sm:$0xff]   ;;  %v4054_v39 = vld [vmem:[%s4294_s12 + $0xc8] ss:$24 sps:$4 sm:$0xff]   ;;  %v4055_v40 = vld [vmem:[%s4294_s12 + $0xfc] ss:$24 sps:$4 sm:$0xff]   ;;  %879 = vperm.xlu0 %3960, %v4354_v52  }
  0x1f   : > { %v4057_v41 = vld [vmem:[%s4294_s12 + $0xf8] ss:$24 sps:$4 sm:$0xff]   ;;  %v4058_v42 = vld [vmem:[%s4294_s12 + $0x12c] ss:$24 sps:$4 sm:$0xff]   ;;  %v4060_v43 = vld [vmem:[%s4294_s12 + $0x128] ss:$24 sps:$4 sm:$0xff]  }
  0x20   : > { %v4061_v44 = vld [vmem:[%s4294_s12 + $0x15c] ss:$24 sps:$4 sm:$0xff]   ;;  %v4063_v45 = vld [vmem:[%s4294_s12 + $0x158] ss:$24 sps:$4 sm:$0xff]   ;;  %v4064_v46 = vld [vmem:[%s4294_s12 + $0x18c] ss:$24 sps:$4 sm:$0xff]  }
  0x21   : > { %v4066_v49 = vld [vmem:[%s4294_s12 + $0x188] ss:$24 sps:$4 sm:$0xff]   ;;  %v4067_v50 = vld [vmem:[%s4294_s12 + $0x1bc] ss:$24 sps:$4 sm:$0xff]   ;;  %v4069_v53 = vld [vmem:[%s4294_s12 + $0x1b8] ss:$24 sps:$4 sm:$0xff]  }
  0x22   : > { %v4070_v55 = vld [vmem:[%s4294_s12 + $0x1ec] ss:$24 sps:$4 sm:$0xff]   ;;  %v4072_v57 = vld [vmem:[%s4294_s12 + $0x1e8] ss:$24 sps:$4 sm:$0xff]   ;;  %v4073_v58 = vld [vmem:[%s4294_s12 + $0x21c] ss:$24 sps:$4 sm:$0xff]   ;;  %3961 = vset.pattern.permute.xlu0 %v4133_v59 }
  0x23   : > { %909 = vperm.xlu0 %3961, %v4354_v52   ;;  %v379_v60 = vld [vmem:[%s4294_s12 + $0x248] sm:$0x77]  ;;  %v4075_v62 = vld [vmem:[%s4294_s12 + $0x218] ss:$24 sps:$4 sm:$0xff]   ;;  %v4136_v3 = vmov 22   ;;  %v4159_v51 = vmov 18  }
  0x24   : > { %v528_v63 = vunpack.c.h.bf16 %v379_v60  ;;  %v527_v1 = vunpack.c.l.bf16 %v379_v60  ;;  %v4076_v2 = vld [vmem:[%s4294_s12 + $0x14] ss:$24 sps:$4 sm:$0xff]   ;;  %v4078_v4 = vld [vmem:[%s4294_s12 + $0x10] ss:$24 sps:$4 sm:$0xff]   ;;  %v4160_v54 = vmov 25   ;;  %v4162_v59 = vmov 39  }
  0x25   : > { %3630 = vmatpush1.bf16.xpose.msra.mxu0 %v4012_v6  ;;  %v533_v5 = vld [vmem:[%s5816_s1 + $0x10] sm:$0xff]  ;;  %v4079_v6 = vld [vmem:[%s4294_s12 + $0x44] ss:$24 sps:$4 sm:$0xff]   ;;  %s5825_s30 = smov 100   ;;  %s4177_s10 = smov 117  }
  0x26   : > { %3632 = vmatprep.subr.bf16.mxu0 %v4013_v7  ;;  %v536_v7 = vld [vmem:[%s5816_s1 + $0x28] sm:$0xff]  ;;  %v535_v60 = vld [vmem:[%s5816_s1 + $0x20] sm:$0xff]  ;;  %s4178_s11 = smov 103   ;;  %s4180_s13 = smov 44  }
  0x27   : > { %3962 = vset.pattern.permute.xlu0 %v4134_v61  ;;  %v4090_v24 = vld [vmem:[%s4294_s12 + $0xd0] ss:$24 sps:$4 sm:$0xff]   ;;  %v4163_v61 = vmov 46   ;;  %s4182_s14 = smov 30   ;;  %s4186_s16 = smov 2  }
  0x28   : > { %924 = vperm.xlu0 %3962, %v4354_v52   ;;  %s4187_s17 = smov 116   ;;  %s4188_s19 = smov 101  }
  0x29   : > { %s4190_s20 = smov 102   ;;  %s4191_s21 = smov 88  }
  0x2a   : > { %s4192_s22 = smov 114   ;;  %s4194_s23 = smov 43  }
  0x2b   : > { %s4195_s24 = smov 29   ;;  %s5828_s9 = smov 1  }
  0x2c   : > { %3963 = vset.pattern.permute.xlu0 %v4135_v0  ;;  %v4166_v0 = vmov 19  }
  0x2d   : > { %3634 = vmatpush1.bf16.xpose.msra.mxu0 %v4015_v8  ;;  %939 = vperm.xlu0 %3963, %v4354_v52   ;;  %v4137_v8 = vmov 29  }
  0x2e   : > { %3636 = vmatprep.subr.bf16.mxu0 %v4016_v9  ;;  %v4138_v9 = vmov 36  }
  0x31   : > { %3964 = vset.pattern.permute.xlu0 %v4136_v3  ;;  %v4169_v3 = vmov 33  }
  0x32   : > { %954 = vperm.xlu0 %3964, %v4354_v52  }
  0x35   : > { %3638 = vmatpush1.bf16.xpose.msra.mxu0 %v4018_v10  ;;  %v4081_v10 = vld [vmem:[%s4294_s12 + $0x40] ss:$24 sps:$4 sm:$0xff]  }
  0x36   : > { %3640 = vmatprep.subr.bf16.mxu0 %v4019_v11  ;;  %3965 = vset.pattern.permute.xlu0 %v4137_v8  ;;  %v4139_v11 = vmov 7  }
  0x37   : > { %969 = vperm.xlu0 %3965, %v4354_v52   ;;  %3955 = vset.pattern.permute.xlu1 %v4139_v11 }
  0x38   : > { %804 = vperm.xlu1 %3955, %v4354_v52  }
  0x3b   : > { %3966 = vset.pattern.permute.xlu0 %v4138_v9 }
  0x3c   : > { %984 = vperm.xlu0 %3966, %v4354_v52  }
  0x3d   : > { %3642 = vmatpush1.bf16.xpose.msra.mxu0 %v4021_v12  ;;  %v4082_v12 = vld [vmem:[%s4294_s12 + $0x74] ss:$24 sps:$4 sm:$0xff]  }
  0x3e   : > { %3644 = vmatprep.subr.bf16.mxu0 %v4022_v13  ;;  %v4140_v13 = vmov 43  }
  0x40   : > { %3967 = vset.pattern.permute.xlu0 %v4140_v13 }
  0x41   : > { %999 = vperm.xlu0 %3967, %v4354_v52  }
  0x45   : > { %3646 = vmatpush1.bf16.xpose.msra.mxu0 %v4024_v14  ;;  %v4141_v14 = vmov 21  }
  0x46   : > { %3648 = vmatprep.subr.bf16.mxu0 %v4025_v15  ;;  %3957 = vset.pattern.permute.xlu1 %v4141_v14  ;;  %v4084_v15 = vld [vmem:[%s4294_s12 + $0x70] ss:$24 sps:$4 sm:$0xff]  }
  0x47   : > { %834 = vperm.xlu1 %3957, %v4354_v52   ;;  %v4453_v14 = vld [vmem:[%s5822_s7 + $0x2] ss:$8 sm:$0x3] }
  0x4d   : > { %3650 = vmatpush1.bf16.xpose.msra.mxu0 %v4027_v16  ;;  %v4085_v16 = vld [vmem:[%s4294_s12 + $0xa4] ss:$24 sps:$4 sm:$0xff]  }
  0x4e   : > { %3652 = vmatprep.subr.bf16.mxu0 %v4028_v17  ;;  %v4142_v17 = vmov 2  }
  0x4f   : > { %3968 = vset.pattern.permute.xlu0 %v4142_v17  ;;  %v4463_v17 = vld [vmem:[%s5822_s7 + $0x3] ss:$8 sm:$0x3] }
  0x50   : > { %1029 = vperm.xlu0 %3968, %v4354_v52  }
  0x55   : > { %3654 = vmatpush1.bf16.xpose.msra.mxu0 %v4030_v18  ;;  %v4143_v18 = vmov 28  }
  0x56   : > { %3656 = vmatprep.subr.bf16.mxu0 %v4031_v19  ;;  %3958 = vset.pattern.permute.xlu1 %v4143_v18  ;;  %v4144_v19 = vmov 9  }
  0x57   : > { %849 = vperm.xlu1 %3958, %v4354_v52   ;;  %3969 = vset.pattern.permute.xlu0 %v4144_v19  ;;  %v3365_v19 = vld [vmem:[%s5822_s7 + $0x1] ss:$8 sm:$0x3] }
  0x58   : > { %1044 = vperm.xlu0 %3969, %v4354_v52  }
  0x5d   : > { %3658 = vmatpush1.bf16.xpose.msra.mxu0 %v4033_v20  ;;  %v4087_v20 = vld [vmem:[%s4294_s12 + $0xa0] ss:$24 sps:$4 sm:$0xff]  }
  0x5e   : > { %3660 = vmatprep.subr.bf16.mxu0 %v4034_v21  ;;  %v4088_v21 = vld [vmem:[%s4294_s12 + $0xd4] ss:$24 sps:$4 sm:$0xff]  }
  0x65   : > { %3662 = vmatpush1.bf16.xpose.msra.mxu0 %v4036_v22  ;;  %v4145_v22 = vmov 16  }
  0x66   : > { %3664 = vmatprep.subr.bf16.mxu0 %v4037_v23  ;;  %3970 = vset.pattern.permute.xlu0 %v4145_v22  ;;  %v4146_v23 = vmov 10  }
  0x67   : > { %1059 = vperm.xlu0 %3970, %v4354_v52   ;;  %3976 = vset.pattern.permute.xlu1 %v4146_v23  ;;  %v4487_v23 = vld [vmem:[%s5822_s7 + $0x5] ss:$8 sm:$0x3] }
  0x68   : > { %1164 = vperm.xlu1 %3976, %v4354_v52  }
  0x6d   : > { %3666 = vmatpush1.bf16.xpose.msra.mxu0 %v4039_v25  ;;  %v4147_v25 = vmov 23  }
  0x6e   : > { %591 = vmatprep.subr.mxu0 %v526_v26  ;;  %3971 = vset.pattern.permute.xlu0 %v4147_v25  ;;  %v4091_v26 = vld [vmem:[%s4294_s12 + $0x104] ss:$24 sps:$4 sm:$0xff]  }
  0x6f   : > { %1074 = vperm.xlu0 %3971, %v4354_v52  }
  0x75   : > { %592 = vmatpush1.xpose.msra.mxu0 %v525_v27  ;;  %v4148_v27 = vmov 45  }
  0x76   : > { %3668 = vmatprep.subr.bf16.mxu0 %v4040_v28  ;;  %3981 = vset.pattern.permute.xlu1 %v4148_v27  ;;  %v4149_v28 = vmov 30  }
  0x77   : > { %1232 = vperm.xlu1 %3981, %v4354_v52   ;;  %3972 = vset.pattern.permute.xlu0 %v4149_v28 }
  0x78   : > { %608 = vmatmul.mubr.f32.vlgmr.msra.gmra.mrb[0].mxu0 %v531_v30  ;;  %1089 = vperm.xlu0 %3972, %v4354_v52   ;;  %v4093_v30 = vld [vmem:[%s4294_s12 + $0x100] ss:$24 sps:$4 sm:$0xff]  }
  0x79   : > { %3670 = vmatpush1.bf16.xpose.msra.mxu0 %v4042_v29  ;;  %678 = vmatprep.mubr.f32.mxu0 %v534_v32  ;;  %v4150_v29 = vmov 4   ;;  %v4151_v32 = vmov 37  }
  0x7a   : > { %3672 = vmatprep.subr.bf16.mxu0 %v4043_v31  ;;  %v4094_v31 = vld [vmem:[%s4294_s12 + $0x134] ss:$24 sps:$4 sm:$0xff]  }
  0x7b   : > { %3982 = vset.pattern.permute.xlu1 %v4150_v29 }
  0x7c   : > { %1262 = vperm.xlu1 %3982, %v4354_v52   ;;  %3973 = vset.pattern.permute.xlu0 %v4151_v32 }
  0x7d   : > { %1104 = vperm.xlu0 %3973, %v4354_v52  }
  0x81   : > { %3674 = vmatpush1.bf16.xpose.msra.mxu0 %v4045_v33  ;;  %v4152_v33 = vmov 44  }
  0x82   : > { %3676 = vmatprep.subr.bf16.mxu0 %v4046_v34  ;;  %3974 = vset.pattern.permute.xlu0 %v4152_v33  ;;  %v4096_v34 = vld [vmem:[%s4294_s12 + $0x130] ss:$24 sps:$4 sm:$0xff]  }
  0x83   : > { %1119 = vperm.xlu0 %3974, %v4354_v52  }
  0x89   : > { %3678 = vmatpush1.bf16.xpose.msra.mxu0 %v4048_v35  ;;  %v4097_v35 = vld [vmem:[%s4294_s12 + $0x164] ss:$24 sps:$4 sm:$0xff]  }
  0x8a   : > { %3680 = vmatprep.subr.bf16.mxu0 %v4049_v36  ;;  %v4153_v36 = vmov 3  }
  0x8b   : > { %3975 = vset.pattern.permute.xlu0 %v4153_v36 }
  0x8c   : > { %1149 = vperm.xlu0 %3975, %v4354_v52  }
  0x8e   : > { %v541_v9 = vpop.permute.xlu0 %540 }
  0x91   : > { %3682 = vmatpush1.bf16.xpose.msra.mxu0 %v4051_v37  ;;  %v4099_v37 = vld [vmem:[%s4294_s12 + $0x160] ss:$24 sps:$4 sm:$0xff]  }
  0x92   : > { %3684 = vmatprep.subr.bf16.mxu0 %v4052_v38  ;;  %v4100_v38 = vld [vmem:[%s4294_s12 + $0x194] ss:$24 sps:$4 sm:$0xff]  }
  0x99   : > { %3686 = vmatpush1.bf16.xpose.msra.mxu0 %v4054_v39  ;;  %v4154_v39 = vmov 17  }
  0x9a   : > { %3688 = vmatprep.subr.bf16.mxu0 %v4055_v40  ;;  %3977 = vset.pattern.permute.xlu0 %v4154_v39  ;;  %v4155_v40 = vmov 24   ;;  %v4181_v39 = vmov 40  }
  0x9b   : > { %1179 = vperm.xlu0 %3977, %v4354_v52  }
  0x9f   : > { %3978 = vset.pattern.permute.xlu0 %v4155_v40  ;;  %v4183_v40 = vmov 47  }
  0xa0   : > { %1187 = vperm.xlu0 %3978, %v4354_v52  }
  0xa1   : > { %3690 = vmatpush1.bf16.xpose.msra.mxu0 %v4057_v41  ;;  %v4102_v41 = vld [vmem:[%s4294_s12 + $0x190] ss:$24 sps:$4 sm:$0xff]  }
  0xa2   : > { %3692 = vmatprep.subr.bf16.mxu0 %v4058_v42  ;;  %v4103_v42 = vld [vmem:[%s4294_s12 + $0x1c4] ss:$24 sps:$4 sm:$0xff]  }
  0xa9   : > { %3694 = vmatpush1.bf16.xpose.msra.mxu0 %v4060_v43  ;;  %v4156_v43 = vmov 31  }
  0xaa   : > { %3696 = vmatprep.subr.bf16.mxu0 %v4061_v44  ;;  %3979 = vset.pattern.permute.xlu0 %v4156_v43  ;;  %v4105_v44 = vld [vmem:[%s4294_s12 + $0x1c0] ss:$24 sps:$4 sm:$0xff]  }
  0xab   : > { %1202 = vperm.xlu0 %3979, %v4354_v52  }
  0xb1   : > { %3698 = vmatpush1.bf16.xpose.msra.mxu0 %v4063_v45  ;;  %v4157_v45 = vmov 38  }
  0xb2   : > { %3700 = vmatprep.subr.bf16.mxu0 %v4064_v46  ;;  %3980 = vset.pattern.permute.xlu0 %v4157_v45  ;;  %v4106_v46 = vld [vmem:[%s4294_s12 + $0x1f4] ss:$24 sps:$4 sm:$0xff]   ;;  %v4189_v45 = vmov 13  }
  0xb3   : > { %1217 = vperm.xlu0 %3980, %v4354_v52  }
  0xb7   : > { %3983 = vset.pattern.permute.xlu0 %v4158_v48 }
  0xb8   : > { %1277 = vperm.xlu0 %3983, %v4354_v52  }
  0xb9   : > { %3702 = vmatpush1.bf16.xpose.msra.mxu0 %v4066_v49  ;;  %v4108_v49 = vld [vmem:[%s4294_s12 + $0x1f0] ss:$24 sps:$4 sm:$0xff]  }
  0xba   : > { %3704 = vmatprep.subr.bf16.mxu0 %v4067_v50  ;;  %v4109_v50 = vld [vmem:[%s4294_s12 + $0x224] ss:$24 sps:$4 sm:$0xff]  }
  0xbc   : > { %3984 = vset.pattern.permute.xlu0 %v4159_v51 }
  0xbd   : > { %1292 = vperm.xlu0 %3984, %v4354_v52  }
  0xc1   : > { %3706 = vmatpush1.bf16.xpose.msra.mxu0 %v4069_v53  ;;  %v380_v53 = vld [vmem:[%s4294_s12 + $0x250] sm:$0x77]  ;;  %3985 = vset.pattern.permute.xlu0 %v4160_v54 }
  0xc2   : > { %3708 = vmatprep.subr.bf16.mxu0 %v4070_v55  ;;  %v4111_v55 = vld [vmem:[%s4294_s12 + $0x220] ss:$24 sps:$4 sm:$0xff]   ;;  %1307 = vperm.xlu0 %3985, %v4354_v52   ;;  %v530_v56 = vunpack.c.h.bf16 %v380_v53  ;;  %s4170_s12 = smov 24  }
  0xc9   : > { %3710 = vmatpush1.bf16.xpose.msra.mxu0 %v4072_v57  ;;  %v4161_v57 = vmov 32  }
  0xca   : > { %3712 = vmatprep.subr.bf16.mxu0 %v4073_v58  ;;  %3986 = vset.pattern.permute.xlu0 %v4161_v57  ;;  %v529_v58 = vunpack.c.l.bf16 %v380_v53  ;;  %v4196_v53 = vmov 27   ;;  %v4200_v57 = vmov 41  }
  0xcb   : > { %1322 = vperm.xlu0 %3986, %v4354_v52  }
  0xcf   : > { %3987 = vset.pattern.permute.xlu0 %v4162_v59 }
  0xd0   : > { %1337 = vperm.xlu0 %3987, %v4354_v52  }
  0xd1   : > { %3714 = vmatpush1.bf16.xpose.msra.mxu0 %v4075_v62  ;;  %v4164_v62 = vmov 5  }
  0xd2   : > { %662 = vmatprep.subr.mxu0 %v528_v63  ;;  %v4165_v63 = vmov 12  }
  0xd4   : > { %3988 = vset.pattern.permute.xlu0 %v4163_v61  ;;  %v4580_v61 = vpop.permute.xlu1 %789 }
  0xd5   : > { %1352 = vperm.xlu0 %3988, %v4354_v52  }
  0xd9   : > { %663 = vmatpush1.xpose.msra.mxu0 %v527_v1  ;;  %3989 = vset.pattern.permute.xlu0 %v4164_v62  ;;  %v4167_v1 = vmov 26  }
  0xda   : > { %3716 = vmatprep.subr.bf16.mxu0 %v4076_v2  ;;  %1382 = vperm.xlu0 %3989, %v4354_v52   ;;  %v5842_v2 = vmov 0.0  }
  0xdb   : > { %757 = vst.msk [vmem:[#allocation2 + $0x8] sm:$0xff] %vm756_vm0, %v5842_v2  ;;  %1972 = vmatprep.mubr.f32.mxu1 %v5842_v2 }
  0xdc   : > { %679 = vmatmul.mubr.f32.vlgmr.msra.gmra.mrb[0].mxu0 %v533_v5 }
  0xdd   : > { %3718 = vmatpush1.bf16.xpose.msra.mxu0 %v4078_v4  ;;  %749 = vmatprep.mubr.f32.mxu0 %v536_v7  ;;  %v5844_v4 = vlaneseq  ;;  %v764_v7 = vld [vmem:[%s5822_s7] ss:$8 sm:$0x3] }
  0xde   : > { %3720 = vmatprep.subr.bf16.mxu0 %v4079_v6  ;;  %3990 = vset.pattern.permute.xlu0 %v4165_v63 }
  0xdf   : > { %1397 = vperm.xlu0 %3990, %v4354_v52   ;;  %v4439_v5 = vshrl.u32 %v5844_v4, 7 }
  0xe1   : > { %5889 = vst [vmem:[#allocation3_spill] sm:$0xff] %v4439_v5  ;;  %v4442_v6 = vsub.s32 0, %v4439_v5 }
  0xe3   : > { %3991 = vset.pattern.permute.xlu0 %v4166_v0  ;;  %5890 = vst [vmem:[#allocation4_spill] sm:$0xff] %v4442_v6  ;;  %v769_v8 = vrot.slane %v764_v7, %v4442_v6  ;;  %v1012_v18 = vrot.slane %v4453_v14, %v4442_v6  ;;  %v1132_v22 = vrot.slane %v4463_v17, %v4442_v6  ;;  %v4592_v0 = vpop.permute.xlu1 %804 }
  0xe4   : > { %1412 = vperm.xlu0 %3991, %v4354_v52  }
  0xe5   : > { %3722 = vmatpush1.bf16.xpose.msra.mxu0 %v4081_v10 }
  0xe6   : > { %3724 = vmatprep.subr.bf16.mxu0 %v4082_v12 }
  0xe8   : > { %3992 = vset.pattern.permute.xlu0 %v4167_v1  ;;  %v4601_v1 = vpop.permute.xlu1 %834 }
  0xe9   : > { %1427 = vperm.xlu0 %3992, %v4354_v52  }
  0xed   : > { %3726 = vmatpush1.bf16.xpose.msra.mxu0 %v4084_v15  ;;  %3993 = vset.pattern.permute.xlu0 %v4169_v3 }
  0xee   : > { %3728 = vmatprep.subr.bf16.mxu0 %v4085_v16  ;;  %v4458_v16 = vsub.s32 1, %v4439_v5 }
  0xf0   : > { %5891 = vst [vmem:[#allocation5_spill] sm:$0xff] %v4458_v16  ;;  %v1369_v27 = vrot.slane %v4487_v23, %v4458_v16 }
  0xf5   : > { %3730 = vmatpush1.bf16.xpose.msra.mxu0 %v4087_v20  ;;  %v4475_v20 = vld [vmem:[%s5822_s7 + $0x6] ss:$8 sm:$0x3] }
  0xf6   : > { %3732 = vmatprep.subr.bf16.mxu0 %v4088_v21  ;;  %v4480_v21 = vld [vmem:[%s5822_s7 + $0x4] ss:$8 sm:$0x3]  ;;  %v1489_v28 = vrot.slane %v4475_v20, %v4458_v16  ;;  %v1485_v59 = vrot.slane %v4475_v20, %v4442_v6 }
  0xfd   : > { %3734 = vmatpush1.bf16.xpose.msra.mxu0 %v4090_v24  ;;  %v896_v24 = vrot.slane %v3365_v19, %v4458_v16 }
  0xfe   : > { %3736 = vmatprep.subr.bf16.mxu0 %v4091_v26  ;;  %v1249_v26 = vrot.slane %v4480_v21, %v4458_v16 }
 0x105   : > { %3738 = vmatpush1.bf16.xpose.msra.mxu0 %v4093_v30  ;;  %v773_v30 = vrot.slane %v764_v7, %v4458_v16  ;;  %v4607_v7 = vpop.permute.xlu1 %849 }
 0x106   : > { %3740 = vmatprep.subr.bf16.mxu0 %v4094_v31 }
 0x10d   : > { %3742 = vmatpush1.bf16.xpose.msra.mxu0 %v4096_v34 }
 0x10e   : > { %3744 = vmatprep.subr.bf16.mxu0 %v4097_v35 }
 0x115   : > { %3746 = vmatpush1.bf16.xpose.msra.mxu0 %v4099_v37  ;;  %v892_v37 = vrot.slane %v3365_v19, %v4442_v6 }
 0x116   : > { %3748 = vmatprep.subr.bf16.mxu0 %v4100_v38 }
 0x11d   : > { %3750 = vmatpush1.bf16.xpose.msra.mxu0 %v4102_v41  ;;  %v1016_v41 = vrot.slane %v4453_v14, %v4458_v16 }
 0x11e   : > { %3752 = vmatprep.subr.bf16.mxu0 %v4103_v42  ;;  %v4185_v42 = vmov 6  }
 0x125   : > { %3754 = vmatpush1.bf16.xpose.msra.mxu0 %v4105_v44  ;;  %v4538_v44 = vpop.permute.xlu0 %819 }
 0x126   : > { %3756 = vmatprep.subr.bf16.mxu0 %v4106_v46  ;;  %v1136_v46 = vrot.slane %v4463_v17, %v4458_v16 }
 0x129   : > { %v4547_v48 = vpop.permute.xlu0 %864 }
 0x12d   : > { %3758 = vmatpush1.bf16.xpose.msra.mxu0 %v4108_v49  ;;  %v4554_v51 = vpop.permute.xlu0 %879 }
 0x12e   : > { %3760 = vmatprep.subr.bf16.mxu0 %v4109_v50  ;;  %v4193_v50 = vmov 20  }
 0x131   : > { %v4561_v54 = vpop.permute.xlu0 %909 }
 0x135   : > { %3762 = vmatpush1.bf16.xpose.msra.mxu0 %v4111_v55  ;;  %v4198_v55 = vmov 34  }
 0x136   : > { %733 = vmatprep.subr.mxu0 %v530_v56  ;;  %v4567_v56 = vpop.permute.xlu0 %924 }
 0x13d   : > { %734 = vmatpush1.xpose.msra.mxu0 %v529_v58  ;;  %v4574_v58 = vpop.permute.xlu0 %939 }
 0x140   : > { %750 = vmatmul.mubr.f32.vlgmr.msra.gmra.mrb[0].mxu0 %v535_v60  ;;  %v4202_v60 = vmov 48  }
 0x141   : > { %1912 = vmatprep.mubr.f32.mxu0 %v5842_v2  ;;  %v4586_v63 = vpop.permute.xlu0 %954 }
 0x213   : > { %v751_v10 = vpop.f32.mrb[0].mxu0 }
 0x214   : > { %v4448_v11 = vadd.f32 %v751_v10, %v541_v9  ;;  %v753_v12 = vpop.f32.mrb[1].mxu0  ;;  %v4617_v10 = vpop.permute.xlu1 %1164 }
 0x215   : > { %v3766_v13 = vadd.f32 %v753_v12, %v541_v9  ;;  %5894 = vst [vmem:[#allocation8_spill] sm:$0xff] %v4617_v10 }
 0x216   : > { %1608 = vrot.lane.b32.xlu0 %v4448_v11, %s4170_s12  ;;  %v776_v15 = vmul.f32 %v4448_v11, %v769_v8  ;;  %v4491_v25 = vmul.f32 %v4448_v11, %v1012_v18  ;;  %v4505_v32 = vmul.f32 %v4448_v11, %v1132_v22  ;;  %s4179_s12 = smov 89   ;;  %v899_v38 = vmul.f32 %v4448_v11, %v892_v37 }
 0x217   : > { %760 = vst.msk [vmem:[#allocation2 + $0x8] sm:$0xff] %vm759_vm1, %v3766_v13  ;;  %v4584_v62 = vmul.f32 %v4448_v11, %v1485_v59 }
 0x218   : > { %778 = vrot.lane.b32.xlu1 %v776_v15, %s4171_s15  ;;  %5892 = vst [vmem:[#allocation6_spill] sm:$0xff] %v4505_v32  ;;  %v4622_v13 = vpop.permute.xlu1 %1232 }
 0x219   : > { %5895 = vst [vmem:[#allocation9_spill] sm:$0xff] %v4622_v13 }
 0x21a   : > { %811 = vrot.lane.b32.xlu0 %v776_v15, %s4172_s18 }
 0x21c   : > { %796 = vrot.lane.b32.xlu1 %v776_v15, %s4173_s25 }
 0x21e   : > { %v762_v29 = vld [vmem:[#allocation2 + $0x8] sm:$0xff]  ;;  %1111 = vrot.lane.b32.xlu0 %v4491_v25, %s5826_s26  ;;  %s4203_s26 = smov 42  }
 0x21f   : > { %v4502_v31 = vmul.f32 %v896_v24, %v762_v29  ;;  %v4508_v33 = vmul.f32 %v1249_v26, %v762_v29  ;;  %v4510_v34 = vmul.f32 %v1369_v27, %v762_v29  ;;  %v4512_v35 = vmul.f32 %v1489_v28, %v762_v29 }
 0x220   : > { %826 = vrot.lane.b32.xlu1 %v776_v15, %s4175_s29  ;;  %v4516_v36 = vmul.f32 %v773_v30, %v762_v29  ;;  %v4536_v43 = vmul.f32 %v1016_v41, %v762_v29  ;;  %v4549_v49 = vmul.f32 %v1136_v46, %v762_v29 }
 0x222   : > { %1209 = vrot.lane.b32.xlu0 %v4505_v32, %s5825_s30  ;;  %5893 = vst [vmem:[#allocation7_spill] sm:$0xff] %v4549_v49  ;;  %s5827_s30 = smov 115  }
 0x224   : > { %841 = vrot.lane.b32.xlu1 %v776_v15, %s4177_s10 }
 0x226   : > { %780 = vrot.lane.b32.xlu0 %v4516_v36, %s4171_s15  ;;  %s4184_s15 = smov 16  }
 0x228   : > { %856 = vrot.lane.b32.xlu1 %v776_v15, %s4178_s11 }
 0x22a   : > { %798 = vrot.lane.b32.xlu0 %v4516_v36, %s4173_s25  ;;  %s4197_s25 = smov 15  }
 0x22c   : > { %871 = vrot.lane.b32.xlu1 %v776_v15, %s4179_s12  ;;  %v4628_v15 = vpop.permute.xlu1 %1262 }
 0x22d   : > { %5896 = vst [vmem:[#allocation10_spill] sm:$0xff] %v4628_v15 }
 0x22e   : > { %1442 = vperm.xlu0 %3993, %v4354_v52  }
 0x230   : > { %901 = vrot.lane.b32.xlu1 %v899_v38, %s4180_s13 }
 0x232   : > { %3994 = vset.pattern.permute.xlu0 %v4181_v39 }
 0x233   : > { %1457 = vperm.xlu0 %3994, %v4354_v52  }
 0x234   : > { %916 = vrot.lane.b32.xlu1 %v899_v38, %s4182_s14 }
 0x237   : > { %3995 = vset.pattern.permute.xlu0 %v4183_v40 }
 0x238   : > { %1472 = vperm.xlu0 %3995, %v4354_v52   ;;  %931 = vrot.lane.b32.xlu1 %v899_v38, %s4184_s15 }
 0x23c   : > { %3996 = vset.pattern.permute.xlu0 %v4185_v42  ;;  %946 = vrot.lane.b32.xlu1 %v899_v38, %s4186_s16 }
 0x23d   : > { %1502 = vperm.xlu0 %3996, %v4354_v52  }
 0x240   : > { %961 = vrot.lane.b32.xlu1 %v899_v38, %s4187_s17 }
 0x241   : > { %1098 = vrot.lane.b32.xlu0 %v4536_v43, %s4188_s19 }
 0x242   : > { %3997 = vset.pattern.permute.xlu0 %v4189_v45 }
 0x244   : > { %976 = vrot.lane.b32.xlu1 %v899_v38, %s4190_s20 }
 0x245   : > { %1517 = vperm.xlu0 %3997, %v4354_v52  }
 0x248   : > { %991 = vrot.lane.b32.xlu1 %v899_v38, %s4191_s21 }
 0x249   : > { %1196 = vrot.lane.b32.xlu0 %v4549_v49, %s4192_s22 }
 0x24a   : > { %3998 = vset.pattern.permute.xlu0 %v4193_v50 }
 0x24c   : > { %1021 = vrot.lane.b32.xlu1 %v4491_v25, %s4194_s23 }
 0x24d   : > { %1532 = vperm.xlu0 %3998, %v4354_v52  }
 0x250   : > { %1036 = vrot.lane.b32.xlu1 %v4491_v25, %s4195_s24 }
 0x251   : > { %3999 = vset.pattern.permute.xlu0 %v4196_v53 }
 0x252   : > { %1547 = vperm.xlu0 %3999, %v4354_v52  }
 0x254   : > { %1051 = vrot.lane.b32.xlu1 %v4491_v25, %s4197_s25 }
 0x256   : > { %4000 = vset.pattern.permute.xlu0 %v4198_v55 }
 0x257   : > { %1562 = vperm.xlu0 %4000, %v4354_v52  }
 0x258   : > { %1066 = vrot.lane.b32.xlu1 %v4491_v25, %s5828_s9  ;;  %s5830_s9 = smov 14  }
 0x25b   : > { %4001 = vset.pattern.permute.xlu0 %v4200_v57 }
 0x25c   : > { %1577 = vperm.xlu0 %4001, %v4354_v52   ;;  %1081 = vrot.lane.b32.xlu1 %v4491_v25, %s5827_s30  ;;  %s5829_s30 = smov 97  }
 0x260   : > { %4002 = vset.pattern.permute.xlu0 %v4202_v60  ;;  %1096 = vrot.lane.b32.xlu1 %v4491_v25, %s4188_s19  ;;  %s5831_s19 = smov 28  }
 0x261   : > { %1592 = vperm.xlu0 %4002, %v4354_v52   ;;  %v4597_v52 = vpop.permute.xlu0 %969 }
 0x264   : > { %1141 = vrot.lane.b32.xlu1 %v4505_v32, %s4203_s26 }
 0x265   : > { %1569 = vrot.lane.b32.xlu0 %v4584_v62, %s5829_s30  ;;  %v4603_v3 = vpop.permute.xlu0 %984  ;;  %s5832_s30 = smov 86  }
 0x266   : > { %4003 = vset.pattern.permute.xlu0 %v4129_v47  ;;  %v1245_v47 = vrot.slane %v4480_v21, %v4442_v6  ;;  %v1365_v21 = vrot.slane %v4487_v23, %v4442_v6 }
 0x268   : > { %1156 = vrot.lane.b32.xlu1 %v4505_v32, %s5831_s19  ;;  %v1252_v9 = vmul.f32 %v4448_v11, %v1245_v47  ;;  %s5839_s19 = smov 13   ;;  %v4646_v24 = vmul.f32 %v4448_v11, %v1365_v21 }
 0x269   : > { %v4613_v8 = vpop.permute.xlu0 %999 }
 0x26c   : > { %1171 = vrot.lane.b32.xlu1 %v4505_v32, %s5830_s9  ;;  %s5833_s9 = smov 41  }
 0x26d   : > { %v4619_v12 = vpop.permute.xlu0 %1029 }
 0x270   : > { %1194 = vrot.lane.b32.xlu1 %v4505_v32, %s4192_s22  ;;  %s5834_s22 = smov 27  }
 0x271   : > { %v4625_v14 = vpop.permute.xlu0 %1044 }
 0x274   : > { %1224 = vrot.lane.b32.xlu1 %v4505_v32, %s5832_s30  ;;  %s5835_s30 = smov 127  }
 0x275   : > { %v4630_v17 = vpop.permute.xlu0 %1059 }
 0x278   : > { %1254 = vrot.lane.b32.xlu1 %v1252_v9, %s5833_s9  ;;  %s5836_s9 = smov 113  }
 0x279   : > { %v4636_v19 = vpop.permute.xlu0 %1074 }
 0x27c   : > { %1269 = vrot.lane.b32.xlu1 %v1252_v9, %s5834_s22  ;;  %s5837_s22 = smov 99  }
 0x27d   : > { %v4648_v25 = vpop.permute.xlu0 %1089 }
 0x280   : > { %1284 = vrot.lane.b32.xlu1 %v1252_v9, %s5839_s19  ;;  %s4218_s19 = smov 126  }
 0x281   : > { %v4656_v23 = vpop.permute.xlu0 %1104 }
 0x284   : > { %1299 = vrot.lane.b32.xlu1 %v1252_v9, %s5835_s30  ;;  %s5838_s30 = smov 85  }
 0x285   : > { %v4664_v28 = vpop.permute.xlu0 %1119 }
 0x288   : > { %1314 = vrot.lane.b32.xlu1 %v1252_v9, %s5836_s9  ;;  %s5840_s9 = smov 40  }
 0x289   : > { %v4672_v30 = vpop.permute.xlu0 %1149 }
 0x28a   : > { %v4633_v18 = vpop.permute.xlu1 %778  ;;  %5897 = vst [vmem:[#allocation11_spill] sm:$0xff] %v4672_v30 }
 0x28c   : > { %1329 = vrot.lane.b32.xlu1 %v1252_v9, %s5837_s22  ;;  %s5841_s22 = smov 26  }
 0x28d   : > { %v4680_v39 = vpop.permute.xlu0 %1179 }
 0x28e   : > { %v4638_v20 = vpop.permute.xlu1 %796  ;;  %5898 = vst [vmem:[#allocation12_spill] sm:$0xff] %v4680_v39 }
 0x290   : > { %1344 = vrot.lane.b32.xlu1 %v1252_v9, %s5838_s30  ;;  %s4217_s30 = smov 12  }
 0x291   : > { %v4688_v41 = vpop.permute.xlu0 %1187 }
 0x292   : > { %v4643_v22 = vpop.permute.xlu1 %826  ;;  %5899 = vst [vmem:[#allocation13_spill] sm:$0xff] %v4688_v41 }
 0x294   : > { %1374 = vrot.lane.b32.xlu1 %v4646_v24, %s5840_s9  ;;  %s4219_s9 = smov 112  }
 0x295   : > { %v4694_v45 = vpop.permute.xlu0 %1202 }
 0x296   : > { %v4652_v26 = vpop.permute.xlu1 %841  ;;  %5900 = vst [vmem:[#allocation14_spill] sm:$0xff] %v4694_v45 }
 0x298   : > { %1389 = vrot.lane.b32.xlu1 %v4646_v24, %s5841_s22  ;;  %s4220_s22 = smov 98  }
 0x299   : > { %v4702_v53 = vpop.permute.xlu0 %1217 }
 0x29a   : > { %v4658_v27 = vpop.permute.xlu1 %856  ;;  %5901 = vst [vmem:[#allocation15_spill] sm:$0xff] %v4702_v53 }
 0x29c   : > { %1404 = vrot.lane.b32.xlu1 %v4646_v24, %s4217_s30 }
 0x29d   : > { %v4710_v57 = vpop.permute.xlu0 %1277 }
 0x29e   : > { %v4662_v11 = vpop.permute.xlu1 %871  ;;  %5902 = vst [vmem:[#allocation16_spill] sm:$0xff] %v4710_v57 }
 0x2a0   : > { %1419 = vrot.lane.b32.xlu1 %v4646_v24, %s4218_s19 }
 0x2a1   : > { %v4718_v47 = vpop.permute.xlu0 %1292 }
 0x2a2   : > { %v4668_v29 = vpop.permute.xlu1 %901  ;;  %5903 = vst [vmem:[#allocation17_spill] sm:$0xff] %v4718_v47 }
 0x2a4   : > { %1434 = vrot.lane.b32.xlu1 %v4646_v24, %s4219_s9 }
 0x2a5   : > { %v4726_v9 = vpop.permute.xlu0 %1307 }
 0x2a6   : > { %v4674_v37 = vpop.permute.xlu1 %916  ;;  %5904 = vst [vmem:[#allocation18_spill] sm:$0xff] %v4726_v9 }
 0x2a8   : > { %1449 = vrot.lane.b32.xlu1 %v4646_v24, %s4220_s22 }
 0x2a9   : > { %v4734_v4 = vpop.permute.xlu0 %1322 }
 0x2aa   : > { %v4678_v38 = vpop.permute.xlu1 %931  ;;  %5905 = vst [vmem:[#allocation19_spill] sm:$0xff] %v4734_v4 }
 0x2ac   : > { %813 = vrot.lane.b32.xlu1 %v4516_v36, %s4172_s18  ;;  %s5914_s18 = smov 1  }
 0x2ad   : > { %v4742_v16 = vpop.permute.xlu0 %1337 }
 0x2ae   : > { %v4684_v40 = vpop.permute.xlu1 %946  ;;  %5907 = vst [vmem:[#allocation21_spill] sm:$0xff] %v4742_v16 }
 0x2b0   : > { %828 = vrot.lane.b32.xlu1 %v4516_v36, %s4175_s29  ;;  %s5917_s29 = smov 115  }
 0x2b1   : > { %v4750_v47 = vpop.permute.xlu0 %1352 }
 0x2b2   : > { %v4690_v42 = vpop.permute.xlu1 %961  ;;  %5910 = vst [vmem:[#allocation24_spill] sm:$0xff] %v4750_v47 }
 0x2b4   : > { %843 = vrot.lane.b32.xlu1 %v4516_v36, %s4177_s10  ;;  %s5919_s10 = smov 87  }
 0x2b6   : > { %v4696_v46 = vpop.permute.xlu1 %976 }
 0x2b8   : > { %858 = vrot.lane.b32.xlu1 %v4516_v36, %s4178_s11  ;;  %s4224_s11 = smov 25  }
 0x2ba   : > { %v4700_v50 = vpop.permute.xlu1 %991 }
 0x2bc   : > { %873 = vrot.lane.b32.xlu1 %v4516_v36, %s4179_s12  ;;  %s4225_s12 = smov 11  }
 0x2be   : > { %v4706_v55 = vpop.permute.xlu1 %1021 }
 0x2c0   : > { %903 = vrot.lane.b32.xlu1 %v4502_v31, %s4180_s13  ;;  %s5925_s13 = smov 28  }
 0x2c2   : > { %v4712_v59 = vpop.permute.xlu1 %1036 }
 0x2c4   : > { %918 = vrot.lane.b32.xlu1 %v4502_v31, %s4182_s14  ;;  %s5927_s14 = smov 14  }
 0x2c6   : > { %v4716_v60 = vpop.permute.xlu1 %1051 }
 0x2c8   : > { %933 = vrot.lane.b32.xlu1 %v4502_v31, %s4184_s15  ;;  %s5929_s15 = smov 100  }
 0x2ca   : > { %v4722_v36 = vpop.permute.xlu1 %1066 }
 0x2cc   : > { %948 = vrot.lane.b32.xlu1 %v4502_v31, %s4186_s16  ;;  %s5933_s16 = smov 41  }
 0x2ce   : > { %v4728_v21 = vpop.permute.xlu1 %1081 }
 0x2d0   : > { %963 = vrot.lane.b32.xlu1 %v4502_v31, %s4187_s17  ;;  %s5935_s17 = smov 27  }
 0x2d2   : > { %v4732_v2 = vpop.permute.xlu1 %1096 }
 0x2d4   : > { %978 = vrot.lane.b32.xlu1 %v4502_v31, %s4190_s20  ;;  %s5938_s20 = smov 13  }
 0x2d6   : > { %v4738_v5 = vpop.permute.xlu1 %1141 }
 0x2d7   : > { %5906 = vst [vmem:[#allocation20_spill] sm:$0xff] %v4738_v5 }
 0x2d8   : > { %993 = vrot.lane.b32.xlu1 %v4502_v31, %s4191_s21  ;;  %v4758_v31 = vpop.permute.xlu0 %1382  ;;  %s5940_s21 = smov 127  }
 0x2d9   : > { %5912 = vst [vmem:[#allocation26_spill] sm:$0xff] %v4758_v31  ;;  %v4777_v31 = vld [vmem:[%s5819_s4] sm:$0xff] }
 0x2da   : > { %v4744_v6 = vpop.permute.xlu1 %1156  ;;  %5920 = vst [vmem:[#allocation31_spill] sm:$0xff] %v4777_v31  ;;  %1602 = vperm.xlu0 %4003, %v4777_v31  }
 0x2db   : > { %5908 = vst [vmem:[#allocation22_spill] sm:$0xff] %v4744_v6 }
 0x2dc   : > { %1023 = vrot.lane.b32.xlu1 %v4536_v43, %s4194_s23  ;;  %v4766_v15 = vpop.permute.xlu0 %1397  ;;  %s5942_s23 = smov 113  }
 0x2dd   : > { %5916 = vst [vmem:[#allocation29_spill] sm:$0xff] %v4766_v15 }
 0x2de   : > { %v4748_v9 = vpop.permute.xlu1 %1171 }
 0x2df   : > { %5909 = vst [vmem:[#allocation23_spill] sm:$0xff] %v4748_v9 }
 0x2e0   : > { %1038 = vrot.lane.b32.xlu1 %v4536_v43, %s4195_s24  ;;  %v4780_v13 = vpop.permute.xlu0 %1412  ;;  %s5945_s24 = smov 99  }
 0x2e1   : > { %5921 = vst [vmem:[#allocation32_spill] sm:$0xff] %v4780_v13 }
 0x2e2   : > { %v4754_v4 = vpop.permute.xlu1 %1194 }
 0x2e3   : > { %5911 = vst [vmem:[#allocation25_spill] sm:$0xff] %v4754_v4 }
 0x2e4   : > { %1053 = vrot.lane.b32.xlu1 %v4536_v43, %s4197_s25  ;;  %s5946_s25 = smov 85  }
 0x2e6   : > { %v4760_v16 = vpop.permute.xlu1 %1224 }
 0x2e7   : > { %5913 = vst [vmem:[#allocation27_spill] sm:$0xff] %v4760_v16 }
 0x2e8   : > { %1068 = vrot.lane.b32.xlu1 %v4536_v43, %s5914_s18  ;;  %s5947_s18 = smov 40  }
 0x2ea   : > { %v4764_v57 = vpop.permute.xlu1 %1254 }
 0x2eb   : > { %5915 = vst [vmem:[#allocation28_spill] sm:$0xff] %v4764_v57 }
 0x2ec   : > { %1083 = vrot.lane.b32.xlu1 %v4536_v43, %s5917_s29  ;;  %s5948_s29 = smov 26  }
 0x2ee   : > { %v4770_v47 = vpop.permute.xlu1 %1269 }
 0x2ef   : > { %5918 = vst [vmem:[#allocation30_spill] sm:$0xff] %v4770_v47  ;;  %v4788_v47 = vpop.permute.xlu0 %1427 }
 0x2f0   : > { %1113 = vrot.lane.b32.xlu1 %v4536_v43, %s5919_s10  ;;  %5924 = vst [vmem:[#allocation35_spill] sm:$0xff] %v4788_v47  ;;  %s4223_s10 = smov 39  }
 0x2f2   : > { %v4782_v57 = vpop.permute.xlu1 %1284 }
 0x2f3   : > { %5922 = vst [vmem:[#allocation33_spill] sm:$0xff] %v4782_v57  ;;  %v4796_v31 = vpop.permute.xlu0 %1608 }
 0x2f4   : > { %1143 = vrot.lane.b32.xlu1 %v4549_v49, %s4203_s26  ;;  %s5931_s26 = smov 86  }
 0x2f6   : > { %v4786_v15 = vpop.permute.xlu1 %1299 }
 0x2f7   : > { %5923 = vst [vmem:[#allocation34_spill] sm:$0xff] %v4786_v15  ;;  %v812_v15 = vpop.permute.xlu0 %811 }
 0x2f8   : > { %1158 = vrot.lane.b32.xlu1 %v4549_v49, %s5925_s13  ;;  %s4226_s13 = smov 125  }
 0x2fa   : > { %v4792_v43 = vpop.permute.xlu1 %1314 }
 0x2fb   : > { %5926 = vst [vmem:[#allocation36_spill] sm:$0xff] %v4792_v43  ;;  %v4810_v43 = vpop.permute.xlu0 %1111 }
 0x2fc   : > { %1173 = vrot.lane.b32.xlu1 %v4549_v49, %s5927_s14  ;;  %s4227_s14 = smov 111  }
 0x2fe   : > { %v4798_v13 = vpop.permute.xlu1 %1329 }
 0x2ff   : > { %5928 = vst [vmem:[#allocation37_spill] sm:$0xff] %v4798_v13  ;;  %v4818_v53 = vpop.permute.xlu0 %1209 }
 0x300   : > { %1211 = vrot.lane.b32.xlu1 %v4549_v49, %s5929_s15  ;;  %5937 = vst [vmem:[#allocation42_spill] sm:$0xff] %v4818_v53  ;;  %s5956_s15 = smov 97  }
 0x302   : > { %v4802_v57 = vpop.permute.xlu1 %1344 }
 0x303   : > { %5930 = vst [vmem:[#allocation38_spill] sm:$0xff] %v4802_v57 }
 0x304   : > { %1226 = vrot.lane.b32.xlu1 %v4549_v49, %s5931_s26  ;;  %s4228_s26 = smov 83  }
 0x306   : > { %v4806_v47 = vpop.permute.xlu1 %1374 }
 0x307   : > { %5932 = vst [vmem:[#allocation39_spill] sm:$0xff] %v4806_v47  ;;  %v781_v47 = vpop.permute.xlu0 %780 }
 0x308   : > { %1256 = vrot.lane.b32.xlu1 %v4508_v33, %s5933_s16 }
 0x30a   : > { %v4812_v16 = vpop.permute.xlu1 %1389 }
 0x30b   : > { %5934 = vst [vmem:[#allocation40_spill] sm:$0xff] %v4812_v16  ;;  %v5943_v16 = vlaneseq  ;;  %v799_v53 = vpop.permute.xlu0 %798 }
 0x30c   : > { %1271 = vrot.lane.b32.xlu1 %v4508_v33, %s5935_s17 }
 0x30d   : > { %v4831_v49 = vand.u32 127, %v5943_v16 }
 0x30e   : > { %v4816_v13 = vpop.permute.xlu1 %1404 }
 0x30f   : > { %5936 = vst [vmem:[#allocation41_spill] sm:$0xff] %v4816_v13  ;;  %vm800_vm2 = vcmp.lt.s32.totalorder %v4831_v49, 31  ;;  %vm784_vm3 = vcmp.lt.s32.totalorder %v4831_v49, 45  ;;  %vm815_vm4 = vcmp.lt.s32.totalorder %v4831_v49, 17  ;;  %vm830_vm5 = vcmp.lt.s32.totalorder %v4831_v49, 3 }
 0x310   : > { %1286 = vrot.lane.b32.xlu1 %v4508_v33, %s5938_s20  ;;  %v801_v41 = vsel %vm800_vm2, %v4638_v20, %v799_v53  ;;  %v786_v16 = vsel %vm784_vm3, %v781_v47, %v4633_v18  ;;  %v785_v32 = vsel %vm784_vm3, %v4633_v18, %v781_v47  ;;  %vm845_vm6 = vcmp.lt.s32.totalorder %v4831_v49, 117 }
 0x311   : > { %v808_v9 = vmul.f32 %v4592_v0, %v801_v41  ;;  %vm860_vm7 = vcmp.lt.s32.totalorder %v4831_v49, 103  ;;  %vm875_vm8 = vcmp.lt.s32.totalorder %v4831_v49, 89  ;;  %vm905_vm9 = vcmp.lt.s32.totalorder %v4831_v49, 44 }
 0x312   : > { %v4822_v57 = vpop.permute.xlu1 %1419  ;;  %vm920_vm10 = vcmp.lt.s32.totalorder %v4831_v49, 30  ;;  %vm935_vm11 = vcmp.lt.s32.totalorder %v4831_v49, 16  ;;  %vm950_vm12 = vcmp.lt.s32.totalorder %v4831_v49, 2  ;;  %vm965_vm13 = vcmp.lt.s32.totalorder %v4831_v49, 116 }
 0x313   : > { %5939 = vst [vmem:[#allocation43_spill] sm:$0xff] %v4822_v57  ;;  %vm980_vm14 = vcmp.lt.s32.totalorder %v4831_v49, 102  ;;  %vm995_vm15 = vcmp.lt.s32.totalorder %v4831_v49, 88  ;;  %vm1025_vm0 = vcmp.lt.s32.totalorder %v4831_v49, 43  ;;  %vm1040_vm1 = vcmp.lt.s32.totalorder %v4831_v49, 29 }
 0x314   : > { %1301 = vrot.lane.b32.xlu1 %v4508_v33, %s5940_s21  ;;  %vm1070_vm3 = vcmp.lt.s32.totalorder %v4831_v49, 1 }
 0x316   : > { %v4826_v45 = vpop.permute.xlu1 %1434 }
 0x317   : > { %5941 = vst [vmem:[#allocation44_spill] sm:$0xff] %v4826_v45  ;;  %v802_v45 = vsel %vm800_vm2, %v799_v53, %v4638_v20  ;;  %v792_v20 = vmul.f32 %v4580_v61, %v786_v16  ;;  %vm1055_vm2 = vcmp.lt.s32.totalorder %v4831_v49, 15 }
 0x318   : > { %1316 = vrot.lane.b32.xlu1 %v4508_v33, %s5942_s23  ;;  %v807_v39 = vmul.f32 %v4592_v0, %v802_v45 }
 0x31a   : > { %v4833_v13 = vpop.permute.xlu1 %1449  ;;  %v809_v45 = vadd.f32 %v807_v39, %v792_v20 }
 0x31b   : > { %5944 = vst [vmem:[#allocation45_spill] sm:$0xff] %v4833_v13 }
 0x31c   : > { %1331 = vrot.lane.b32.xlu1 %v4508_v33, %s5945_s24 }
 0x31e   : > { %v814_v57 = vpop.permute.xlu1 %813 }
 0x31f   : > { %v817_v13 = vsel %vm815_vm4, %v814_v57, %v812_v15  ;;  %v816_v10 = vsel %vm815_vm4, %v812_v15, %v814_v57  ;;  %vm1100_vm4 = vcmp.lt.s32.totalorder %v4831_v49, 101 }
 0x320   : > { %1346 = vrot.lane.b32.xlu1 %v4508_v33, %s5946_s25  ;;  %v822_v53 = vmul.f32 %v4538_v44, %v817_v13  ;;  %v793_v33 = vmul.f32 %v4580_v61, %v785_v32  ;;  %v823_v47 = vmul.f32 %v4538_v44, %v816_v10 }
 0x322   : > { %v829_v4 = vpop.permute.xlu1 %828  ;;  %v810_v41 = vadd.f32 %v808_v9, %v793_v33  ;;  %v824_v16 = vadd.f32 %v822_v53, %v809_v45 }
 0x323   : > { %v832_v6 = vsel %vm830_vm5, %v829_v4, %v4643_v22  ;;  %v831_v18 = vsel %vm830_vm5, %v4643_v22, %v829_v4  ;;  %vm1085_vm5 = vcmp.lt.s32.totalorder %v4831_v49, 115 }
 0x324   : > { %1376 = vrot.lane.b32.xlu1 %v4510_v34, %s5947_s18  ;;  %v837_v0 = vmul.f32 %v4601_v1, %v832_v6  ;;  %v838_v30 = vmul.f32 %v4601_v1, %v831_v18  ;;  %v825_v4 = vadd.f32 %v823_v47, %v810_v41 }
 0x326   : > { %v844_v15 = vpop.permute.xlu1 %843  ;;  %v839_v32 = vadd.f32 %v837_v0, %v824_v16  ;;  %v840_v22 = vadd.f32 %v838_v30, %v825_v4 }
 0x327   : > { %v846_v57 = vsel %vm845_vm6, %v4652_v26, %v844_v15  ;;  %v847_v13 = vsel %vm845_vm6, %v844_v15, %v4652_v26  ;;  %vm1115_vm6 = vcmp.lt.s32.totalorder %v4831_v49, 87 }
 0x328   : > { %v852_v5 = vmul.f32 %v4607_v7, %v846_v57  ;;  %1391 = vrot.lane.b32.xlu1 %v4510_v34, %s5948_s29  ;;  %v853_v6 = vmul.f32 %v4607_v7, %v847_v13 }
 0x32a   : > { %v859_v44 = vpop.permute.xlu1 %858  ;;  %v854_v1 = vadd.f32 %v852_v5, %v839_v32  ;;  %v855_v9 = vadd.f32 %v853_v6, %v840_v22 }
 0x32b   : > { %v861_v61 = vsel %vm860_vm7, %v4658_v27, %v859_v44  ;;  %v862_v10 = vsel %vm860_vm7, %v859_v44, %v4658_v27  ;;  %vm1145_vm7 = vcmp.lt.s32.totalorder %v4831_v49, 42 }
 0x32c   : > { %v867_v26 = vmul.f32 %v4547_v48, %v861_v61  ;;  %v868_v39 = vmul.f32 %v4547_v48, %v862_v10  ;;  %1406 = vrot.lane.b32.xlu1 %v4510_v34, %s4217_s30 }
 0x32e   : > { %v869_v20 = vadd.f32 %v867_v26, %v854_v1  ;;  %v874_v53 = vpop.permute.xlu1 %873  ;;  %v870_v18 = vadd.f32 %v868_v39, %v855_v9 }
 0x32f   : > { %v876_v7 = vsel %vm875_vm8, %v4662_v11, %v874_v53  ;;  %v877_v33 = vsel %vm875_vm8, %v874_v53, %v4662_v11  ;;  %vm1160_vm8 = vcmp.lt.s32.totalorder %v4831_v49, 28 }
 0x330   : > { %v882_v27 = vmul.f32 %v4554_v51, %v876_v7  ;;  %v883_v30 = vmul.f32 %v4554_v51, %v877_v33  ;;  %1421 = vrot.lane.b32.xlu1 %v4510_v34, %s4218_s19  ;;  %s4221_s19 = smov 104  }
 0x332   : > { %v884_v5 = vadd.f32 %v882_v27, %v869_v20  ;;  %v885_v48 = vadd.f32 %v883_v30, %v870_v18  ;;  %v904_v45 = vpop.permute.xlu1 %903 }
 0x333   : > { %v906_v47 = vsel %vm905_vm9, %v4668_v29, %v904_v45  ;;  %v907_v0 = vsel %vm905_vm9, %v904_v45, %v4668_v29  ;;  %vm1175_vm9 = vcmp.lt.s32.totalorder %v4831_v49, 14 }
 0x334   : > { %v912_v15 = vmul.f32 %v4561_v54, %v907_v0  ;;  %v913_v11 = vmul.f32 %v4561_v54, %v906_v47  ;;  %1436 = vrot.lane.b32.xlu1 %v4510_v34, %s4219_s9  ;;  %v4120_v54 = vld [vmem:[%s5818_s3] sm:$0xff] }
 0x335   : > { %v1611_v32 = vmul.f32 %v4120_v54, %v4796_v31 }
 0x336   : > { %v914_v51 = vadd.f32 %v912_v15, %v884_v5  ;;  %v915_v41 = vadd.f32 %v913_v11, %v885_v48  ;;  %v919_v57 = vpop.permute.xlu1 %918 }
 0x337   : > { %v921_v13 = vsel %vm920_vm10, %v4674_v37, %v919_v57  ;;  %v922_v16 = vsel %vm920_vm10, %v919_v57, %v4674_v37  ;;  %vm1198_vm10 = vcmp.lt.s32.totalorder %v4831_v49, 114 }
 0x338   : > { %v927_v4 = vmul.f32 %v4567_v56, %v922_v16  ;;  %v928_v29 = vmul.f32 %v4567_v56, %v921_v13  ;;  %1451 = vrot.lane.b32.xlu1 %v4510_v34, %s4220_s22  ;;  %s4222_s22 = smov 84  }
 0x33a   : > { %v929_v6 = vadd.f32 %v927_v4, %v914_v51  ;;  %v930_v44 = vadd.f32 %v928_v29, %v915_v41  ;;  %v934_v61 = vpop.permute.xlu1 %933 }
 0x33b   : > { %v936_v37 = vsel %vm935_vm11, %v4678_v38, %v934_v61  ;;  %v937_v10 = vsel %vm935_vm11, %v934_v61, %v4678_v38  ;;  %vm1213_vm11 = vcmp.lt.s32.totalorder %v4831_v49, 100 }
 0x33c   : > { %v942_v56 = vmul.f32 %v4574_v58, %v937_v10  ;;  %v943_v22 = vmul.f32 %v4574_v58, %v936_v37  ;;  %1613 = vrot.lane.b32.xlu1 %v1611_v32, %s4221_s19 }
 0x33e   : > { %v944_v1 = vadd.f32 %v942_v56, %v929_v6  ;;  %v945_v26 = vadd.f32 %v943_v22, %v930_v44  ;;  %v949_v39 = vpop.permute.xlu1 %948 }
 0x33f   : > { %v951_v31 = vsel %vm950_vm12, %v4684_v40, %v949_v39  ;;  %v952_v9 = vsel %vm950_vm12, %v949_v39, %v4684_v40  ;;  %vm1228_vm12 = vcmp.lt.s32.totalorder %v4831_v49, 86 }
 0x340   : > { %v957_v20 = vmul.f32 %v4586_v63, %v952_v9  ;;  %v958_v53 = vmul.f32 %v4586_v63, %v951_v31  ;;  %1464 = vrot.lane.b32.xlu1 %v4646_v24, %s4222_s22  ;;  %v4916_v63 = vpop.permute.xlu0 %1442 }
 0x342   : > { %v959_v58 = vadd.f32 %v957_v20, %v944_v1  ;;  %v960_v38 = vadd.f32 %v958_v53, %v945_v26  ;;  %v964_v7 = vpop.permute.xlu1 %963 }
 0x343   : > { %v966_v33 = vsel %vm965_vm13, %v4690_v42, %v964_v7  ;;  %v967_v18 = vsel %vm965_vm13, %v964_v7, %v4690_v42  ;;  %vm1258_vm13 = vcmp.lt.s32.totalorder %v4831_v49, 41 }
 0x344   : > { %v972_v27 = vmul.f32 %v4597_v52, %v966_v33  ;;  %v973_v40 = vmul.f32 %v4597_v52, %v967_v18  ;;  %1466 = vrot.lane.b32.xlu1 %v4510_v34, %s4222_s22  ;;  %v4926_v51 = vpop.permute.xlu0 %1457 }
 0x346   : > { %v974_v24 = vadd.f32 %v972_v27, %v959_v58  ;;  %v975_v30 = vadd.f32 %v973_v40, %v960_v38  ;;  %v979_v5 = vpop.permute.xlu1 %978 }
 0x347   : > { %v981_v48 = vsel %vm980_vm14, %v4696_v46, %v979_v5  ;;  %v982_v45 = vsel %vm980_vm14, %v979_v5, %v4696_v46  ;;  %vm1273_vm14 = vcmp.lt.s32.totalorder %v4831_v49, 27 }
 0x348   : > { %v987_v47 = vmul.f32 %v4603_v3, %v981_v48  ;;  %v988_v42 = vmul.f32 %v4603_v3, %v982_v45  ;;  %1494 = vrot.lane.b32.xlu1 %v4584_v62, %s4223_s10 }
 0x34a   : > { %v989_v34 = vadd.f32 %v987_v47, %v974_v24  ;;  %v990_v52 = vadd.f32 %v988_v42, %v975_v30  ;;  %v994_v0 = vpop.permute.xlu1 %993 }
 0x34b   : > { %v996_v15 = vsel %vm995_vm15, %v4700_v50, %v994_v0  ;;  %v997_v11 = vsel %vm995_vm15, %v994_v0, %v4700_v50  ;;  %vm1288_vm15 = vcmp.lt.s32.totalorder %v4831_v49, 13 }
 0x34c   : > { %v1002_v46 = vmul.f32 %v4613_v8, %v996_v15  ;;  %v1003_v41 = vmul.f32 %v4613_v8, %v997_v11  ;;  %1496 = vrot.lane.b32.xlu1 %v4512_v35, %s4223_s10  ;;  %v4938_v8 = vpop.permute.xlu0 %1472  ;;  %v5949_v11 = vld [vmem:[#allocation20_spill] sm:$0xff] }
 0x34e   : > { %v1004_v3 = vadd.f32 %v1002_v46, %v989_v34  ;;  %v1005_v57 = vadd.f32 %v1003_v41, %v990_v52  ;;  %v1024_v13 = vpop.permute.xlu1 %1023 }
 0x34f   : > { %v1026_v16 = vsel %vm1025_vm0, %v4706_v55, %v1024_v13  ;;  %v1027_v4 = vsel %vm1025_vm0, %v1024_v13, %v4706_v55  ;;  %vm1303_vm0 = vcmp.lt.s32.totalorder %v4831_v49, 127 }
 0x350   : > { %v1032_v29 = vmul.f32 %v4619_v12, %v1027_v4  ;;  %v1033_v50 = vmul.f32 %v4619_v12, %v1026_v16  ;;  %1509 = vrot.lane.b32.xlu1 %v4584_v62, %s4224_s11  ;;  %v4948_v26 = vpop.permute.xlu0 %1502  ;;  %v5951_v16 = vld [vmem:[#allocation22_spill] sm:$0xff] }
 0x352   : > { %v1034_v54 = vadd.f32 %v1032_v29, %v1004_v3  ;;  %v1035_v32 = vadd.f32 %v1033_v50, %v1005_v57  ;;  %v1039_v6 = vpop.permute.xlu1 %1038  ;;  %v5950_v3 = vld [vmem:[#allocation11_spill] sm:$0xff] }
 0x353   : > { %v1041_v44 = vsel %vm1040_vm1, %v4712_v59, %v1039_v6  ;;  %v1042_v61 = vsel %vm1040_vm1, %v1039_v6, %v4712_v59  ;;  %vm1318_vm1 = vcmp.lt.s32.totalorder %v4831_v49, 113 }
 0x354   : > { %v1047_v55 = vmul.f32 %v4625_v14, %v1042_v61  ;;  %v1048_v37 = vmul.f32 %v4625_v14, %v1041_v44  ;;  %1511 = vrot.lane.b32.xlu1 %v4512_v35, %s4224_s11  ;;  %s5993_s11 = smul.u32 600, %s5998_s28 }
 0x356   : > { %v1049_v12 = vadd.f32 %v1047_v55, %v1034_v54  ;;  %v1050_v10 = vadd.f32 %v1048_v37, %v1035_v32  ;;  %v1054_v56 = vpop.permute.xlu1 %1053  ;;  %v5952_v32 = vld [vmem:[#allocation8_spill] sm:$0xff] }
 0x357   : > { %v1056_v22 = vsel %vm1055_vm2, %v4716_v60, %v1054_v56  ;;  %v1057_v1 = vsel %vm1055_vm2, %v1054_v56, %v4716_v60  ;;  %vm1333_vm2 = vcmp.lt.s32.totalorder %v4831_v49, 99 }
 0x358   : > { %v1062_v39 = vmul.f32 %v4630_v17, %v1057_v1  ;;  %v1063_v59 = vmul.f32 %v4630_v17, %v1056_v22  ;;  %1524 = vrot.lane.b32.xlu1 %v4584_v62, %s4225_s12  ;;  %v1099_v17 = vpop.permute.xlu0 %1098  ;;  %v5954_v1 = vld [vmem:[#allocation25_spill] sm:$0xff] }
 0x359   : > { %v1101_v18 = vsel %vm1100_vm4, %v4732_v2, %v1099_v17  ;;  %v1102_v27 = vsel %vm1100_vm4, %v1099_v17, %v4732_v2  ;;  %vm1378_vm4 = vcmp.lt.s32.totalorder %v4831_v49, 40 }
 0x35a   : > { %v1064_v14 = vadd.f32 %v1062_v39, %v1049_v12  ;;  %v1065_v31 = vadd.f32 %v1063_v59, %v1050_v10  ;;  %v1069_v9 = vpop.permute.xlu1 %1068  ;;  %v1107_v30 = vmul.f32 %v4656_v23, %v1101_v18  ;;  %v1108_v5 = vmul.f32 %v4656_v23, %v1102_v27  ;;  %v5953_v10 = vld [vmem:[#allocation23_spill] sm:$0xff]  ;;  %v5955_v59 = vld [vmem:[#allocation12_spill] sm:$0xff]  ;;  %v5960_v18 = vld [vmem:[#allocation14_spill] sm:$0xff] }
 0x35b   : > { %v1071_v20 = vsel %vm1070_vm3, %v4722_v36, %v1069_v9  ;;  %v1072_v53 = vsel %vm1070_vm3, %v1069_v9, %v4722_v36  ;;  %vm1348_vm3 = vcmp.lt.s32.totalorder %v4831_v49, 85 }
 0x35c   : > { %v1077_v60 = vmul.f32 %v4636_v19, %v1072_v53  ;;  %v1078_v58 = vmul.f32 %v4636_v19, %v1071_v20  ;;  %1526 = vrot.lane.b32.xlu1 %v4512_v35, %s4225_s12  ;;  %v4983_v13 = vpop.permute.xlu0 %1517  ;;  %v5957_v20 = vld [vmem:[#allocation6_spill] sm:$0xff]  ;;  %v5958_v53 = vld [vmem:[#allocation13_spill] sm:$0xff] }
 0x35e   : > { %v1079_v38 = vadd.f32 %v1077_v60, %v1064_v14  ;;  %v1080_v7 = vadd.f32 %v1078_v58, %v1065_v31  ;;  %v1084_v33 = vpop.permute.xlu1 %1083  ;;  %v1190_v60 = vmul.f32 %v5958_v53, %v5957_v20  ;;  %v5959_v58 = vld [vmem:[#allocation7_spill] sm:$0xff] }
 0x35f   : > { %v1086_v36 = vsel %vm1085_vm5, %v4728_v21, %v1084_v33  ;;  %v1087_v40 = vsel %vm1085_vm5, %v1084_v33, %v4728_v21  ;;  %v1191_v17 = vmul.f32 %v5958_v53, %v5959_v58  ;;  %vm1393_vm5 = vcmp.lt.s32.totalorder %v4831_v49, 26 }
 0x360   : > { %v1092_v24 = vmul.f32 %v4648_v25, %v1086_v36  ;;  %v1093_v19 = vmul.f32 %v4648_v25, %v1087_v40  ;;  %1539 = vrot.lane.b32.xlu1 %v4584_v62, %s4226_s13  ;;  %v1197_v12 = vpop.permute.xlu0 %1196  ;;  %v5961_v36 = vld [vmem:[#allocation42_spill] sm:$0xff] }
 0x361   : > { %v1199_v39 = vsel %vm1198_vm10, %v5954_v1, %v1197_v12  ;;  %v1200_v9 = vsel %vm1198_vm10, %v1197_v12, %v5954_v1  ;;  %vm1468_vm10 = vcmp.lt.s32.totalorder %v4831_v49, 84 }
 0x362   : > { %v1094_v48 = vadd.f32 %v1092_v24, %v1079_v38  ;;  %v1095_v45 = vadd.f32 %v1093_v19, %v1080_v7  ;;  %v1114_v2 = vpop.permute.xlu1 %1113  ;;  %v1205_v27 = vmul.f32 %v5960_v18, %v1199_v39  ;;  %v1206_v19 = vmul.f32 %v5960_v18, %v1200_v9 }
 0x363   : > { %v1116_v47 = vsel %vm1115_vm6, %v4810_v43, %v1114_v2  ;;  %v1117_v21 = vsel %vm1115_vm6, %v1114_v2, %v4810_v43  ;;  %v5962_v2 = vld [vmem:[#allocation15_spill] sm:$0xff]  ;;  %vm1408_vm6 = vcmp.lt.s32.totalorder %v4831_v49, 12 }
 0x364   : > { %v1109_v42 = vadd.f32 %v1107_v30, %v1094_v48  ;;  %v1110_v25 = vadd.f32 %v1108_v5, %v1095_v45  ;;  %v1122_v34 = vmul.f32 %v4664_v28, %v1116_v47  ;;  %v1123_v52 = vmul.f32 %v4664_v28, %v1117_v21  ;;  %1541 = vrot.lane.b32.xlu1 %v4512_v35, %s4226_s13 }
 0x366   : > { %v1124_v0 = vadd.f32 %v1122_v34, %v1109_v42  ;;  %v1125_v15 = vadd.f32 %v1123_v52, %v1110_v25  ;;  %v1144_v23 = vpop.permute.xlu1 %1143  ;;  %v5963_v25 = vld [vmem:[#allocation27_spill] sm:$0xff] }
 0x367   : > { %v1146_v46 = vsel %vm1145_vm7, %v5949_v11, %v1144_v23  ;;  %v1147_v41 = vsel %vm1145_vm7, %v1144_v23, %v5949_v11  ;;  %v5964_v23 = vld [vmem:[#allocation9_spill] sm:$0xff]  ;;  %vm1423_vm7 = vcmp.lt.s32.totalorder %v4831_v49, 126 }
 0x368   : > { %v1152_v57 = vmul.f32 %v5950_v3, %v1147_v41  ;;  %v1153_v43 = vmul.f32 %v5950_v3, %v1146_v46  ;;  %1554 = vrot.lane.b32.xlu1 %v4584_v62, %s4227_s14 }
 0x36a   : > { %v1159_v28 = vpop.permute.xlu1 %1158  ;;  %v1154_v50 = vadd.f32 %v1152_v57, %v1124_v0  ;;  %v1155_v54 = vadd.f32 %v1153_v43, %v1125_v15  ;;  %v5965_v57 = vld [vmem:[#allocation28_spill] sm:$0xff] }
 0x36b   : > { %v1161_v4 = vsel %vm1160_vm8, %v5951_v16, %v1159_v28  ;;  %v1162_v29 = vsel %vm1160_vm8, %v1159_v28, %v5951_v16  ;;  %v5966_v16 = vld [vmem:[#allocation10_spill] sm:$0xff]  ;;  %vm1438_vm8 = vcmp.lt.s32.totalorder %v4831_v49, 112 }
 0x36c   : > { %v1167_v6 = vmul.f32 %v5952_v32, %v1162_v29  ;;  %v1168_v44 = vmul.f32 %v5952_v32, %v1161_v4  ;;  %1556 = vrot.lane.b32.xlu1 %v4512_v35, %s4227_s14  ;;  %s5433_s14 = scalar_lea.vmem %s5823_s8, %s5993_s11 }
 0x36e   : > { %v1169_v61 = vadd.f32 %v1167_v6, %v1154_v50  ;;  %v1170_v55 = vadd.f32 %v1168_v44, %v1155_v54  ;;  %v1174_v37 = vpop.permute.xlu1 %1173  ;;  %v5967_v6 = vld [vmem:[#allocation30_spill] sm:$0xff] }
 0x36f   : > { %v1176_v56 = vsel %vm1175_vm9, %v5953_v10, %v1174_v37  ;;  %v1177_v22 = vsel %vm1175_vm9, %v1174_v37, %v5953_v10  ;;  %vm1453_vm9 = vcmp.lt.s32.totalorder %v4831_v49, 98 }
 0x370   : > { %v1182_v14 = vmul.f32 %v5955_v59, %v1177_v22  ;;  %v1183_v31 = vmul.f32 %v5955_v59, %v1176_v56  ;;  %1571 = vrot.lane.b32.xlu1 %v4512_v35, %s5956_s15  ;;  %v5969_v22 = vld [vmem:[#allocation33_spill] sm:$0xff] }
 0x371   : > { %v5970_v59 = vld [vmem:[#allocation17_spill] sm:$0xff] }
 0x372   : > { %v1184_v38 = vadd.f32 %v1182_v14, %v1169_v61  ;;  %v1185_v7 = vadd.f32 %v1183_v31, %v1170_v55  ;;  %v1212_v33 = vpop.permute.xlu1 %1211  ;;  %v5968_v61 = vld [vmem:[#allocation16_spill] sm:$0xff] }
 0x373   : > { %v1214_v40 = vsel %vm1213_vm11, %v5961_v36, %v1212_v33  ;;  %v1215_v24 = vsel %vm1213_vm11, %v1212_v33, %v5961_v36  ;;  %vm1498_vm11 = vcmp.lt.s32.totalorder %v4831_v49, 39 }
 0x374   : > { %v1192_v30 = vadd.f32 %v1190_v60, %v1184_v38  ;;  %v1193_v5 = vadd.f32 %v1191_v17, %v1185_v7  ;;  %1584 = vrot.lane.b32.xlu1 %v4584_v62, %s4228_s26  ;;  %v1220_v47 = vmul.f32 %v5962_v2, %v1214_v40  ;;  %v1221_v21 = vmul.f32 %v5962_v2, %v1215_v24  ;;  %v5971_v60 = vld [vmem:[#allocation34_spill] sm:$0xff]  ;;  %v5973_v40 = vld [vmem:[#allocation36_spill] sm:$0xff] }
 0x375   : > { %v5972_v38 = vld [vmem:[#allocation18_spill] sm:$0xff] }
 0x376   : > { %v1207_v48 = vadd.f32 %v1205_v27, %v1192_v30  ;;  %v1208_v45 = vadd.f32 %v1206_v19, %v1193_v5  ;;  %v1227_v42 = vpop.permute.xlu1 %1226  ;;  %v5974_v30 = vld [vmem:[#allocation19_spill] sm:$0xff] }
 0x377   : > { %v1229_v34 = vsel %vm1228_vm12, %v5963_v25, %v1227_v42  ;;  %v1230_v52 = vsel %vm1228_vm12, %v1227_v42, %v5963_v25  ;;  %v5976_v25 = vld [vmem:[#allocation21_spill] sm:$0xff]  ;;  %vm1513_vm12 = vcmp.lt.s32.totalorder %v4831_v49, 25 }
 0x378   : > { %v1222_v0 = vadd.f32 %v1220_v47, %v1207_v48  ;;  %v1223_v15 = vadd.f32 %v1221_v21, %v1208_v45  ;;  %v1235_v11 = vmul.f32 %v5964_v23, %v1229_v34  ;;  %v1236_v62 = vmul.f32 %v5964_v23, %v1230_v52  ;;  %1586 = vrot.lane.b32.xlu1 %v4512_v35, %s4228_s26  ;;  %v5975_v21 = vld [vmem:[#allocation37_spill] sm:$0xff] }
 0x37a   : > { %v1237_v46 = vadd.f32 %v1235_v11, %v1222_v0  ;;  %v1238_v41 = vadd.f32 %v1236_v62, %v1223_v15  ;;  %v1257_v3 = vpop.permute.xlu1 %1256  ;;  %v5977_v15 = vld [vmem:[#allocation38_spill] sm:$0xff]  ;;  %v5978_v11 = vld [vmem:[#allocation24_spill] sm:$0xff] }
 0x37b   : > { %v1259_v43 = vsel %vm1258_vm13, %v5965_v57, %v1257_v3  ;;  %v1260_v28 = vsel %vm1258_vm13, %v1257_v3, %v5965_v57  ;;  %v5979_v3 = vld [vmem:[#allocation39_spill] sm:$0xff]  ;;  %vm1528_vm13 = vcmp.lt.s32.totalorder %v4831_v49, 11 }
 0x37c   : > { %v1265_v4 = vmul.f32 %v5966_v16, %v1260_v28  ;;  %v1266_v29 = vmul.f32 %v5966_v16, %v1259_v43  ;;  %v5980_v43 = vld [vmem:[#allocation26_spill] sm:$0xff] }
 0x37e   : > { %v1267_v50 = vadd.f32 %v1265_v4, %v1237_v46  ;;  %v1268_v54 = vadd.f32 %v1266_v29, %v1238_v41  ;;  %v1272_v32 = vpop.permute.xlu1 %1271  ;;  %v5981_v29 = vld [vmem:[#allocation40_spill] sm:$0xff] }
 0x37f   : > { %v1274_v44 = vsel %vm1273_vm14, %v5967_v6, %v1272_v32  ;;  %v1275_v35 = vsel %vm1273_vm14, %v1272_v32, %v5967_v6  ;;  %vm1543_vm14 = vcmp.lt.s32.totalorder %v4831_v49, 125 }
 0x380   : > { %v1280_v55 = vmul.f32 %v5968_v61, %v1275_v35  ;;  %v1281_v37 = vmul.f32 %v5968_v61, %v1274_v44  ;;  %v5983_v35 = vld [vmem:[#allocation41_spill] sm:$0xff] }
 0x382   : > { %v1282_v12 = vadd.f32 %v1280_v55, %v1267_v50  ;;  %v1283_v10 = vadd.f32 %v1281_v37, %v1268_v54  ;;  %v1287_v56 = vpop.permute.xlu1 %1286  ;;  %v5982_v54 = vld [vmem:[#allocation29_spill] sm:$0xff]  ;;  %v5984_v55 = vld [vmem:[#allocation32_spill] sm:$0xff] }
 0x383   : > { %v1289_v1 = vsel %vm1288_vm15, %v5969_v22, %v1287_v56  ;;  %v1290_v39 = vsel %vm1288_vm15, %v1287_v56, %v5969_v22  ;;  %v5985_v56 = vld [vmem:[#allocation43_spill] sm:$0xff]  ;;  %vm1558_vm15 = vcmp.lt.s32.totalorder %v4831_v49, 111 }
 0x384   : > { %v1295_v14 = vmul.f32 %v5970_v59, %v1290_v39  ;;  %v1296_v31 = vmul.f32 %v5970_v59, %v1289_v1  ;;  %v5986_v1 = vld [vmem:[#allocation35_spill] sm:$0xff] }
 0x386   : > { %v1297_v9 = vadd.f32 %v1295_v14, %v1282_v12  ;;  %v1298_v20 = vadd.f32 %v1296_v31, %v1283_v10  ;;  %v1302_v53 = vpop.permute.xlu1 %1301  ;;  %v5987_v31 = vld [vmem:[#allocation44_spill] sm:$0xff] }
 0x387   : > { %v1304_v58 = vsel %vm1303_vm0, %v5971_v60, %v1302_v53  ;;  %v1305_v17 = vsel %vm1303_vm0, %v1302_v53, %v5971_v60  ;;  %vm1573_vm0 = vcmp.lt.s32.totalorder %v4831_v49, 97 }
 0x388   : > { %v1310_v7 = vmul.f32 %v5972_v38, %v1304_v58  ;;  %v1311_v33 = vmul.f32 %v5972_v38, %v1305_v17  ;;  %v5988_v58 = vld [vmem:[#allocation45_spill] sm:$0xff] }
 0x38a   : > { %v1312_v18 = vadd.f32 %v1310_v7, %v1297_v9  ;;  %v1313_v27 = vadd.f32 %v1311_v33, %v1298_v20  ;;  %v1317_v36 = vpop.permute.xlu1 %1316 }
 0x38b   : > { %v1319_v24 = vsel %vm1318_vm1, %v5973_v40, %v1317_v36  ;;  %v1320_v19 = vsel %vm1318_vm1, %v1317_v36, %v5973_v40  ;;  %vm1588_vm1 = vcmp.lt.s32.totalorder %v4831_v49, 83 }
 0x38c   : > { %v1325_v5 = vmul.f32 %v5974_v30, %v1319_v24  ;;  %v1326_v48 = vmul.f32 %v5974_v30, %v1320_v19 }
 0x38e   : > { %v1327_v45 = vadd.f32 %v1325_v5, %v1312_v18  ;;  %v5044_v2 = vadd.f32 %v1326_v48, %v1313_v27  ;;  %v1332_v47 = vpop.permute.xlu1 %1331  ;;  %v5989_v18 = vld [vmem:[#allocation31_spill] sm:$0xff] }
 0x38f   : > { %v1334_v42 = vsel %vm1333_vm2, %v5975_v21, %v1332_v47 }
 0x390   : > { %v1340_v34 = vmul.f32 %v5976_v25, %v1334_v42 }
 0x392   : > { %v1342_v52 = vadd.f32 %v1340_v34, %v1327_v45  ;;  %v1347_v0 = vpop.permute.xlu1 %1346 }
 0x393   : > { %v1349_v23 = vsel %vm1348_vm3, %v5977_v15, %v1347_v0 }
 0x394   : > { %v1355_v62 = vmul.f32 %v5978_v11, %v1349_v23  ;;  %v5094_v23 = vpop.permute.xlu0 %1532 }
 0x396   : > { %v1357_v46 = vadd.f32 %v1355_v62, %v1342_v52  ;;  %v1377_v41 = vpop.permute.xlu1 %1376 }
 0x397   : > { %v1380_v57 = vsel %vm1378_vm4, %v1377_v41, %v5979_v3 }
 0x398   : > { %v1385_v28 = vmul.f32 %v5980_v43, %v1380_v57 }
 0x39a   : > { %v1387_v16 = vadd.f32 %v1385_v28, %v1357_v46  ;;  %v1392_v4 = vpop.permute.xlu1 %1391  ;;  %v1335_v28 = vsel %vm1333_vm2, %v1332_v47, %v5975_v21 }
 0x39b   : > { %v1395_v50 = vsel %vm1393_vm5, %v1392_v4, %v5981_v29  ;;  %v1394_v47 = vsel %vm1393_vm5, %v5981_v29, %v1392_v4  ;;  %vm1751_vm5 = vcmask 64512  }
 0x39c   : > { %v1400_v32 = vmul.f32 %v5982_v54, %v1395_v50 }
 0x39e   : > { %v1402_v6 = vadd.f32 %v1400_v32, %v1387_v16  ;;  %v1407_v44 = vpop.permute.xlu1 %1406  ;;  %v5103_v16 = vpop.permute.xlu0 %1547 }
 0x39f   : > { %v1410_v61 = vsel %vm1408_vm6, %v1407_v44, %v5983_v35 }
 0x3a0   : > { %v1415_v37 = vmul.f32 %v5984_v55, %v1410_v61  ;;  %v1341_v61 = vmul.f32 %v5976_v25, %v1335_v28 }
 0x3a2   : > { %v1417_v12 = vadd.f32 %v1415_v37, %v1402_v6  ;;  %v1422_v10 = vpop.permute.xlu1 %1421  ;;  %v1350_v6 = vsel %vm1348_vm3, %v1347_v0, %v5977_v15  ;;  %v1379_v37 = vsel %vm1378_vm4, %v5979_v3, %v1377_v41  ;;  %v1343_v0 = vadd.f32 %v1341_v61, %v5044_v2 }
 0x3a3   : > { %v1424_v22 = vsel %vm1423_vm7, %v5985_v56, %v1422_v10  ;;  %v1386_v25 = vmul.f32 %v5980_v43, %v1379_v37  ;;  %v1409_v41 = vsel %vm1408_vm6, %v5983_v35, %v1407_v44  ;;  %v1401_v3 = vmul.f32 %v5982_v54, %v1394_v47 }
 0x3a4   : > { %v1430_v39 = vmul.f32 %v5986_v1, %v1424_v22  ;;  %v1425_v4 = vsel %vm1423_vm7, %v1422_v10, %v5985_v56  ;;  %v1416_v2 = vmul.f32 %v5984_v55, %v1409_v41  ;;  %vm1618_vm3 = vcmp.eq.s32.totalorder %v4831_v49, 0 }
 0x3a5   : > { %v1431_v35 = vmul.f32 %v5986_v1, %v1425_v4  ;;  %vm3287_vm6 = vcmask 1042432   ;;  %vm3288_vm7 = vsmask.f32 2304 }
 0x3a6   : > { %v1432_v59 = vadd.f32 %v1430_v39, %v1417_v12  ;;  %v1437_v14 = vpop.permute.xlu1 %1436  ;;  %v1356_v12 = vmul.f32 %v5978_v11, %v1350_v6  ;;  %v1563_v39 = vpop.permute.xlu0 %1562 }
 0x3a7   : > { %v1439_v9 = vsel %vm1438_vm8, %v5987_v31, %v1437_v14  ;;  %v1440_v43 = vsel %vm1438_vm8, %v1437_v14, %v5987_v31  ;;  %vm3290_vm8 = vcmask 1046532  }
 0x3a8   : > { %v1445_v20 = vmul.f32 %v4916_v63, %v1439_v9  ;;  %v1358_v11 = vadd.f32 %v1356_v12, %v1343_v0  ;;  %v1446_v55 = vmul.f32 %v4916_v63, %v1440_v43 }
 0x3aa   : > { %v1447_v53 = vadd.f32 %v1445_v20, %v1432_v59  ;;  %v1452_v60 = vpop.permute.xlu1 %1451  ;;  %v1388_v29 = vadd.f32 %v1386_v25, %v1358_v11  ;;  %v1578_v20 = vpop.permute.xlu0 %1577 }
 0x3ab   : > { %v1454_v17 = vsel %vm1453_vm9, %v5988_v58, %v1452_v60 }
 0x3ac   : > { %v1460_v38 = vmul.f32 %v4926_v51, %v1454_v17  ;;  %v1403_v44 = vadd.f32 %v1401_v3, %v1388_v29 }
 0x3ae   : > { %v1462_v7 = vadd.f32 %v1460_v38, %v1447_v53  ;;  %v1614_v33 = vpop.permute.xlu1 %1613  ;;  %v1455_v53 = vsel %vm1453_vm9, %v1452_v60, %v5988_v58  ;;  %v1418_v56 = vadd.f32 %v1416_v2, %v1403_v44  ;;  %v1593_v60 = vpop.permute.xlu0 %1592  ;;  %vm3291_vm9 = vsmask.f32 6400 }
 0x3af   : > { %v1616_v27 = vadd.f32 %v1614_v33, %v5989_v18  ;;  %v1461_v38 = vmul.f32 %v4926_v51, %v1455_v53 }
 0x3b0   : > { %v1433_v31 = vadd.f32 %v1431_v35, %v1418_v56 }
 0x3b1   : > { %1622 = vperm.xlu0 %4003, %v1616_v27  }
 0x3b2   : > { %v1465_v36 = vpop.permute.xlu1 %1464  ;;  %v1448_v58 = vadd.f32 %v1446_v55, %v1433_v31 }
 0x3b4   : > { %v1463_v27 = vadd.f32 %v1461_v38, %v1448_v58 }
 0x3b6   : > { %v1467_v40 = vpop.permute.xlu1 %1466 }
 0x3b7   : > { %v1469_v24 = vsel %vm1468_vm10, %v1465_v36, %v1467_v40  ;;  %v1470_v14 = vsel %vm1468_vm10, %v1467_v40, %v1465_v36  ;;  %vm3289_vm10 = vmand %vm3287_vm6, %vm3288_vm7 }
 0x3b8   : > { %v1475_v19 = vmul.f32 %v4938_v8, %v1469_v24  ;;  %v1476_v18 = vmul.f32 %v4938_v8, %v1470_v14 }
 0x3ba   : > { %v1477_v30 = vadd.f32 %v1475_v19, %v1462_v7  ;;  %v1495_v5 = vpop.permute.xlu1 %1494  ;;  %v1478_v19 = vadd.f32 %v1476_v18, %v1463_v27 }
 0x3be   : > { %v1497_v48 = vpop.permute.xlu1 %1496 }
 0x3bf   : > { %v1500_v45 = vsel %vm1498_vm11, %v1497_v48, %v1495_v5  ;;  %v1499_v33 = vsel %vm1498_vm11, %v1495_v5, %v1497_v48  ;;  %v1681_v48 = vld [vmem:[%s5820_s5] sm:$0xff]  ;;  %vm3292_vm11 = vmand %vm3290_vm8, %vm3291_vm9 }
 0x3c0   : > { %v1505_v42 = vmul.f32 %v4948_v26, %v1500_v45  ;;  %v1506_v36 = vmul.f32 %v4948_v26, %v1499_v33  ;;  %v1682_v26 = vld [vmem:[%s5820_s5 + $0x8] sm:$0xff]  ;;  %v1570_v45 = vpop.permute.xlu0 %1569 }
 0x3c1   : > { %1848 = vmatprep.subr.mxu0 %v1682_v26  ;;  %3763 = vmatprep.subr.mxu1 %v1682_v26 }
 0x3c2   : > { %v1507_v34 = vadd.f32 %v1505_v42, %v1477_v30  ;;  %v1510_v52 = vpop.permute.xlu1 %1509  ;;  %v1508_v42 = vadd.f32 %v1506_v36, %v1478_v19  ;;  %1849 = vmatpush1.msra.mxu0 %v1681_v48  ;;  %3764 = vmatpush1.msra.mxu1 %v1681_v48 }
 0x3c6   : > { %v1512_v62 = vpop.permute.xlu1 %1511 }
 0x3c7   : > { %v1515_v46 = vsel %vm1513_vm12, %v1512_v62, %v1510_v52  ;;  %v1514_v63 = vsel %vm1513_vm12, %v1510_v52, %v1512_v62  ;;  %vm5579_vm12 = vmor %vm3292_vm11, %vm3289_vm10 }
 0x3c8   : > { %v1520_v57 = vmul.f32 %v4983_v13, %v1515_v46  ;;  %v1521_v30 = vmul.f32 %v4983_v13, %v1514_v63 }
 0x3ca   : > { %v1522_v50 = vadd.f32 %v1520_v57, %v1507_v34  ;;  %v1525_v32 = vpop.permute.xlu1 %1524  ;;  %v1523_v57 = vadd.f32 %v1521_v30, %v1508_v42 }
 0x3ce   : > { %v1527_v22 = vpop.permute.xlu1 %1526 }
 0x3cf   : > { %v1530_v21 = vsel %vm1528_vm13, %v1527_v22, %v1525_v32  ;;  %v1529_v51 = vsel %vm1528_vm13, %v1525_v32, %v1527_v22 }
 0x3d0   : > { %v1535_v15 = vmul.f32 %v5094_v23, %v1530_v21  ;;  %v1536_v34 = vmul.f32 %v5094_v23, %v1529_v51 }
 0x3d2   : > { %v1537_v59 = vadd.f32 %v1535_v15, %v1522_v50  ;;  %v1540_v9 = vpop.permute.xlu1 %1539  ;;  %v1538_v23 = vadd.f32 %v1536_v34, %v1523_v57 }
 0x3d6   : > { %v1542_v54 = vpop.permute.xlu1 %1541 }
 0x3d7   : > { %v1544_v10 = vsel %vm1543_vm14, %v1540_v9, %v1542_v54  ;;  %v1545_v8 = vsel %vm1543_vm14, %v1542_v54, %v1540_v9 }
 0x3d8   : > { %v1550_v17 = vmul.f32 %v5103_v16, %v1544_v10  ;;  %v1551_v28 = vmul.f32 %v5103_v16, %v1545_v8  ;;  %v1603_v16 = vpop.permute.xlu0 %1602 }
 0x3da   : > { %v1552_v1 = vadd.f32 %v1550_v17, %v1537_v59  ;;  %v1555_v7 = vpop.permute.xlu1 %1554  ;;  %v1553_v12 = vadd.f32 %v1551_v28, %v1538_v23 }
 0x3de   : > { %v1557_v40 = vpop.permute.xlu1 %1556 }
 0x3df   : > { %v1559_v24 = vsel %vm1558_vm15, %v1555_v7, %v1557_v40  ;;  %v1560_v62 = vsel %vm1558_vm15, %v1557_v40, %v1555_v7 }
 0x3e0   : > { %v1565_v5 = vmul.f32 %v1563_v39, %v1559_v24  ;;  %v1566_v6 = vmul.f32 %v1563_v39, %v1560_v62 }
 0x3e2   : > { %v1567_v52 = vadd.f32 %v1565_v5, %v1552_v1  ;;  %v1572_v13 = vpop.permute.xlu1 %1571  ;;  %v1568_v47 = vadd.f32 %v1566_v6, %v1553_v12 }
 0x3e3   : > { %v1574_v46 = vsel %vm1573_vm0, %v1570_v45, %v1572_v13  ;;  %v1575_v32 = vsel %vm1573_vm0, %v1572_v13, %v1570_v45 }
 0x3e4   : > { %v1580_v50 = vmul.f32 %v1578_v20, %v1574_v46  ;;  %v1581_v22 = vmul.f32 %v1578_v20, %v1575_v32 }
 0x3e6   : > { %v1582_v61 = vadd.f32 %v1580_v50, %v1567_v52  ;;  %v1585_v37 = vpop.permute.xlu1 %1584  ;;  %v1583_v15 = vadd.f32 %v1581_v22, %v1568_v47 }
 0x3ea   : > { %v1587_v21 = vpop.permute.xlu1 %1586 }
 0x3eb   : > { %v1589_v0 = vsel %vm1588_vm1, %v1585_v37, %v1587_v21  ;;  %v1590_v25 = vsel %vm1588_vm1, %v1587_v21, %v1585_v37  ;;  %v1684_v21 = vld [vmem:[%s5820_s5 + $0x18] sm:$0xff] }
 0x3ec   : > { %v1595_v41 = vmul.f32 %v1593_v60, %v1589_v0  ;;  %v1596_v11 = vmul.f32 %v1593_v60, %v1590_v25  ;;  %v4229_v60 = vmov 1.0   ;;  %2091 = vmatprep.subr.mxu1 %v1684_v21  ;;  %v5990_v25 = vmov 0.0  }
 0x3ee   : > { %v1597_v3 = vadd.f32 %v1595_v41, %v1582_v61  ;;  %v1598_v59 = vadd.f32 %v1596_v11, %v1583_v15 }
 0x3f0   : > { %v1606_v9 = vadd.f32 %v1603_v16, %v1598_v59  ;;  %v1605_v40 = vadd.f32 %v1603_v16, %v1597_v3 }
 0x3f2   : > { %v1630_v4 = vmul.f32 0.70710677, %v1606_v9  ;;  %v1628_v63 = vmul.f32 0.5, %v1606_v9 }
 0x3f4   : > { %v1636_v29 = vand.u32 2147483647, %v1630_v4  ;;  %vm1632_vm2 = vcmp.lt.f32.partialorder %v1630_v4, 0.0 }
 0x3f5   : > { %v1634_v58 = vsel %vm1632_vm2, -1.0, %v4229_v60 }
 0x3f6   : > { %v1638_v39 = vmul.f32 0.3275911, %v1636_v29  ;;  %v1664_v43 = vsub.f32 0.0, %v1636_v29 }
 0x3f8   : > { %v1640_v2 = vadd.f32 1.0, %v1638_v39  ;;  %v1666_v44 = vmul.f32 %v1664_v43, %v1636_v29  ;;  %v1683_v43 = vld [vmem:[%s5820_s5 + $0x10] sm:$0xff] }
 0x3fa   : > { %4112 = vrcp.f32 %v1640_v2  ;;  %v1669_v53 = vmul.f32 1.442695, %v1666_v44  ;;  %v1686_v44 = vld [vmem:[%s5820_s5 + $0x28] sm:$0xff] }
 0x3fc   : > { %4114 = vpow2.f32 %v1669_v53 }
 0x404   : > { %v4113_v20 = vpop.eup %4112 }
 0x405   : > { %v1646_v35 = vmul.f32 1.0614054, %v4113_v20 }
 0x406   : > { %v4115_v1 = vpop.eup %4114 }
 0x407   : > { %v1648_v54 = vadd.f32 -1.4531521, %v1646_v35 }
 0x409   : > { %v1650_v10 = vmul.f32 %v4113_v20, %v1648_v54 }
 0x40b   : > { %v1652_v56 = vadd.f32 1.4214138, %v1650_v10 }
 0x40d   : > { %v1654_v55 = vmul.f32 %v4113_v20, %v1652_v56 }
 0x40f   : > { %v1656_v17 = vadd.f32 -0.28449672, %v1654_v55 }
 0x411   : > { %v1658_v14 = vmul.f32 %v4113_v20, %v1656_v17 }
 0x413   : > { %v1660_v31 = vadd.f32 0.2548296, %v1658_v14 }
 0x415   : > { %v1662_v38 = vmul.f32 %v4113_v20, %v1660_v31 }
 0x417   : > { %v1672_v7 = vmul.f32 %v4115_v1, %v1662_v38 }
 0x419   : > { %v1674_v33 = vsub.f32 1.0, %v1672_v7 }
 0x41b   : > { %v1676_v18 = vmul.f32 %v1674_v33, %v1634_v58 }
 0x41d   : > { %v1678_v27 = vadd.f32 1.0, %v1676_v18 }
 0x41f   : > { %v1680_v36 = vmul.f32 %v1678_v27, %v1628_v63 }
 0x421   : > { %1719 = vxpose.xlu0.b32.start.end [1/1] (short) %v1680_v36, 128 }
 0x430   : > { %v1623_v51 = vpop.permute.xlu0 %1622 }
 0x431   : > { %v1625_v24 = vsel %vm1618_vm3, %v1623_v51, %v1605_v40  ;;  %v1685_v40 = vld [vmem:[%s5820_s5 + $0x20] sm:$0xff] }
 0x432   : > { %v1629_v19 = vmul.f32 0.70710677, %v1625_v24  ;;  %v1627_v12 = vmul.f32 0.5, %v1625_v24  ;;  %v5410_v51 = vld [vmem:[%s5821_s6] sm:$0x3f]  ;;  %v5991_v24 = vld [vmem:[#allocation4_spill] sm:$0xff] }
 0x434   : > { %vm1631_vm4 = vcmp.lt.f32.partialorder %v1629_v19, 0.0  ;;  %v1635_v30 = vand.u32 2147483647, %v1629_v19  ;;  %v5416_v19 = vrot.slane %v5410_v51, %v5991_v24 }
 0x435   : > { %v1633_v5 = vsel %vm1631_vm4, -1.0, %v4229_v60 }
 0x436   : > { %v1637_v8 = vmul.f32 0.3275911, %v1635_v30  ;;  %v1663_v48 = vsub.f32 0.0, %v1635_v30 }
 0x438   : > { %v1639_v26 = vadd.f32 1.0, %v1637_v8  ;;  %v1665_v42 = vmul.f32 %v1663_v48, %v1635_v30  ;;  %v5992_v30 = vld [vmem:[#allocation5_spill] sm:$0xff] }
 0x43a   : > { %4116 = vrcp.f32 %v1639_v26  ;;  %v1667_v13 = vmul.f32 1.442695, %v1665_v42 }
 0x43c   : > { %4118 = vpow2.f32 %v1667_v13 }
 0x444   : > { %v4117_v45 = vpop.eup %4116 }
 0x445   : > { %v1645_v34 = vmul.f32 1.0614054, %v4117_v45 }
 0x446   : > { %v4119_v23 = vpop.eup %4118 }
 0x447   : > { %v1647_v52 = vadd.f32 -1.4531521, %v1645_v34 }
 0x449   : > { %v1649_v62 = vmul.f32 %v4117_v45, %v1647_v52 }
 0x44b   : > { %v1651_v46 = vadd.f32 1.4214138, %v1649_v62 }
 0x44d   : > { %v1653_v49 = vmul.f32 %v4117_v45, %v1651_v46 }
 0x44f   : > { %v1655_v57 = vadd.f32 -0.28449672, %v1653_v49 }
 0x451   : > { %v1657_v28 = vmul.f32 %v4117_v45, %v1655_v57 }
 0x453   : > { %v1659_v50 = vadd.f32 0.2548296, %v1657_v28 }
 0x455   : > { %v1661_v32 = vmul.f32 %v4117_v45, %v1659_v50 }
 0x457   : > { %v1671_v6 = vmul.f32 %v4119_v23, %v1661_v32 }
 0x459   : > { %v1673_v61 = vsub.f32 1.0, %v1671_v6 }
 0x45b   : > { %v1675_v37 = vmul.f32 %v1673_v61, %v1633_v5  ;;  %v5421_v5 = vrot.slane %v5410_v51, %v5992_v30 }
 0x45d   : > { %v1677_v22 = vadd.f32 1.0, %v1675_v37 }
 0x45f   : > { %v1679_v47 = vmul.f32 %v1677_v22, %v1627_v12 }
 0x461   : > { %1687 = vxpose.xlu1.b32.start.end [1/1] (short) %v1679_v47, 128 }
 0x4a1   : > { %v5221_v29 = vpop.trf.xlu0 }
 0x4a5   : > { %v5230_v2 = vpop.trf.xlu0 }
 0x4a9   : > { %v5245_v54 = vpop.trf.xlu0 }
 0x4ad   : > { %v5255_v10 = vpop.trf.xlu0 }
 0x4b1   : > { %v5264_v17 = vpop.trf.xlu0 }
 0x4b5   : > { %v5274_v31 = vpop.trf.xlu0 }
 0x4b9   : > { %v5279_v38 = vpop.trf.xlu0 }
 0x4bd   : > { %v5287_v1 = vpop.trf.xlu0 }
 0x4c1   : > { %v5292_v7 = vpop.trf.xlu0 }
 0x4c5   : > { %v5300_v33 = vpop.trf.xlu0 }
 0x4c9   : > { %v5305_v60 = vpop.trf.xlu0 }
 0x4cd   : > { %v5313_v58 = vpop.trf.xlu0 }
 0x4d1   : > { %v5318_v18 = vpop.trf.xlu0 }
 0x4d5   : > { %v5326_v63 = vpop.trf.xlu0 }
 0x4d9   : > { %v5331_v27 = vpop.trf.xlu0 }
 0x4dd   : > { %v5338_v36 = vpop.trf.xlu0 }
 0x4e1   : > { %v5179_v0 = vpop.trf.xlu1 }
 0x4e2   : > { %3371 = vmatmul.mubr.msk.f32.vlgmr.msra.gmra.mrb[2].mxu0 %vm1751_vm5, %v5179_v0 }
 0x4e3   : > { %1918 = vmatprep.mubr.f32.mxu0 %v5990_v25 }
 0x4e5   : > { %v5184_v15 = vpop.trf.xlu1 }
 0x4e6   : > { %3372 = vmatmul.mubr.msk.f32.gmra.mrb[4].mxu0 %vm1751_vm5, %v5184_v15 }
 0x4e7   : > { %1924 = vmatprep.mubr.f32.mxu0 %v5990_v25 }
 0x4e9   : > { %v5189_v41 = vpop.trf.xlu1 }
 0x4ea   : > { %3373 = vmatmul.mubr.msk.f32.gmra.mrb[6].mxu0 %vm1751_vm5, %v5189_v41 }
 0x4eb   : > { %1930 = vmatprep.mubr.f32.mxu0 %v5990_v25 }
 0x4ed   : > { %v5194_v11 = vpop.trf.xlu1 }
 0x4ee   : > { %3374 = vmatmul.mubr.msk.f32.gmra.mrb[8].mxu0 %vm1751_vm5, %v5194_v11 }
 0x4ef   : > { %1936 = vmatprep.mubr.f32.mxu0 %v5990_v25 }
 0x4f1   : > { %v5199_v16 = vpop.trf.xlu1 }
 0x4f2   : > { %3375 = vmatmul.mubr.msk.f32.gmra.mrb[10].mxu0 %vm1751_vm5, %v5199_v16 }
 0x4f3   : > { %1942 = vmatprep.mubr.f32.mxu0 %v5990_v25 }
 0x4f5   : > { %v5204_v3 = vpop.trf.xlu1 }
 0x4f6   : > { %3376 = vmatmul.mubr.msk.f32.gmra.mrb[12].mxu0 %vm1751_vm5, %v5204_v3 }
 0x4f7   : > { %1948 = vmatprep.mubr.f32.mxu0 %v5990_v25 }
 0x4f9   : > { %v5209_v59 = vpop.trf.xlu1 }
 0x4fa   : > { %3377 = vmatmul.mubr.msk.f32.gmra.mrb[14].mxu0 %vm1751_vm5, %v5209_v59 }
 0x4fb   : > { %1954 = vmatprep.mubr.f32.mxu0 %v5990_v25 }
 0x4fd   : > { %v5214_v9 = vpop.trf.xlu1 }
 0x4fe   : > { %3378 = vmatmul.mubr.msk.f32.gmra.mrb[16].mxu0 %vm1751_vm5, %v5214_v9 }
 0x4ff   : > { %1960 = vmatprep.mubr.f32.mxu0 %v5990_v25 }
 0x501   : > { %v5219_v4 = vpop.trf.xlu1 }
 0x502   : > { %3379 = vmatmul.mubr.msk.f32.gmra.mrb[18].mxu0 %vm1751_vm5, %v5219_v4 }
 0x503   : > { %1966 = vmatprep.mubr.f32.mxu0 %v5990_v25 }
 0x505   : > { %v5226_v39 = vpop.trf.xlu1 }
 0x506   : > { %3380 = vmatmul.mubr.msk.f32.gmra.mrb[20].mxu0 %vm1751_vm5, %v5226_v39 }
 0x509   : > { %v5235_v20 = vpop.trf.xlu1 }
 0x50a   : > { %3381 = vmatmul.mubr.msk.f32.vlgmr.msra.gmra.mrb[0].mxu1 %vm1751_vm5, %v5235_v20 }
 0x50b   : > { %2092 = vmatpush1.msra.mxu1 %v1683_v43  ;;  %1978 = vmatprep.mubr.f32.mxu1 %v5990_v25 }
 0x50c   : > { %2334 = vmatprep.subr.mxu1 %v1686_v44 }
 0x50d   : > { %v5243_v35 = vpop.trf.xlu1 }
 0x50e   : > { %3382 = vmatmul.mubr.msk.f32.gmra.mrb[2].mxu1 %vm1751_vm5, %v5243_v35 }
 0x50f   : > { %1984 = vmatprep.mubr.f32.mxu1 %v5990_v25 }
 0x511   : > { %v5250_v53 = vpop.trf.xlu1 }
 0x512   : > { %3383 = vmatmul.mubr.msk.f32.gmra.mrb[4].mxu1 %vm1751_vm5, %v5250_v53 }
 0x513   : > { %1990 = vmatprep.mubr.f32.mxu1 %v5990_v25 }
 0x515   : > { %v5257_v56 = vpop.trf.xlu1 }
 0x516   : > { %3384 = vmatmul.mubr.msk.f32.gmra.mrb[6].mxu1 %vm1751_vm5, %v5257_v56 }
 0x517   : > { %1996 = vmatprep.mubr.f32.mxu1 %v5990_v25 }
 0x519   : > { %v5262_v55 = vpop.trf.xlu1 }
 0x51a   : > { %3385 = vmatmul.mubr.msk.f32.gmra.mrb[8].mxu1 %vm1751_vm5, %v5262_v55 }
 0x51b   : > { %2002 = vmatprep.mubr.f32.mxu1 %v5990_v25 }
 0x51d   : > { %v5269_v14 = vpop.trf.xlu1 }
 0x51e   : > { %3386 = vmatmul.mubr.msk.f32.gmra.mrb[10].mxu1 %vm1751_vm5, %v5269_v14 }
 0x51f   : > { %2008 = vmatprep.mubr.f32.mxu1 %v5990_v25 }
 0x522   : > { %3387 = vmatmul.mubr.msk.f32.gmra.mrb[12].mxu1 %vm1751_vm5, %v5221_v29 }
 0x523   : > { %2014 = vmatprep.mubr.f32.mxu1 %v5990_v25 }
 0x526   : > { %3388 = vmatmul.mubr.msk.f32.gmra.mrb[14].mxu1 %vm1751_vm5, %v5230_v2 }
 0x527   : > { %2020 = vmatprep.mubr.f32.mxu1 %v5990_v25 }
 0x52a   : > { %3389 = vmatmul.mubr.msk.f32.gmra.mrb[16].mxu1 %vm1751_vm5, %v5245_v54 }
 0x52b   : > { %2026 = vmatprep.mubr.f32.mxu1 %v5990_v25 }
 0x52e   : > { %3390 = vmatmul.mubr.msk.f32.gmra.mrb[18].mxu1 %vm1751_vm5, %v5255_v10 }
 0x52f   : > { %2032 = vmatprep.mubr.f32.mxu1 %v5990_v25 }
 0x532   : > { %3391 = vmatmul.mubr.msk.f32.gmra.mrb[20].mxu1 %vm1751_vm5, %v5264_v17 }
 0x533   : > { %2038 = vmatprep.mubr.f32.mxu1 %v5990_v25 }
 0x536   : > { %3392 = vmatmul.mubr.msk.f32.gmra.mrb[22].mxu1 %vm1751_vm5, %v5274_v31 }
 0x537   : > { %2044 = vmatprep.mubr.f32.mxu1 %v5990_v25 }
 0x53a   : > { %3393 = vmatmul.mubr.msk.f32.gmra.mrb[24].mxu1 %vm1751_vm5, %v5279_v38 }
 0x53b   : > { %2050 = vmatprep.mubr.f32.mxu1 %v5990_v25 }
 0x53e   : > { %3394 = vmatmul.mubr.msk.f32.gmra.mrb[26].mxu1 %vm1751_vm5, %v5287_v1 }
 0x53f   : > { %2056 = vmatprep.mubr.f32.mxu1 %v5990_v25 }
 0x542   : > { %3395 = vmatmul.mubr.msk.f32.gmra.mrb[28].mxu1 %vm1751_vm5, %v5292_v7 }
 0x543   : > { %2062 = vmatprep.mubr.f32.mxu1 %v5990_v25 }
 0x546   : > { %3396 = vmatmul.mubr.msk.f32.gmra.mrb[30].mxu1 %vm1751_vm5, %v5300_v33 }
 0x547   : > { %2066 = vmatprep.mubr.f32.mxu1 %v5990_v25 }
 0x54a   : > { %3397 = vmatmul.mubr.msk.f32.gmra.mrb[32].mxu1 %vm1751_vm5, %v5305_v60 }
 0x54b   : > { %2070 = vmatprep.mubr.f32.mxu1 %v5990_v25 }
 0x54e   : > { %3398 = vmatmul.mubr.msk.f32.gmra.mrb[34].mxu1 %vm1751_vm5, %v5313_v58 }
 0x54f   : > { %2074 = vmatprep.mubr.f32.mxu1 %v5990_v25 }
 0x552   : > { %3399 = vmatmul.mubr.msk.f32.gmra.mrb[36].mxu1 %vm1751_vm5, %v5318_v18 }
 0x553   : > { %2078 = vmatprep.mubr.f32.mxu1 %v5990_v25 }
 0x556   : > { %3400 = vmatmul.mubr.msk.f32.gmra.mrb[38].mxu1 %vm1751_vm5, %v5326_v63 }
 0x557   : > { %2082 = vmatprep.mubr.f32.mxu1 %v5990_v25 }
 0x55a   : > { %3401 = vmatmul.mubr.msk.f32.gmra.mrb[40].mxu1 %vm1751_vm5, %v5331_v27 }
 0x55b   : > { %2086 = vmatprep.mubr.f32.mxu1 %v5990_v25 }
 0x55e   : > { %3402 = vmatmul.mubr.msk.f32.gmra.mrb[42].mxu1 %vm1751_vm5, %v5338_v36 }
 0x55f   : > { %2155 = vmatprep.mubr.f32.mxu1 %v5990_v25 }
 0x562   : > { %3403 = vmatmul.mubr.msk.f32.vlgmr.msra.gmra.mrb[44].mxu1 %vm1751_vm5, %v5179_v0 }
 0x563   : > { %2335 = vmatpush1.msra.mxu1 %v1685_v40  ;;  %2161 = vmatprep.mubr.f32.mxu1 %v5990_v25 }
 0x566   : > { %3404 = vmatmul.mubr.msk.f32.gmra.mrb[46].mxu1 %vm1751_vm5, %v5184_v15 }
 0x567   : > { %2167 = vmatprep.mubr.f32.mxu1 %v5990_v25 }
 0x56a   : > { %3405 = vmatmul.mubr.msk.f32.gmra.mrb[48].mxu1 %vm1751_vm5, %v5189_v41 }
 0x56b   : > { %2173 = vmatprep.mubr.f32.mxu1 %v5990_v25 }
 0x56e   : > { %3406 = vmatmul.mubr.msk.f32.gmra.mrb[50].mxu1 %vm1751_vm5, %v5194_v11 }
 0x56f   : > { %2179 = vmatprep.mubr.f32.mxu1 %v5990_v25 }
 0x572   : > { %3407 = vmatmul.mubr.msk.f32.gmra.mrb[52].mxu1 %vm1751_vm5, %v5199_v16 }
 0x573   : > { %2185 = vmatprep.mubr.f32.mxu1 %v5990_v25 }
 0x576   : > { %3408 = vmatmul.mubr.msk.f32.gmra.mrb[54].mxu1 %vm1751_vm5, %v5204_v3 }
 0x577   : > { %2191 = vmatprep.mubr.f32.mxu1 %v5990_v25 }
 0x57a   : > { %3409 = vmatmul.mubr.msk.f32.gmra.mrb[56].mxu1 %vm1751_vm5, %v5209_v59 }
 0x57b   : > { %2197 = vmatprep.mubr.f32.mxu1 %v5990_v25 }
 0x57e   : > { %3410 = vmatmul.mubr.msk.f32.gmra.mrb[58].mxu1 %vm1751_vm5, %v5214_v9 }
 0x57f   : > { %2203 = vmatprep.mubr.f32.mxu1 %v5990_v25 }
 0x582   : > { %3411 = vmatmul.mubr.msk.f32.gmra.mrb[60].mxu1 %vm1751_vm5, %v5219_v4 }
 0x583   : > { %2209 = vmatprep.mubr.f32.mxu1 %v5990_v25 }
 0x586   : > { %3412 = vmatmul.mubr.msk.f32.gmra.mrb[62].mxu1 %vm1751_vm5, %v5226_v39 }
 0x587   : > { %2215 = vmatprep.mubr.f32.mxu1 %v5990_v25 }
 0x58a   : > { %3413 = vmatmul.mubr.msk.f32.gmra.mrb[64].mxu1 %vm1751_vm5, %v5235_v20 }
 0x58b   : > { %2221 = vmatprep.mubr.f32.mxu1 %v5990_v25 }
 0x58e   : > { %3414 = vmatmul.mubr.msk.f32.gmra.mrb[66].mxu1 %vm1751_vm5, %v5243_v35 }
 0x58f   : > { %2227 = vmatprep.mubr.f32.mxu1 %v5990_v25 }
 0x592   : > { %3415 = vmatmul.mubr.msk.f32.gmra.mrb[68].mxu1 %vm1751_vm5, %v5250_v53 }
 0x593   : > { %2233 = vmatprep.mubr.f32.mxu1 %v5990_v25 }
 0x596   : > { %3416 = vmatmul.mubr.msk.f32.gmra.mrb[70].mxu1 %vm1751_vm5, %v5257_v56 }
 0x597   : > { %2239 = vmatprep.mubr.f32.mxu1 %v5990_v25 }
 0x59a   : > { %3417 = vmatmul.mubr.msk.f32.gmra.mrb[72].mxu1 %vm1751_vm5, %v5262_v55 }
 0x59b   : > { %2245 = vmatprep.mubr.f32.mxu1 %v5990_v25 }
 0x59e   : > { %3418 = vmatmul.mubr.msk.f32.gmra.mrb[74].mxu1 %vm1751_vm5, %v5269_v14 }
 0x59f   : > { %2251 = vmatprep.mubr.f32.mxu1 %v5990_v25 }
 0x5a2   : > { %3419 = vmatmul.mubr.msk.f32.gmra.mrb[76].mxu1 %vm1751_vm5, %v5221_v29 }
 0x5a3   : > { %2257 = vmatprep.mubr.f32.mxu1 %v5990_v25 }
 0x5a6   : > { %3420 = vmatmul.mubr.msk.f32.gmra.mrb[78].mxu1 %vm1751_vm5, %v5230_v2 }
 0x5a7   : > { %2263 = vmatprep.mubr.f32.mxu1 %v5990_v25 }
 0x5aa   : > { %3421 = vmatmul.mubr.msk.f32.gmra.mrb[80].mxu1 %vm1751_vm5, %v5245_v54 }
 0x5ab   : > { %2269 = vmatprep.mubr.f32.mxu1 %v5990_v25 }
 0x5ae   : > { %3422 = vmatmul.mubr.msk.f32.gmra.mrb[82].mxu1 %vm1751_vm5, %v5255_v10 }
 0x5af   : > { %2275 = vmatprep.mubr.f32.mxu1 %v5990_v25 }
 0x5b2   : > { %3423 = vmatmul.mubr.msk.f32.gmra.mrb[84].mxu1 %vm1751_vm5, %v5264_v17 }
 0x5b3   : > { %2281 = vmatprep.mubr.f32.mxu1 %v5990_v25 }
 0x5b5   : > { %v1914_v8 = vpop.f32.mrb[2].mxu0 }
 0x5b6   : > { %v2609_v26 = vadd.f32 %v5416_v19, %v1914_v8  ;;  %v1916_v48 = vpop.f32.mrb[3].mxu0  ;;  %3424 = vmatmul.mubr.msk.f32.gmra.mrb[86].mxu1 %vm1751_vm5, %v5274_v31 }
 0x5b7   : > { %v2610_v45 = vadd.f32 %v5421_v5, %v1916_v48  ;;  %2287 = vmatprep.mubr.f32.mxu1 %v5990_v25 }
 0x5b9   : > { %v3544_v42 = vpack.c.bf16 %v2610_v45, %v2609_v26  ;;  %v1920_v34 = vpop.f32.mrb[4].mxu0 }
 0x5ba   : > { %v2615_v52 = vadd.f32 %v5416_v19, %v1920_v34  ;;  %v1922_v13 = vpop.f32.mrb[5].mxu0  ;;  %3425 = vmatmul.mubr.msk.f32.gmra.mrb[88].mxu1 %vm1751_vm5, %v5279_v38 }
 0x5bb   : > { %3215 = vst [vmem:[%s5433_s14] sm:$0xff] %v3544_v42  ;;  %v2616_v62 = vadd.f32 %v5421_v5, %v1922_v13  ;;  %2293 = vmatprep.mubr.f32.mxu1 %v5990_v25 }
 0x5bd   : > { %v3547_v46 = vpack.c.bf16 %v2616_v62, %v2615_v52  ;;  %v1926_v49 = vpop.f32.mrb[6].mxu0 }
 0x5be   : > { %v2621_v57 = vadd.f32 %v5416_v19, %v1926_v49  ;;  %v1928_v28 = vpop.f32.mrb[7].mxu0  ;;  %3426 = vmatmul.mubr.msk.f32.gmra.mrb[90].mxu1 %vm1751_vm5, %v5287_v1 }
 0x5bf   : > { %3218 = vst [vmem:[%s5433_s14 + $0x18] sm:$0xff] %v3547_v46  ;;  %v2622_v50 = vadd.f32 %v5421_v5, %v1928_v28  ;;  %2299 = vmatprep.mubr.f32.mxu1 %v5990_v25 }
 0x5c1   : > { %v3550_v32 = vpack.c.bf16 %v2622_v50, %v2621_v57  ;;  %v1932_v23 = vpop.f32.mrb[8].mxu0 }
 0x5c2   : > { %v2627_v6 = vadd.f32 %v5416_v19, %v1932_v23  ;;  %v1934_v61 = vpop.f32.mrb[9].mxu0  ;;  %3427 = vmatmul.mubr.msk.f32.gmra.mrb[92].mxu1 %vm1751_vm5, %v5292_v7 }
 0x5c3   : > { %3221 = vst [vmem:[%s5433_s14 + $0x30] sm:$0xff] %v3550_v32  ;;  %v2628_v37 = vadd.f32 %v5421_v5, %v1934_v61  ;;  %2305 = vmatprep.mubr.f32.mxu1 %v5990_v25 }
 0x5c5   : > { %v3553_v12 = vpack.c.bf16 %v2628_v37, %v2627_v6  ;;  %v1938_v22 = vpop.f32.mrb[10].mxu0 }
 0x5c6   : > { %v2633_v47 = vadd.f32 %v5416_v19, %v1938_v22  ;;  %v1940_v21 = vpop.f32.mrb[11].mxu0  ;;  %3428 = vmatmul.mubr.msk.f32.gmra.mrb[94].mxu1 %vm1751_vm5, %v5300_v33 }
 0x5c7   : > { %3224 = vst [vmem:[%s5433_s14 + $0x48] sm:$0xff] %v3553_v12  ;;  %v2634_v43 = vadd.f32 %v5421_v5, %v1940_v21  ;;  %2309 = vmatprep.mubr.f32.mxu1 %v5990_v25 }
 0x5c9   : > { %v3556_v44 = vpack.c.bf16 %v2634_v43, %v2633_v47  ;;  %v1944_v40 = vpop.f32.mrb[12].mxu0 }
 0x5ca   : > { %v2639_v24 = vadd.f32 %v5416_v19, %v1944_v40  ;;  %v1946_v30 = vpop.f32.mrb[13].mxu0  ;;  %3429 = vmatmul.mubr.msk.f32.gmra.mrb[96].mxu1 %vm1751_vm5, %v5305_v60 }
 0x5cb   : > { %3227 = vst [vmem:[%s5433_s14 + $0x60] sm:$0xff] %v3556_v44  ;;  %v2640_v8 = vadd.f32 %v5421_v5, %v1946_v30  ;;  %2313 = vmatprep.mubr.f32.mxu1 %v5990_v25 }
 0x5cd   : > { %v3559_v26 = vpack.c.bf16 %v2640_v8, %v2639_v24  ;;  %v1950_v48 = vpop.f32.mrb[14].mxu0 }
 0x5ce   : > { %v2645_v45 = vadd.f32 %v5416_v19, %v1950_v48  ;;  %v1952_v42 = vpop.f32.mrb[15].mxu0  ;;  %3430 = vmatmul.mubr.msk.f32.gmra.mrb[98].mxu1 %vm1751_vm5, %v5313_v58 }
 0x5cf   : > { %3230 = vst [vmem:[%s5433_s14 + $0x78] sm:$0xff] %v3559_v26  ;;  %v2646_v34 = vadd.f32 %v5421_v5, %v1952_v42  ;;  %2317 = vmatprep.mubr.f32.mxu1 %v5990_v25 }
 0x5d1   : > { %v3562_v52 = vpack.c.bf16 %v2646_v34, %v2645_v45  ;;  %v1956_v13 = vpop.f32.mrb[16].mxu0 }
 0x5d2   : > { %v2651_v62 = vadd.f32 %v5416_v19, %v1956_v13  ;;  %v1958_v46 = vpop.f32.mrb[17].mxu0  ;;  %3431 = vmatmul.mubr.msk.f32.gmra.mrb[100].mxu1 %vm1751_vm5, %v5318_v18 }
 0x5d3   : > { %3233 = vst [vmem:[%s5433_s14 + $0x90] sm:$0xff] %v3562_v52  ;;  %v2652_v49 = vadd.f32 %v5421_v5, %v1958_v46  ;;  %2321 = vmatprep.mubr.f32.mxu1 %v5990_v25 }
 0x5d5   : > { %v3565_v57 = vpack.c.bf16 %v2652_v49, %v2651_v62  ;;  %v1962_v28 = vpop.f32.mrb[18].mxu0 }
 0x5d6   : > { %v2657_v50 = vadd.f32 %v5416_v19, %v1962_v28  ;;  %v1964_v32 = vpop.f32.mrb[19].mxu0  ;;  %3432 = vmatmul.mubr.msk.f32.gmra.mrb[102].mxu1 %vm1751_vm5, %v5326_v63 }
 0x5d7   : > { %3236 = vst [vmem:[%s5433_s14 + $0xa8] sm:$0xff] %v3565_v57  ;;  %v2658_v23 = vadd.f32 %v5421_v5, %v1964_v32  ;;  %2325 = vmatprep.mubr.f32.mxu1 %v5990_v25 }
 0x5d9   : > { %v3568_v6 = vpack.c.bf16 %v2658_v23, %v2657_v50  ;;  %v1968_v61 = vpop.f32.mrb[20].mxu0 }
 0x5da   : > { %v2663_v37 = vadd.f32 %v5416_v19, %v1968_v61  ;;  %v1970_v12 = vpop.f32.mrb[21].mxu0  ;;  %3433 = vmatmul.mubr.msk.f32.gmra.mrb[104].mxu1 %vm1751_vm5, %v5331_v27 }
 0x5db   : > { %3239 = vst [vmem:[%s5433_s14 + $0xc0] sm:$0xff] %v3568_v6  ;;  %v2664_v22 = vadd.f32 %v5421_v5, %v1970_v12  ;;  %2329 = vmatprep.mubr.f32.mxu1 %v5990_v25 }
 0x5dd   : > { %v3571_v47 = vpack.c.bf16 %v2664_v22, %v2663_v37  ;;  %v1974_v21 = vpop.f32.mrb[0].mxu1 }
 0x5de   : > { %v2669_v43 = vadd.f32 %v5416_v19, %v1974_v21  ;;  %v1976_v44 = vpop.f32.mrb[1].mxu1  ;;  %3434 = vmatmul.mubr.msk.f32.gmra.mrb[106].mxu1 %vm1751_vm5, %v5338_v36 }
 0x5df   : > { %3242 = vst [vmem:[%s5433_s14 + $0xd8] sm:$0xff] %v3571_v47  ;;  %v2670_v40 = vadd.f32 %v5421_v5, %v1976_v44  ;;  %2398 = vmatprep.mubr.f32.mxu1 %v5990_v25 }
 0x5e1   : > { %v3574_v24 = vpack.c.bf16 %v2670_v40, %v2669_v43  ;;  %v1980_v30 = vpop.f32.mrb[2].mxu1 }
 0x5e2   : > { %v2675_v8 = vadd.f32 %v5416_v19, %v1980_v30  ;;  %v1982_v26 = vpop.f32.mrb[3].mxu1  ;;  %3435 = vmatmul.mubr.msk.f32.vlgmr.msra.gmra.mrb[108].mxu1 %vm1751_vm5, %v5179_v0 }
 0x5e3   : > { %3245 = vst [vmem:[%s5433_s14 + $0xf0] sm:$0xff] %v3574_v24  ;;  %v2676_v48 = vadd.f32 %v5421_v5, %v1982_v26  ;;  %2404 = vmatprep.mubr.f32.mxu1 %v5990_v25 }
 0x5e5   : > { %v3577_v45 = vpack.c.bf16 %v2676_v48, %v2675_v8  ;;  %v1986_v42 = vpop.f32.mrb[4].mxu1 }
 0x5e6   : > { %v2681_v34 = vadd.f32 %v5416_v19, %v1986_v42  ;;  %v1988_v52 = vpop.f32.mrb[5].mxu1  ;;  %3436 = vmatmul.mubr.msk.f32.gmra.mrb[110].mxu1 %vm1751_vm5, %v5184_v15 }
 0x5e7   : > { %3248 = vst [vmem:[%s5433_s14 + $0x108] sm:$0xff] %v3577_v45  ;;  %v2682_v13 = vadd.f32 %v5421_v5, %v1988_v52  ;;  %2410 = vmatprep.mubr.f32.mxu1 %v5990_v25 }
 0x5e9   : > { %v3580_v0 = vpack.c.bf16 %v2682_v13, %v2681_v34  ;;  %v1992_v62 = vpop.f32.mrb[6].mxu1 }
 0x5ea   : > { %v2687_v46 = vadd.f32 %v5416_v19, %v1992_v62  ;;  %v1994_v49 = vpop.f32.mrb[7].mxu1  ;;  %3437 = vmatmul.mubr.msk.f32.gmra.mrb[112].mxu1 %vm1751_vm5, %v5189_v41 }
 0x5eb   : > { %3251 = vst [vmem:[%s5433_s14 + $0x120] sm:$0xff] %v3580_v0  ;;  %v2688_v57 = vadd.f32 %v5421_v5, %v1994_v49  ;;  %2416 = vmatprep.mubr.f32.mxu1 %v5990_v25 }
 0x5ed   : > { %v3583_v15 = vpack.c.bf16 %v2688_v57, %v2687_v46  ;;  %v1998_v28 = vpop.f32.mrb[8].mxu1 }
 0x5ee   : > { %v2693_v50 = vadd.f32 %v5416_v19, %v1998_v28  ;;  %v2000_v32 = vpop.f32.mrb[9].mxu1  ;;  %3438 = vmatmul.mubr.msk.f32.gmra.mrb[114].mxu1 %vm1751_vm5, %v5194_v11 }
 0x5ef   : > { %3254 = vst [vmem:[%s5433_s14 + $0x138] sm:$0xff] %v3583_v15  ;;  %v2694_v23 = vadd.f32 %v5421_v5, %v2000_v32  ;;  %2422 = vmatprep.mubr.f32.mxu1 %v5990_v25 }
 0x5f1   : > { %v3586_v41 = vpack.c.bf16 %v2694_v23, %v2693_v50  ;;  %v2004_v6 = vpop.f32.mrb[10].mxu1 }
 0x5f2   : > { %v2699_v61 = vadd.f32 %v5416_v19, %v2004_v6  ;;  %v2006_v37 = vpop.f32.mrb[11].mxu1  ;;  %3439 = vmatmul.mubr.msk.f32.gmra.mrb[116].mxu1 %vm1751_vm5, %v5199_v16 }
 0x5f3   : > { %3257 = vst [vmem:[%s5433_s14 + $0x150] sm:$0xff] %v3586_v41  ;;  %v2700_v12 = vadd.f32 %v5421_v5, %v2006_v37  ;;  %2428 = vmatprep.mubr.f32.mxu1 %v5990_v25 }
 0x5f5   : > { %v3589_v11 = vpack.c.bf16 %v2700_v12, %v2699_v61  ;;  %v2010_v22 = vpop.f32.mrb[12].mxu1 }
 0x5f6   : > { %v2705_v47 = vadd.f32 %v5416_v19, %v2010_v22  ;;  %v2012_v21 = vpop.f32.mrb[13].mxu1  ;;  %3440 = vmatmul.mubr.msk.f32.gmra.mrb[118].mxu1 %vm1751_vm5, %v5204_v3 }
 0x5f7   : > { %3260 = vst [vmem:[%s5433_s14 + $0x168] sm:$0xff] %v3589_v11  ;;  %v2706_v43 = vadd.f32 %v5421_v5, %v2012_v21  ;;  %2434 = vmatprep.mubr.f32.mxu1 %v5990_v25 }
 0x5f9   : > { %v3592_v16 = vpack.c.bf16 %v2706_v43, %v2705_v47  ;;  %v2016_v44 = vpop.f32.mrb[14].mxu1 }
 0x5fa   : > { %v2711_v40 = vadd.f32 %v5416_v19, %v2016_v44  ;;  %v2018_v24 = vpop.f32.mrb[15].mxu1  ;;  %3441 = vmatmul.mubr.msk.f32.gmra.mrb[120].mxu1 %vm1751_vm5, %v5209_v59 }
 0x5fb   : > { %3263 = vst [vmem:[%s5433_s14 + $0x180] sm:$0xff] %v3592_v16  ;;  %v2712_v30 = vadd.f32 %v5421_v5, %v2018_v24  ;;  %2440 = vmatprep.mubr.f32.mxu1 %v5990_v25  ;;  %v3294_v16 = vld [vmem:[%s5433_s14 + $0x240] sm:$0x77] }
 0x5fd   : > { %v3595_v3 = vpack.c.bf16 %v2712_v30, %v2711_v40  ;;  %v2022_v8 = vpop.f32.mrb[16].mxu1 }
 0x5fe   : > { %v2717_v26 = vadd.f32 %v5416_v19, %v2022_v8  ;;  %v2024_v48 = vpop.f32.mrb[17].mxu1  ;;  %3442 = vmatmul.mubr.msk.f32.gmra.mrb[122].mxu1 %vm1751_vm5, %v5214_v9 }
 0x5ff   : > { %3266 = vst [vmem:[%s5433_s14 + $0x198] sm:$0xff] %v3595_v3  ;;  %v2718_v45 = vadd.f32 %v5421_v5, %v2024_v48  ;;  %2446 = vmatprep.mubr.f32.mxu1 %v5990_v25 }
 0x601   : > { %v3598_v59 = vpack.c.bf16 %v2718_v45, %v2717_v26  ;;  %v2028_v42 = vpop.f32.mrb[18].mxu1 }
 0x602   : > { %v2723_v34 = vadd.f32 %v5416_v19, %v2028_v42  ;;  %v2030_v52 = vpop.f32.mrb[19].mxu1  ;;  %3443 = vmatmul.mubr.msk.f32.gmra.mrb[124].mxu1 %vm1751_vm5, %v5219_v4 }
 0x603   : > { %3269 = vst [vmem:[%s5433_s14 + $0x1b0] sm:$0xff] %v3598_v59  ;;  %v2724_v13 = vadd.f32 %v5421_v5, %v2030_v52  ;;  %2452 = vmatprep.mubr.f32.mxu1 %v5990_v25 }
 0x605   : > { %v3601_v9 = vpack.c.bf16 %v2724_v13, %v2723_v34  ;;  %v2034_v0 = vpop.f32.mrb[20].mxu1 }
 0x606   : > { %v2729_v62 = vadd.f32 %v5416_v19, %v2034_v0  ;;  %v2036_v46 = vpop.f32.mrb[21].mxu1  ;;  %3444 = vmatmul.mubr.msk.f32.gmra.mrb[126].mxu1 %vm1751_vm5, %v5226_v39 }
 0x607   : > { %3272 = vst [vmem:[%s5433_s14 + $0x1c8] sm:$0xff] %v3601_v9  ;;  %v2730_v49 = vadd.f32 %v5421_v5, %v2036_v46  ;;  %2458 = vmatprep.mubr.f32.mxu1 %v5990_v25 }
 0x609   : > { %v3604_v4 = vpack.c.bf16 %v2730_v49, %v2729_v62  ;;  %v2040_v57 = vpop.f32.mrb[22].mxu1 }
 0x60a   : > { %v2735_v15 = vadd.f32 %v5416_v19, %v2040_v57  ;;  %v2042_v28 = vpop.f32.mrb[23].mxu1  ;;  %3445 = vmatmul.mubr.msk.f32.gmra.mrb[128].mxu1 %vm1751_vm5, %v5235_v20 }
 0x60b   : > { %3275 = vst [vmem:[%s5433_s14 + $0x1e0] sm:$0xff] %v3604_v4  ;;  %v2736_v50 = vadd.f32 %v5421_v5, %v2042_v28  ;;  %2464 = vmatprep.mubr.f32.mxu1 %v5990_v25 }
 0x60d   : > { %v3607_v39 = vpack.c.bf16 %v2736_v50, %v2735_v15  ;;  %v2046_v32 = vpop.f32.mrb[24].mxu1 }
 0x60e   : > { %v2741_v23 = vadd.f32 %v5416_v19, %v2046_v32  ;;  %v2048_v41 = vpop.f32.mrb[25].mxu1  ;;  %3446 = vmatmul.mubr.msk.f32.gmra.mrb[130].mxu1 %vm1751_vm5, %v5243_v35 }
 0x60f   : > { %3278 = vst [vmem:[%s5433_s14 + $0x1f8] sm:$0xff] %v3607_v39  ;;  %v2742_v6 = vadd.f32 %v5421_v5, %v2048_v41  ;;  %2470 = vmatprep.mubr.f32.mxu1 %v5990_v25 }
 0x611   : > { %v3610_v20 = vpack.c.bf16 %v2742_v6, %v2741_v23  ;;  %v2052_v61 = vpop.f32.mrb[26].mxu1 }
 0x612   : > { %v2747_v37 = vadd.f32 %v5416_v19, %v2052_v61  ;;  %v2054_v12 = vpop.f32.mrb[27].mxu1  ;;  %3447 = vmatmul.mubr.msk.f32.gmra.mrb[132].mxu1 %vm1751_vm5, %v5250_v53 }
 0x613   : > { %3281 = vst [vmem:[%s5433_s14 + $0x210] sm:$0xff] %v3610_v20  ;;  %v2748_v35 = vadd.f32 %v5421_v5, %v2054_v12  ;;  %2476 = vmatprep.mubr.f32.mxu1 %v5990_v25 }
 0x615   : > { %v3613_v11 = vpack.c.bf16 %v2748_v35, %v2747_v37  ;;  %v2058_v22 = vpop.f32.mrb[28].mxu1 }
 0x616   : > { %v2753_v47 = vadd.f32 %v5416_v19, %v2058_v22  ;;  %v2060_v21 = vpop.f32.mrb[29].mxu1  ;;  %3448 = vmatmul.mubr.msk.f32.gmra.mrb[134].mxu1 %vm1751_vm5, %v5257_v56 }
 0x617   : > { %3284 = vst [vmem:[%s5433_s14 + $0x228] sm:$0xff] %v3613_v11  ;;  %v2754_v53 = vadd.f32 %v5421_v5, %v2060_v21  ;;  %2482 = vmatprep.mubr.f32.mxu1 %v5990_v25 }
 0x619   : > { %v3616_v44 = vpack.c.bf16 %v2754_v53, %v2753_v47  ;;  %v2064_v40 = vpop.f32.mrb[30].mxu1 }
 0x61a   : > { %v2065_v24 = vpop.f32.mrb[31].mxu1  ;;  %3449 = vmatmul.mubr.msk.f32.gmra.mrb[136].mxu1 %vm1751_vm5, %v5262_v55 }
 0x61b   : > { %v3295_v19 = vsel %vm5579_vm12, %v3616_v44, %v3294_v16  ;;  %2488 = vmatprep.mubr.f32.mxu1 %v5990_v25 }
 0x61c   : > { %3296 = vst [vmem:[%s5433_s14 + $0x240] sm:$0x77] %v3295_v19 }
 0x61d   : > { %v2068_v56 = vpop.f32.mrb[32].mxu1 }
 0x61e   : > { %v2069_v5 = vpop.f32.mrb[33].mxu1  ;;  %3450 = vmatmul.mubr.msk.f32.gmra.mrb[138].mxu1 %vm1751_vm5, %v5269_v14 }
 0x61f   : > { %2494 = vmatprep.mubr.f32.mxu1 %v5990_v25 }
 0x621   : > { %v2072_v30 = vpop.f32.mrb[34].mxu1 }
 0x622   : > { %v2073_v3 = vpop.f32.mrb[35].mxu1  ;;  %3451 = vmatmul.mubr.msk.f32.gmra.mrb[140].mxu1 %vm1751_vm5, %v5221_v29  ;;  %v5996_v29 = vld [vmem:[#allocation3_spill] sm:$0xff] }
 0x623   : > { %2500 = vmatprep.mubr.f32.mxu1 %v5990_v25  ;;  %v2589_v59 = vsub.s32 2, %v5996_v29 }
 0x625   : > { %v2076_v55 = vpop.f32.mrb[36].mxu1 }
 0x626   : > { %v2077_v8 = vpop.f32.mrb[37].mxu1  ;;  %3452 = vmatmul.mubr.msk.f32.gmra.mrb[142].mxu1 %vm1751_vm5, %v5230_v2  ;;  %v2593_v2 = vsub.s32 3, %v5996_v29 }
 0x627   : > { %2506 = vmatprep.mubr.f32.mxu1 %v5990_v25 }
 0x628   : > { %v5614_v52 = vrot.slane %v5410_v51, %v2593_v2 }
 0x629   : > { %v2080_v26 = vpop.f32.mrb[38].mxu1 }
 0x62a   : > { %v2081_v48 = vpop.f32.mrb[39].mxu1  ;;  %3453 = vmatmul.mubr.msk.f32.gmra.mrb[144].mxu1 %vm1751_vm5, %v5245_v54  ;;  %v5610_v54 = vrot.slane %v5410_v51, %v2589_v59 }
 0x62b   : > { %2512 = vmatprep.mubr.f32.mxu1 %v5990_v25 }
 0x62d   : > { %v2084_v14 = vpop.f32.mrb[40].mxu1 }
 0x62e   : > { %v2085_v45 = vpop.f32.mrb[41].mxu1  ;;  %3454 = vmatmul.mubr.msk.f32.gmra.mrb[146].mxu1 %vm1751_vm5, %v5255_v10 }
 0x62f   : > { %2518 = vmatprep.mubr.f32.mxu1 %v5990_v25 }
 0x631   : > { %v2088_v42 = vpop.f32.mrb[42].mxu1 }
 0x632   : > { %v2089_v34 = vpop.f32.mrb[43].mxu1  ;;  %3455 = vmatmul.mubr.msk.f32.gmra.mrb[148].mxu1 %vm1751_vm5, %v5264_v17 }
 0x633   : > { %2524 = vmatprep.mubr.f32.mxu1 %v5990_v25 }
 0x635   : > { %v2157_v10 = vpop.f32.mrb[44].mxu1 }
 0x636   : > { %v2611_v13 = vadd.f32 %v5610_v54, %v2157_v10  ;;  %v2159_v9 = vpop.f32.mrb[45].mxu1  ;;  %3456 = vmatmul.mubr.msk.f32.gmra.mrb[150].mxu1 %vm1751_vm5, %v5274_v31 }
 0x637   : > { %v2612_v0 = vadd.f32 %v5614_v52, %v2159_v9  ;;  %2530 = vmatprep.mubr.f32.mxu1 %v5990_v25 }
 0x639   : > { %v3545_v17 = vpack.c.bf16 %v2612_v0, %v2611_v13  ;;  %v2163_v62 = vpop.f32.mrb[46].mxu1 }
 0x63a   : > { %v2617_v46 = vadd.f32 %v5610_v54, %v2163_v62  ;;  %v2165_v49 = vpop.f32.mrb[47].mxu1  ;;  %3457 = vmatmul.mubr.msk.f32.gmra.mrb[152].mxu1 %vm1751_vm5, %v5279_v38 }
 0x63b   : > { %3216 = vst [vmem:[%s5433_s14 + $0x8] sm:$0xff] %v3545_v17  ;;  %v2618_v4 = vadd.f32 %v5614_v52, %v2165_v49  ;;  %2536 = vmatprep.mubr.f32.mxu1 %v5990_v25 }
 0x63d   : > { %v3548_v31 = vpack.c.bf16 %v2618_v4, %v2617_v46  ;;  %v2169_v57 = vpop.f32.mrb[48].mxu1 }
 0x63e   : > { %v2623_v15 = vadd.f32 %v5610_v54, %v2169_v57  ;;  %v2171_v28 = vpop.f32.mrb[49].mxu1  ;;  %3458 = vmatmul.mubr.msk.f32.gmra.mrb[154].mxu1 %vm1751_vm5, %v5287_v1 }
 0x63f   : > { %3219 = vst [vmem:[%s5433_s14 + $0x20] sm:$0xff] %v3548_v31  ;;  %v2624_v50 = vadd.f32 %v5614_v52, %v2171_v28  ;;  %2542 = vmatprep.mubr.f32.mxu1 %v5990_v25 }
 0x641   : > { %v3551_v38 = vpack.c.bf16 %v2624_v50, %v2623_v15  ;;  %v2175_v39 = vpop.f32.mrb[50].mxu1 }
 0x642   : > { %v2629_v32 = vadd.f32 %v5610_v54, %v2175_v39  ;;  %v2177_v23 = vpop.f32.mrb[51].mxu1  ;;  %3459 = vmatmul.mubr.msk.f32.gmra.mrb[156].mxu1 %vm1751_vm5, %v5292_v7 }
 0x643   : > { %3222 = vst [vmem:[%s5433_s14 + $0x38] sm:$0xff] %v3551_v38  ;;  %v2630_v41 = vadd.f32 %v5614_v52, %v2177_v23  ;;  %2548 = vmatprep.mubr.f32.mxu1 %v5990_v25 }
 0x645   : > { %v3554_v1 = vpack.c.bf16 %v2630_v41, %v2629_v32  ;;  %v2181_v6 = vpop.f32.mrb[52].mxu1 }
 0x646   : > { %v2635_v20 = vadd.f32 %v5610_v54, %v2181_v6  ;;  %v2183_v61 = vpop.f32.mrb[53].mxu1  ;;  %3460 = vmatmul.mubr.msk.f32.gmra.mrb[158].mxu1 %vm1751_vm5, %v5300_v33 }
 0x647   : > { %3225 = vst [vmem:[%s5433_s14 + $0x50] sm:$0xff] %v3554_v1  ;;  %v2636_v37 = vadd.f32 %v5614_v52, %v2183_v61  ;;  %2552 = vmatprep.mubr.f32.mxu1 %v5990_v25 }
 0x649   : > { %v3557_v7 = vpack.c.bf16 %v2636_v37, %v2635_v20  ;;  %v2187_v12 = vpop.f32.mrb[54].mxu1 }
 0x64a   : > { %v2641_v35 = vadd.f32 %v5610_v54, %v2187_v12  ;;  %v2189_v11 = vpop.f32.mrb[55].mxu1  ;;  %3461 = vmatmul.mubr.msk.f32.gmra.mrb[160].mxu1 %vm1751_vm5, %v5305_v60 }
 0x64b   : > { %3228 = vst [vmem:[%s5433_s14 + $0x68] sm:$0xff] %v3557_v7  ;;  %v2642_v22 = vadd.f32 %v5614_v52, %v2189_v11  ;;  %2556 = vmatprep.mubr.f32.mxu1 %v5990_v25 }
 0x64d   : > { %v3560_v33 = vpack.c.bf16 %v2642_v22, %v2641_v35  ;;  %v2193_v47 = vpop.f32.mrb[56].mxu1 }
 0x64e   : > { %v2647_v21 = vadd.f32 %v5610_v54, %v2193_v47  ;;  %v2195_v53 = vpop.f32.mrb[57].mxu1  ;;  %3462 = vmatmul.mubr.msk.f32.gmra.mrb[162].mxu1 %vm1751_vm5, %v5313_v58 }
 0x64f   : > { %3231 = vst [vmem:[%s5433_s14 + $0x80] sm:$0xff] %v3560_v33  ;;  %v2648_v16 = vadd.f32 %v5614_v52, %v2195_v53  ;;  %2560 = vmatprep.mubr.f32.mxu1 %v5990_v25 }
 0x651   : > { %v3563_v60 = vpack.c.bf16 %v2648_v16, %v2647_v21  ;;  %v2199_v44 = vpop.f32.mrb[58].mxu1 }
 0x652   : > { %v2653_v40 = vadd.f32 %v5610_v54, %v2199_v44  ;;  %v2201_v24 = vpop.f32.mrb[59].mxu1  ;;  %3463 = vmatmul.mubr.msk.f32.gmra.mrb[164].mxu1 %vm1751_vm5, %v5318_v18 }
 0x653   : > { %3234 = vst [vmem:[%s5433_s14 + $0x98] sm:$0xff] %v3563_v60  ;;  %v2654_v19 = vadd.f32 %v5614_v52, %v2201_v24  ;;  %2564 = vmatprep.mubr.f32.mxu1 %v5990_v25 }
 0x655   : > { %v3566_v58 = vpack.c.bf16 %v2654_v19, %v2653_v40  ;;  %v2205_v56 = vpop.f32.mrb[60].mxu1 }
 0x656   : > { %v2659_v5 = vadd.f32 %v5610_v54, %v2205_v56  ;;  %v2207_v30 = vpop.f32.mrb[61].mxu1  ;;  %3464 = vmatmul.mubr.msk.f32.gmra.mrb[166].mxu1 %vm1751_vm5, %v5326_v63 }
 0x657   : > { %3237 = vst [vmem:[%s5433_s14 + $0xb0] sm:$0xff] %v3566_v58  ;;  %v2660_v3 = vadd.f32 %v5614_v52, %v2207_v30  ;;  %2568 = vmatprep.mubr.f32.mxu1 %v5990_v25 }
 0x659   : > { %v3569_v18 = vpack.c.bf16 %v2660_v3, %v2659_v5  ;;  %v2211_v55 = vpop.f32.mrb[62].mxu1 }
 0x65a   : > { %v2665_v8 = vadd.f32 %v5610_v54, %v2211_v55  ;;  %v2213_v26 = vpop.f32.mrb[63].mxu1  ;;  %3465 = vmatmul.mubr.msk.f32.gmra.mrb[168].mxu1 %vm1751_vm5, %v5331_v27 }
 0x65b   : > { %3240 = vst [vmem:[%s5433_s14 + $0xc8] sm:$0xff] %v3569_v18  ;;  %v2666_v48 = vadd.f32 %v5614_v52, %v2213_v26  ;;  %2572 = vmatprep.mubr.f32.mxu1 %v5990_v25 }
 0x65d   : > { %v3572_v63 = vpack.c.bf16 %v2666_v48, %v2665_v8  ;;  %v2217_v14 = vpop.f32.mrb[64].mxu1 }
 0x65e   : > { %v2671_v45 = vadd.f32 %v5610_v54, %v2217_v14  ;;  %v2219_v59 = vpop.f32.mrb[65].mxu1  ;;  %3466 = vmatmul.mubr.msk.f32.gmra.mrb[170].mxu1 %vm1751_vm5, %v5338_v36 }
 0x65f   : > { %3243 = vst [vmem:[%s5433_s14 + $0xe0] sm:$0xff] %v3572_v63  ;;  %v2672_v2 = vadd.f32 %v5614_v52, %v2219_v59 }
 0x661   : > { %v3575_v42 = vpack.c.bf16 %v2672_v2, %v2671_v45  ;;  %v2223_v27 = vpop.f32.mrb[66].mxu1 }
 0x662   : > { %v2677_v34 = vadd.f32 %v5610_v54, %v2223_v27  ;;  %v2225_v10 = vpop.f32.mrb[67].mxu1 }
 0x663   : > { %3246 = vst [vmem:[%s5433_s14 + $0xf8] sm:$0xff] %v3575_v42  ;;  %v2678_v25 = vadd.f32 %v5614_v52, %v2225_v10 }
 0x665   : > { %v3578_v13 = vpack.c.bf16 %v2678_v25, %v2677_v34  ;;  %v2229_v9 = vpop.f32.mrb[68].mxu1 }
 0x666   : > { %v2683_v0 = vadd.f32 %v5610_v54, %v2229_v9  ;;  %v2231_v17 = vpop.f32.mrb[69].mxu1 }
 0x667   : > { %3249 = vst [vmem:[%s5433_s14 + $0x110] sm:$0xff] %v3578_v13  ;;  %v2684_v36 = vadd.f32 %v5614_v52, %v2231_v17 }
 0x669   : > { %v3581_v62 = vpack.c.bf16 %v2684_v36, %v2683_v0  ;;  %v2235_v46 = vpop.f32.mrb[70].mxu1 }
 0x66a   : > { %v2689_v49 = vadd.f32 %v5610_v54, %v2235_v46  ;;  %v2237_v4 = vpop.f32.mrb[71].mxu1  ;;  %v3297_v46 = vld [vmem:[%s5433_s14 + $0x248] sm:$0x77] }
 0x66b   : > { %3252 = vst [vmem:[%s5433_s14 + $0x128] sm:$0xff] %v3581_v62  ;;  %v2690_v31 = vadd.f32 %v5614_v52, %v2237_v4 }
 0x66d   : > { %v3584_v57 = vpack.c.bf16 %v2690_v31, %v2689_v49  ;;  %v2241_v15 = vpop.f32.mrb[72].mxu1 }
 0x66e   : > { %v2695_v28 = vadd.f32 %v5610_v54, %v2241_v15  ;;  %v2243_v50 = vpop.f32.mrb[73].mxu1 }
 0x66f   : > { %3255 = vst [vmem:[%s5433_s14 + $0x140] sm:$0xff] %v3584_v57  ;;  %v2696_v38 = vadd.f32 %v5614_v52, %v2243_v50 }
 0x671   : > { %v3587_v39 = vpack.c.bf16 %v2696_v38, %v2695_v28  ;;  %v2247_v32 = vpop.f32.mrb[74].mxu1 }
 0x672   : > { %v2701_v23 = vadd.f32 %v5610_v54, %v2247_v32  ;;  %v2249_v41 = vpop.f32.mrb[75].mxu1 }
 0x673   : > { %3258 = vst [vmem:[%s5433_s14 + $0x158] sm:$0xff] %v3587_v39  ;;  %v2702_v1 = vadd.f32 %v5614_v52, %v2249_v41 }
 0x675   : > { %v3590_v6 = vpack.c.bf16 %v2702_v1, %v2701_v23  ;;  %v2253_v20 = vpop.f32.mrb[76].mxu1 }
 0x676   : > { %v2707_v61 = vadd.f32 %v5610_v54, %v2253_v20  ;;  %v2255_v37 = vpop.f32.mrb[77].mxu1 }
 0x677   : > { %3261 = vst [vmem:[%s5433_s14 + $0x170] sm:$0xff] %v3590_v6  ;;  %v2708_v7 = vadd.f32 %v5614_v52, %v2255_v37  ;;  %v2601_v6 = vsub.s32 5, %v5996_v29 }
 0x679   : > { %v3593_v12 = vpack.c.bf16 %v2708_v7, %v2707_v61  ;;  %v2259_v35 = vpop.f32.mrb[78].mxu1  ;;  %v5732_v7 = vrot.slane %v5410_v51, %v2601_v6 }
 0x67a   : > { %v2713_v11 = vadd.f32 %v5610_v54, %v2259_v35  ;;  %v2261_v22 = vpop.f32.mrb[79].mxu1 }
 0x67b   : > { %3264 = vst [vmem:[%s5433_s14 + $0x188] sm:$0xff] %v3593_v12  ;;  %v2714_v33 = vadd.f32 %v5614_v52, %v2261_v22 }
 0x67d   : > { %v3596_v47 = vpack.c.bf16 %v2714_v33, %v2713_v11  ;;  %v2265_v21 = vpop.f32.mrb[80].mxu1 }
 0x67e   : > { %v2719_v53 = vadd.f32 %v5610_v54, %v2265_v21  ;;  %v2267_v16 = vpop.f32.mrb[81].mxu1 }
 0x67f   : > { %3267 = vst [vmem:[%s5433_s14 + $0x1a0] sm:$0xff] %v3596_v47  ;;  %v2720_v60 = vadd.f32 %v5614_v52, %v2267_v16 }
 0x681   : > { %v3599_v44 = vpack.c.bf16 %v2720_v60, %v2719_v53  ;;  %v2271_v40 = vpop.f32.mrb[82].mxu1 }
 0x682   : > { %v2725_v24 = vadd.f32 %v5610_v54, %v2271_v40  ;;  %v2273_v19 = vpop.f32.mrb[83].mxu1 }
 0x683   : > { %3270 = vst [vmem:[%s5433_s14 + $0x1b8] sm:$0xff] %v3599_v44  ;;  %v2726_v58 = vadd.f32 %v5614_v52, %v2273_v19 }
 0x685   : > { %v3602_v56 = vpack.c.bf16 %v2726_v58, %v2725_v24  ;;  %v2277_v5 = vpop.f32.mrb[84].mxu1 }
 0x686   : > { %v2731_v30 = vadd.f32 %v5610_v54, %v2277_v5  ;;  %v2279_v3 = vpop.f32.mrb[85].mxu1 }
 0x687   : > { %3273 = vst [vmem:[%s5433_s14 + $0x1d0] sm:$0xff] %v3602_v56  ;;  %v2732_v18 = vadd.f32 %v5614_v52, %v2279_v3 }
 0x689   : > { %v3605_v55 = vpack.c.bf16 %v2732_v18, %v2731_v30  ;;  %v2283_v8 = vpop.f32.mrb[86].mxu1 }
 0x68a   : > { %v2737_v26 = vadd.f32 %v5610_v54, %v2283_v8  ;;  %v2285_v48 = vpop.f32.mrb[87].mxu1 }
 0x68b   : > { %3276 = vst [vmem:[%s5433_s14 + $0x1e8] sm:$0xff] %v3605_v55  ;;  %v2738_v63 = vadd.f32 %v5614_v52, %v2285_v48 }
 0x68d   : > { %v3608_v14 = vpack.c.bf16 %v2738_v63, %v2737_v26  ;;  %v2289_v45 = vpop.f32.mrb[88].mxu1 }
 0x68e   : > { %v2743_v59 = vadd.f32 %v5610_v54, %v2289_v45  ;;  %v2291_v2 = vpop.f32.mrb[89].mxu1 }
 0x68f   : > { %3279 = vst [vmem:[%s5433_s14 + $0x200] sm:$0xff] %v3608_v14  ;;  %v2744_v42 = vadd.f32 %v5614_v52, %v2291_v2 }
 0x691   : > { %v3611_v27 = vpack.c.bf16 %v2744_v42, %v2743_v59  ;;  %v2295_v34 = vpop.f32.mrb[90].mxu1 }
 0x692   : > { %v2749_v10 = vadd.f32 %v5610_v54, %v2295_v34  ;;  %v2297_v25 = vpop.f32.mrb[91].mxu1 }
 0x693   : > { %3282 = vst [vmem:[%s5433_s14 + $0x218] sm:$0xff] %v3611_v27  ;;  %v2750_v13 = vadd.f32 %v5614_v52, %v2297_v25 }
 0x695   : > { %v3614_v9 = vpack.c.bf16 %v2750_v13, %v2749_v10  ;;  %v2301_v0 = vpop.f32.mrb[92].mxu1 }
 0x696   : > { %v2755_v17 = vadd.f32 %v5610_v54, %v2301_v0  ;;  %v2303_v36 = vpop.f32.mrb[93].mxu1 }
 0x697   : > { %3285 = vst [vmem:[%s5433_s14 + $0x230] sm:$0xff] %v3614_v9  ;;  %v2756_v62 = vadd.f32 %v5614_v52, %v2303_v36  ;;  %v2597_v52 = vsub.s32 4, %v5996_v29 }
 0x699   : > { %v3617_v49 = vpack.c.bf16 %v2756_v62, %v2755_v17  ;;  %v2307_v4 = vpop.f32.mrb[94].mxu1  ;;  %v5729_v37 = vrot.slane %v5410_v51, %v2597_v52 }
 0x69a   : > { %v2308_v31 = vpop.f32.mrb[95].mxu1 }
 0x69b   : > { %v3298_v57 = vsel %vm5579_vm12, %v3617_v49, %v3297_v46 }
 0x69c   : > { %3299 = vst [vmem:[%s5433_s14 + $0x248] sm:$0x77] %v3298_v57 }
 0x69d   : > { %v2311_v15 = vpop.f32.mrb[96].mxu1 }
 0x69e   : > { %v2312_v28 = vpop.f32.mrb[97].mxu1 }
 0x6a1   : > { %v2315_v50 = vpop.f32.mrb[98].mxu1 }
 0x6a2   : > { %v2316_v38 = vpop.f32.mrb[99].mxu1 }
 0x6a5   : > { %v2319_v39 = vpop.f32.mrb[100].mxu1 }
 0x6a6   : > { %v2320_v32 = vpop.f32.mrb[101].mxu1 }
 0x6a9   : > { %v2323_v23 = vpop.f32.mrb[102].mxu1 }
 0x6aa   : > { %v2324_v54 = vpop.f32.mrb[103].mxu1 }
 0x6ad   : > { %v2327_v41 = vpop.f32.mrb[104].mxu1 }
 0x6ae   : > { %v2328_v1 = vpop.f32.mrb[105].mxu1 }
 0x6b1   : > { %v2331_v20 = vpop.f32.mrb[106].mxu1 }
 0x6b2   : > { %v2332_v61 = vpop.f32.mrb[107].mxu1 }
 0x6b5   : > { %v2400_v12 = vpop.f32.mrb[108].mxu1 }
 0x6b6   : > { %v2613_v35 = vadd.f32 %v5729_v37, %v2400_v12  ;;  %v2402_v11 = vpop.f32.mrb[109].mxu1 }
 0x6b7   : > { %v2614_v22 = vadd.f32 %v5732_v7, %v2402_v11 }
 0x6b9   : > { %v3546_v33 = vpack.c.bf16 %v2614_v22, %v2613_v35  ;;  %v2406_v47 = vpop.f32.mrb[110].mxu1 }
 0x6ba   : > { %v2619_v29 = vadd.f32 %v5729_v37, %v2406_v47  ;;  %v2408_v21 = vpop.f32.mrb[111].mxu1 }
 0x6bb   : > { %3217 = vst [vmem:[%s5433_s14 + $0x10] sm:$0xff] %v3546_v33  ;;  %v2620_v53 = vadd.f32 %v5732_v7, %v2408_v21 }
 0x6bd   : > { %v3549_v16 = vpack.c.bf16 %v2620_v53, %v2619_v29  ;;  %v2412_v60 = vpop.f32.mrb[112].mxu1 }
 0x6be   : > { %v2625_v51 = vadd.f32 %v5729_v37, %v2412_v60  ;;  %v2414_v44 = vpop.f32.mrb[113].mxu1 }
 0x6bf   : > { %3220 = vst [vmem:[%s5433_s14 + $0x28] sm:$0xff] %v3549_v16  ;;  %v2626_v40 = vadd.f32 %v5732_v7, %v2414_v44 }
 0x6c1   : > { %v3552_v24 = vpack.c.bf16 %v2626_v40, %v2625_v51  ;;  %v2418_v19 = vpop.f32.mrb[114].mxu1 }
 0x6c2   : > { %v2631_v58 = vadd.f32 %v5729_v37, %v2418_v19  ;;  %v2420_v56 = vpop.f32.mrb[115].mxu1 }
 0x6c3   : > { %3223 = vst [vmem:[%s5433_s14 + $0x40] sm:$0xff] %v3552_v24  ;;  %v2632_v5 = vadd.f32 %v5732_v7, %v2420_v56 }
 0x6c5   : > { %v3555_v30 = vpack.c.bf16 %v2632_v5, %v2631_v58  ;;  %v2424_v3 = vpop.f32.mrb[116].mxu1 }
 0x6c6   : > { %v2637_v18 = vadd.f32 %v5729_v37, %v2424_v3  ;;  %v2426_v55 = vpop.f32.mrb[117].mxu1 }
 0x6c7   : > { %3226 = vst [vmem:[%s5433_s14 + $0x58] sm:$0xff] %v3555_v30  ;;  %v2638_v8 = vadd.f32 %v5732_v7, %v2426_v55 }
 0x6c9   : > { %v3558_v26 = vpack.c.bf16 %v2638_v8, %v2637_v18  ;;  %v2430_v48 = vpop.f32.mrb[118].mxu1 }
 0x6ca   : > { %v2643_v63 = vadd.f32 %v5729_v37, %v2430_v48  ;;  %v2432_v14 = vpop.f32.mrb[119].mxu1 }
 0x6cb   : > { %3229 = vst [vmem:[%s5433_s14 + $0x70] sm:$0xff] %v3558_v26  ;;  %v2644_v45 = vadd.f32 %v5732_v7, %v2432_v14 }
 0x6cd   : > { %v3561_v59 = vpack.c.bf16 %v2644_v45, %v2643_v63  ;;  %v2436_v2 = vpop.f32.mrb[120].mxu1 }
 0x6ce   : > { %v2649_v42 = vadd.f32 %v5729_v37, %v2436_v2  ;;  %v2438_v27 = vpop.f32.mrb[121].mxu1 }
 0x6cf   : > { %3232 = vst [vmem:[%s5433_s14 + $0x88] sm:$0xff] %v3561_v59  ;;  %v2650_v34 = vadd.f32 %v5732_v7, %v2438_v27 }
 0x6d1   : > { %v3564_v10 = vpack.c.bf16 %v2650_v34, %v2649_v42  ;;  %v2442_v25 = vpop.f32.mrb[122].mxu1 }
 0x6d2   : > { %v2655_v13 = vadd.f32 %v5729_v37, %v2442_v25  ;;  %v2444_v9 = vpop.f32.mrb[123].mxu1 }
 0x6d3   : > { %3235 = vst [vmem:[%s5433_s14 + $0xa0] sm:$0xff] %v3564_v10  ;;  %v2656_v0 = vadd.f32 %v5732_v7, %v2444_v9 }
 0x6d5   : > { %v3567_v17 = vpack.c.bf16 %v2656_v0, %v2655_v13  ;;  %v2448_v36 = vpop.f32.mrb[124].mxu1 }
 0x6d6   : > { %v2661_v62 = vadd.f32 %v5729_v37, %v2448_v36  ;;  %v2450_v46 = vpop.f32.mrb[125].mxu1 }
 0x6d7   : > { %3238 = vst [vmem:[%s5433_s14 + $0xb8] sm:$0xff] %v3567_v17  ;;  %v2662_v49 = vadd.f32 %v5732_v7, %v2450_v46 }
 0x6d9   : > { %v3570_v4 = vpack.c.bf16 %v2662_v49, %v2661_v62  ;;  %v2454_v31 = vpop.f32.mrb[126].mxu1 }
 0x6da   : > { %v2667_v57 = vadd.f32 %v5729_v37, %v2454_v31  ;;  %v2456_v15 = vpop.f32.mrb[127].mxu1 }
 0x6db   : > { %3241 = vst [vmem:[%s5433_s14 + $0xd0] sm:$0xff] %v3570_v4  ;;  %v2668_v28 = vadd.f32 %v5732_v7, %v2456_v15 }
 0x6dd   : > { %v3573_v50 = vpack.c.bf16 %v2668_v28, %v2667_v57  ;;  %v2460_v38 = vpop.f32.mrb[128].mxu1 }
 0x6de   : > { %v2673_v39 = vadd.f32 %v5729_v37, %v2460_v38  ;;  %v2462_v32 = vpop.f32.mrb[129].mxu1 }
 0x6df   : > { %3244 = vst [vmem:[%s5433_s14 + $0xe8] sm:$0xff] %v3573_v50  ;;  %v2674_v23 = vadd.f32 %v5732_v7, %v2462_v32 }
 0x6e1   : > { %v3576_v54 = vpack.c.bf16 %v2674_v23, %v2673_v39  ;;  %v2466_v41 = vpop.f32.mrb[130].mxu1 }
 0x6e2   : > { %v2679_v1 = vadd.f32 %v5729_v37, %v2466_v41  ;;  %v2468_v52 = vpop.f32.mrb[131].mxu1 }
 0x6e3   : > { %3247 = vst [vmem:[%s5433_s14 + $0x100] sm:$0xff] %v3576_v54  ;;  %v2680_v6 = vadd.f32 %v5732_v7, %v2468_v52 }
 0x6e5   : > { %v3579_v20 = vpack.c.bf16 %v2680_v6, %v2679_v1  ;;  %v2472_v61 = vpop.f32.mrb[132].mxu1 }
 0x6e6   : > { %v2685_v12 = vadd.f32 %v5729_v37, %v2472_v61  ;;  %v2474_v35 = vpop.f32.mrb[133].mxu1 }
 0x6e7   : > { %3250 = vst [vmem:[%s5433_s14 + $0x118] sm:$0xff] %v3579_v20  ;;  %v2686_v11 = vadd.f32 %v5732_v7, %v2474_v35 }
 0x6e9   : > { %v3582_v22 = vpack.c.bf16 %v2686_v11, %v2685_v12  ;;  %v2478_v33 = vpop.f32.mrb[134].mxu1  ;;  %v3300_v11 = vld [vmem:[%s5433_s14 + $0x250] sm:$0x77] }
 0x6ea   : > { %v2691_v47 = vadd.f32 %v5729_v37, %v2478_v33  ;;  %v2480_v29 = vpop.f32.mrb[135].mxu1 }
 0x6eb   : > { %3253 = vst [vmem:[%s5433_s14 + $0x130] sm:$0xff] %v3582_v22  ;;  %v2692_v21 = vadd.f32 %v5732_v7, %v2480_v29 }
 0x6ed   : > { %v3585_v53 = vpack.c.bf16 %v2692_v21, %v2691_v47  ;;  %v2484_v16 = vpop.f32.mrb[136].mxu1 }
 0x6ee   : > { %v2697_v60 = vadd.f32 %v5729_v37, %v2484_v16  ;;  %v2486_v51 = vpop.f32.mrb[137].mxu1 }
 0x6ef   : > { %3256 = vst [vmem:[%s5433_s14 + $0x148] sm:$0xff] %v3585_v53  ;;  %v2698_v44 = vadd.f32 %v5732_v7, %v2486_v51 }
 0x6f1   : > { %v3588_v40 = vpack.c.bf16 %v2698_v44, %v2697_v60  ;;  %v2490_v24 = vpop.f32.mrb[138].mxu1 }
 0x6f2   : > { %v2703_v19 = vadd.f32 %v5729_v37, %v2490_v24  ;;  %v2492_v58 = vpop.f32.mrb[139].mxu1 }
 0x6f3   : > { %3259 = vst [vmem:[%s5433_s14 + $0x160] sm:$0xff] %v3588_v40  ;;  %v2704_v56 = vadd.f32 %v5732_v7, %v2492_v58 }
 0x6f5   : > { %v3591_v5 = vpack.c.bf16 %v2704_v56, %v2703_v19  ;;  %v2496_v30 = vpop.f32.mrb[140].mxu1 }
 0x6f6   : > { %v2709_v3 = vadd.f32 %v5729_v37, %v2496_v30  ;;  %v2498_v18 = vpop.f32.mrb[141].mxu1 }
 0x6f7   : > { %3262 = vst [vmem:[%s5433_s14 + $0x178] sm:$0xff] %v3591_v5  ;;  %v2710_v55 = vadd.f32 %v5732_v7, %v2498_v18 }
 0x6f9   : > { %v3594_v8 = vpack.c.bf16 %v2710_v55, %v2709_v3  ;;  %v2502_v26 = vpop.f32.mrb[142].mxu1 }
 0x6fa   : > { %v2715_v48 = vadd.f32 %v5729_v37, %v2502_v26  ;;  %v2504_v63 = vpop.f32.mrb[143].mxu1 }
 0x6fb   : > { %3265 = vst [vmem:[%s5433_s14 + $0x190] sm:$0xff] %v3594_v8  ;;  %v2716_v14 = vadd.f32 %v5732_v7, %v2504_v63 }
 0x6fd   : > { %v3597_v45 = vpack.c.bf16 %v2716_v14, %v2715_v48  ;;  %v2508_v59 = vpop.f32.mrb[144].mxu1 }
 0x6fe   : > { %v2721_v2 = vadd.f32 %v5729_v37, %v2508_v59  ;;  %v2510_v42 = vpop.f32.mrb[145].mxu1 }
 0x6ff   : > { %3268 = vst [vmem:[%s5433_s14 + $0x1a8] sm:$0xff] %v3597_v45  ;;  %v2722_v27 = vadd.f32 %v5732_v7, %v2510_v42 }
 0x701   : > { %v3600_v34 = vpack.c.bf16 %v2722_v27, %v2721_v2  ;;  %v2514_v10 = vpop.f32.mrb[146].mxu1 }
 0x702   : > { %v2727_v25 = vadd.f32 %v5729_v37, %v2514_v10  ;;  %v2516_v13 = vpop.f32.mrb[147].mxu1 }
 0x703   : > { %3271 = vst [vmem:[%s5433_s14 + $0x1c0] sm:$0xff] %v3600_v34  ;;  %v2728_v9 = vadd.f32 %v5732_v7, %v2516_v13 }
 0x705   : > { %v3603_v0 = vpack.c.bf16 %v2728_v9, %v2727_v25  ;;  %v2520_v17 = vpop.f32.mrb[148].mxu1 }
 0x706   : > { %v2733_v36 = vadd.f32 %v5729_v37, %v2520_v17  ;;  %v2522_v62 = vpop.f32.mrb[149].mxu1 }
 0x707   : > { %3274 = vst [vmem:[%s5433_s14 + $0x1d8] sm:$0xff] %v3603_v0  ;;  %v2734_v46 = vadd.f32 %v5732_v7, %v2522_v62 }
 0x709   : > { %v3606_v49 = vpack.c.bf16 %v2734_v46, %v2733_v36  ;;  %v2526_v4 = vpop.f32.mrb[150].mxu1 }
 0x70a   : > { %v2739_v31 = vadd.f32 %v5729_v37, %v2526_v4  ;;  %v2528_v57 = vpop.f32.mrb[151].mxu1 }
 0x70b   : > { %3277 = vst [vmem:[%s5433_s14 + $0x1f0] sm:$0xff] %v3606_v49  ;;  %v2740_v15 = vadd.f32 %v5732_v7, %v2528_v57 }
 0x70d   : > { %v3609_v28 = vpack.c.bf16 %v2740_v15, %v2739_v31  ;;  %v2532_v50 = vpop.f32.mrb[152].mxu1 }
 0x70e   : > { %v2745_v38 = vadd.f32 %v5729_v37, %v2532_v50  ;;  %v2534_v39 = vpop.f32.mrb[153].mxu1 }
 0x70f   : > { %3280 = vst [vmem:[%s5433_s14 + $0x208] sm:$0xff] %v3609_v28  ;;  %v2746_v32 = vadd.f32 %v5732_v7, %v2534_v39 }
 0x711   : > { %v3612_v23 = vpack.c.bf16 %v2746_v32, %v2745_v38  ;;  %v2538_v54 = vpop.f32.mrb[154].mxu1 }
 0x712   : > { %v2751_v41 = vadd.f32 %v5729_v37, %v2538_v54  ;;  %v2540_v1 = vpop.f32.mrb[155].mxu1 }
 0x713   : > { %3283 = vst [vmem:[%s5433_s14 + $0x220] sm:$0xff] %v3612_v23  ;;  %v2752_v52 = vadd.f32 %v5732_v7, %v2540_v1 }
 0x715   : > { %v3615_v6 = vpack.c.bf16 %v2752_v52, %v2751_v41  ;;  %v2544_v20 = vpop.f32.mrb[156].mxu1 }
 0x716   : > { %v2757_v61 = vadd.f32 %v5729_v37, %v2544_v20  ;;  %v2546_v12 = vpop.f32.mrb[157].mxu1 }
 0x717   : > { %3286 = vst [vmem:[%s5433_s14 + $0x238] sm:$0xff] %v3615_v6  ;;  %v2758_v35 = vadd.f32 %v5732_v7, %v2546_v12 }
 0x719   : > { %v3618_v22 = vpack.c.bf16 %v2758_v35, %v2757_v61  ;;  %v2550_v33 = vpop.f32.mrb[158].mxu1 }
 0x71a   : > { %v2551_v47 = vpop.f32.mrb[159].mxu1 }
 0x71b   : > { %v3301_v29 = vsel %vm5579_vm12, %v3618_v22, %v3300_v11 }
 0x71c   : > { %3302 = vst [vmem:[%s5433_s14 + $0x250] sm:$0x77] %v3301_v29 }
 0x71d   : > { %v2554_v21 = vpop.f32.mrb[160].mxu1 }
 0x71e   : > { %v2555_v53 = vpop.f32.mrb[161].mxu1 }
 0x721   : > { %v2558_v16 = vpop.f32.mrb[162].mxu1 }
 0x722   : > { %v2559_v60 = vpop.f32.mrb[163].mxu1 }
 0x725   : > { %v2562_v51 = vpop.f32.mrb[164].mxu1 }
 0x726   : > { %v2563_v44 = vpop.f32.mrb[165].mxu1 }
 0x729   : > { %v2566_v40 = vpop.f32.mrb[166].mxu1 }
 0x72a   : > { %v2567_v37 = vpop.f32.mrb[167].mxu1 }
 0x72d   : > { %v2570_v24 = vpop.f32.mrb[168].mxu1 }
 0x72e   : > { %v2571_v19 = vpop.f32.mrb[169].mxu1 }
 0x731   : > { %v2574_v58 = vpop.f32.mrb[170].mxu1 }
 0x732   : > { %v2575_v7 = vpop.f32.mrb[171].mxu1 }
 0x733 PF: > { %s18_s27 = sadd.s32 1, %s4127_s27  }
 0x734   : > { %p15_p4 = scmp.ge.s32.totalorder %s18_s27, 4  }
 0x736   :  { %17 = sbr.rel (!%p15_p4) target bundleno = 1 (0x1), region = 88 }

</bundles_post_ra>
